<compile_context>
chip_gen: v7x
topology: tpu7x:2x2x1
jax: 0.10.0
libtpu: 0.0.40
codegen_flags: <defaults>
</compile_context>

<pallas_src>
import math

import jax
import jax.numpy as jnp
from jax.experimental import pallas as pl
from jax.experimental.pallas import tpu as pltpu  # noqa: F401  (TPU backend)

# ---- small synthetic DistilBERT config ----
B = 2           # batch
S = 8           # sequence length
H = 128         # hidden size   (768 in real DistilBERT) — lane-dense
NH = 4          # attention heads
HD = H // NH    # head dim
FF = 256        # FFN inner dim (3072 in real DistilBERT)
LAYERS = 2      # encoder layers (6 in real DistilBERT)
VOCAB = 100
LABELS = 5
EPS = 1e-12
TB = 2 * B      # title + body stacked on the batch axis
SCALE = 1.0 / math.sqrt(HD)

# Row layout of the packed per-layer vector slab (LAYERS, NVEC, FF), f32.
# H-sized vectors live in lanes [:H]; the FFN lin1 bias uses the full FF row.
R_BQ, R_BK, R_BV, R_BO = 0, 1, 2, 3      # attention proj biases
R_G1, R_B1 = 4, 5                        # sa_layer_norm gamma / beta
R_BF1 = 6                                # FFN lin1 bias (full FF row)
R_BF2 = 7                                # FFN lin2 bias
R_G2, R_B2 = 8, 9                        # output_layer_norm gamma / beta
NVEC = 10

# Row layout of the small model-level vector slab (4, H), f32.
SV_EG, SV_EB, SV_F1B, SV_F2B = 0, 1, 2, 3


# ----------------------------- in-kernel helpers -----------------------------
def _ln(x, g, b):
    mean = jnp.mean(x, axis=-1, keepdims=True)
    var = jnp.mean((x - mean) ** 2, axis=-1, keepdims=True)
    return (x - mean) * jax.lax.rsqrt(var + EPS) * g + b


def _gelu(x):
    # TODO(synk): HF DistilBERT uses exact erf GELU; tanh approximation used here.
    c = math.sqrt(2.0 / math.pi)
    return 0.5 * x * (1.0 + jnp.tanh(c * (x + 0.044715 * x * x * x)))


# ----------------------------- fused model kernel -----------------------------
def model_kernel(emb_ref, mask_ref,
                 wqkv_ref, wo_ref, w1_ref, w2_ref,
                 lvec_ref, headw_ref, svec_ref,
                 o_ref):
    # Whole forward in a single invocation; everything is VMEM-resident.
    x = emb_ref[...].reshape(TB * S, H)                               # (TB*S, H) f32
    sv = svec_ref[...]                                                # (4, H)   f32

    x = _ln(x, sv[SV_EG:SV_EG + 1, :], sv[SV_EB:SV_EB + 1, :])        # embedding LN

    # Additive key mask, hoisted out of the layer loop.  Kept (rows, 1, S);
    # the (.., S, S) broadcast happens implicitly inside the add (no
    # materialized full bias tensor).  Tiled once over heads (leading axis).
    neg = (1.0 - mask_ref[...]) * (-1e9)                              # (TB, 1, S)
    neg_all = jnp.concatenate([neg] * NH, axis=0)                     # (NH*TB, 1, S)

    for l in range(LAYERS):                                           # static unroll
        lv = lvec_ref[l]                                              # (NVEC, FF) f32
        xb = x.astype(jnp.bfloat16)

        # --- fused QKV: one wide (H -> 3H) matmul, bf16 MXU inputs, f32 acc ---
        qkv = jnp.dot(xb, wqkv_ref[l], preferred_element_type=jnp.float32)
        # 128-aligned lane slices (tile-aligned, free); f32 attention scale on q.
        q = (qkv[:, 0:H] + lv[R_BQ:R_BQ + 1, :H]) * SCALE
        k = qkv[:, H:2 * H] + lv[R_BK:R_BK + 1, :H]
        v = qkv[:, 2 * H:3 * H] + lv[R_BV:R_BV + 1, :H]

        # --- head-batched attention: stack heads on the leading batch axis so
        # scores / softmax / context are single batched ops per layer. ---
        def heads(t):
            return jnp.concatenate(
                [t[:, h * HD:(h + 1) * HD].reshape(TB, S, HD) for h in range(NH)],
                axis=0)                                               # (NH*TB, S, HD)

        qh, kh, vh = heads(q), heads(k), heads(v)
        scores = jnp.einsum("bqd,bkd->bqk", qh, kh,
                            preferred_element_type=jnp.float32) + neg_all
        m = jnp.max(scores, axis=-1, keepdims=True)
        p = jnp.exp(scores - m)
        probs = p * pl.reciprocal(jnp.sum(p, axis=-1, keepdims=True), approx=True)
        ctx_h = jnp.einsum("bqk,bkd->bqd", probs, vh,
                           preferred_element_type=jnp.float32)        # (NH*TB, S, HD)
        # reassemble heads into lanes for the single wide output projection
        ctx = jnp.concatenate(
            [ctx_h[h * TB:(h + 1) * TB].reshape(TB * S, HD) for h in range(NH)],
            axis=-1)                                                  # (TB*S, H)
        attn = jnp.dot(ctx.astype(jnp.bfloat16), wo_ref[l],
                       preferred_element_type=jnp.float32) + lv[R_BO:R_BO + 1, :H]
        h1 = _ln(x + attn, lv[R_G1:R_G1 + 1, :H], lv[R_B1:R_B1 + 1, :H])

        # --- feed-forward ---
        f = _gelu(jnp.dot(h1.astype(jnp.bfloat16), w1_ref[l],
                          preferred_element_type=jnp.float32) + lv[R_BF1:R_BF1 + 1, :])
        f2 = jnp.dot(f.astype(jnp.bfloat16), w2_ref[l],
                     preferred_element_type=jnp.float32) + lv[R_BF2:R_BF2 + 1, :H]
        x = _ln(h1 + f2, lv[R_G2:R_G2 + 1, :H], lv[R_B2:R_B2 + 1, :H])

    # --- CLS extraction, title/body concat, classifier head (bf16 MXU, f32 acc) ---
    cls = x.reshape(TB, S, H)[:, 0, :]                                # (TB, H)
    full = jnp.concatenate([cls[:B], cls[B:]], axis=1)                # (B, 2H)
    # Dropout(0.3): identity at inference time.
    f1w = headw_ref[0:2 * H, :]                                       # (2H, H)  bf16
    f2w = headw_ref[2 * H:3 * H, :]                                   # (H, 128) bf16 (padded)
    mid = jnp.maximum(
        jnp.dot(full.astype(jnp.bfloat16), f1w,
                preferred_element_type=jnp.float32) + sv[SV_F1B:SV_F1B + 1, :], 0.0)
    # Lane-dense (B, 128) output; logits are lanes [:LABELS], sliced in wrapper.
    o_ref[...] = (jnp.dot(mid.astype(jnp.bfloat16), f2w,
                          preferred_element_type=jnp.float32)
                  + sv[SV_F2B:SV_F2B + 1, :])


# ----------------------------- wrapper -----------------------------
@jax.jit
def forward(title_ids, title_mask, body_ids, body_mask, params):
    # Stack title/body on the batch axis so the shared encoder runs once.
    ids = jnp.concatenate([title_ids, body_ids], axis=0)              # (2B, S)
    mask = jnp.concatenate([title_mask, body_mask], axis=0)           # (2B, S)
    # Embedding lookup (gather) stays in plain JAX glue.
    emb = params["word_emb"][ids] + params["pos_emb"][None, :, :]     # (2B, S, H)
    mask3 = mask.astype(jnp.float32).reshape(TB, 1, S)
    logits_pad = pl.pallas_call(
        model_kernel,
        out_shape=jax.ShapeDtypeStruct((B, 128), jnp.float32),        # lane-dense
    )(emb, mask3,
      params["wqkv"], params["wo"], params["w1"], params["w2"],
      params["lvec"], params["headw"], params["svec"])
    return logits_pad[:, :LABELS]


# ----------------------------- parameters -----------------------------
def init_params(key):
    keys = jax.random.split(key, 16)
    it = iter(keys)

    def nrm(shape, dtype=jnp.float32):
        return (0.02 * jax.random.normal(next(it), shape, jnp.float32)).astype(dtype)

    # Fused QKV weight slab (LAYERS, H, 3H), bf16 (MXU inputs).
    wq = nrm((LAYERS, H, H))
    wk = nrm((LAYERS, H, H))
    wv = nrm((LAYERS, H, H))
    wqkv = jnp.concatenate([wq, wk, wv], axis=-1).astype(jnp.bfloat16)

    # Packed per-layer bias / LayerNorm slab (biases zero, LN gammas one).
    lvec = jnp.zeros((LAYERS, NVEC, FF), jnp.float32)
    lvec = lvec.at[:, R_G1, :H].set(1.0)
    lvec = lvec.at[:, R_G2, :H].set(1.0)

    # Classifier head: feed1 (2H->H) and feed2 (H->LABELS, zero-padded to 128
    # output lanes for a lane-dense final store), stacked into one bf16 slab.
    f1w = nrm((2 * H, H), jnp.bfloat16)
    f2w = nrm((H, LABELS))
    f2w_pad = jnp.zeros((H, 128), jnp.float32).at[:, :LABELS].set(f2w)
    headw = jnp.concatenate([f1w, f2w_pad.astype(jnp.bfloat16)], axis=0)  # (3H, H)

    # Small model-level vectors: emb-LN gamma/beta, feed1 bias, feed2 bias (padded).
    svec = jnp.zeros((4, H), jnp.float32).at[SV_EG].set(1.0)

    params = {
        "word_emb": nrm((VOCAB, H)),
        "pos_emb": nrm((S, H)),
        "wqkv": wqkv,
        "wo": nrm((LAYERS, H, H), jnp.bfloat16),
        "w1": nrm((LAYERS, H, FF), jnp.bfloat16),
        "w2": nrm((LAYERS, FF, H), jnp.bfloat16),
        "lvec": lvec,
        "headw": headw,
        "svec": svec,
    }
    return params


if __name__ == "__main__":
    key = jax.random.PRNGKey(0)
    pkey, k1, k2 = jax.random.split(key, 3)
    params = init_params(pkey)

    title_ids = jax.random.randint(k1, (B, S), 0, VOCAB)
    body_ids = jax.random.randint(k2, (B, S), 0, VOCAB)
    title_mask = jnp.ones((B, S), jnp.float32).at[:, 6:].set(0.0)   # some padding
    body_mask = jnp.ones((B, S), jnp.float32)

    logits = forward(title_ids, title_mask, body_ids, body_mask, params)
    logits = jax.block_until_ready(logits)
    assert logits.shape == (B, LABELS) and logits.dtype == jnp.float32
    print("KERNEL_OK")
</pallas_src>

<mosaic_0001>
module attributes {stable_mosaic.version = 11 : i64} {
  func.func @model_kernel(%arg0: memref<4x8x128xf32, #tpu.memory_space<vmem>>, %arg1: memref<4x1x8xf32, #tpu.memory_space<vmem>>, %arg2: memref<2x128x384xbf16, #tpu.memory_space<vmem>>, %arg3: memref<2x128x128xbf16, #tpu.memory_space<vmem>>, %arg4: memref<2x128x256xbf16, #tpu.memory_space<vmem>>, %arg5: memref<2x256x128xbf16, #tpu.memory_space<vmem>>, %arg6: memref<2x10x256xf32, #tpu.memory_space<vmem>>, %arg7: memref<384x128xbf16, #tpu.memory_space<vmem>>, %arg8: memref<4x128xf32, #tpu.memory_space<vmem>>, %arg9: memref<2x128xf32, #tpu.memory_space<vmem>>) attributes {dimension_semantics = [], scalar_prefetch = 0 : i64, scratch_operands = 0 : i64, tpu.core_type = #tpu.core_type<tc>} {
    %c0 = arith.constant 0 : index
    %c0_0 = arith.constant 0 : index
    %c0_1 = arith.constant 0 : index
    %0 = vector.load %arg0[%c0, %c0_0, %c0_1] : memref<4x8x128xf32, #tpu.memory_space<vmem>>, vector<4x8x128xf32>
    %1 = vector.shape_cast %0 : vector<4x8x128xf32> to vector<32x128xf32>
    %c0_2 = arith.constant 0 : index
    %c0_3 = arith.constant 0 : index
    %2 = vector.load %arg8[%c0_2, %c0_3] : memref<4x128xf32, #tpu.memory_space<vmem>>, vector<4x128xf32>
    %3 = vector.extract_strided_slice %2 {offsets = [0, 0], sizes = [1, 128], strides = [1, 1]} : vector<4x128xf32> to vector<1x128xf32>
    %4 = vector.extract_strided_slice %2 {offsets = [1, 0], sizes = [1, 128], strides = [1, 1]} : vector<4x128xf32> to vector<1x128xf32>
    %cst = arith.constant dense<0.000000e+00> : vector<32xf32>
    %5 = vector.multi_reduction <add>, %1, %cst [1] : vector<32x128xf32> to vector<32xf32>
    %6 = vector.shape_cast %5 : vector<32xf32> to vector<32x1xf32>
    %cst_4 = arith.constant 1.280000e+02 : f32
    %7 = vector.broadcast %cst_4 : f32 to vector<32x1xf32>
    %8 = arith.divf %6, %7 : vector<32x1xf32>
    %9 = vector.broadcast %8 : vector<32x1xf32> to vector<32x128xf32>
    %10 = arith.subf %1, %9 : vector<32x128xf32>
    %11 = arith.mulf %10, %10 : vector<32x128xf32>
    %cst_5 = arith.constant dense<0.000000e+00> : vector<32xf32>
    %12 = vector.multi_reduction <add>, %11, %cst_5 [1] : vector<32x128xf32> to vector<32xf32>
    %13 = vector.shape_cast %12 : vector<32xf32> to vector<32x1xf32>
    %cst_6 = arith.constant 1.280000e+02 : f32
    %14 = vector.broadcast %cst_6 : f32 to vector<32x1xf32>
    %15 = arith.divf %13, %14 : vector<32x1xf32>
    %16 = vector.broadcast %8 : vector<32x1xf32> to vector<32x128xf32>
    %17 = arith.subf %1, %16 : vector<32x128xf32>
    %cst_7 = arith.constant 9.99999996E-13 : f32
    %18 = vector.broadcast %cst_7 : f32 to vector<32x1xf32>
    %19 = arith.addf %15, %18 : vector<32x1xf32>
    %20 = math.rsqrt %19 : vector<32x1xf32>
    %21 = vector.broadcast %20 : vector<32x1xf32> to vector<32x128xf32>
    %22 = arith.mulf %17, %21 : vector<32x128xf32>
    %23 = vector.broadcast %3 : vector<1x128xf32> to vector<32x128xf32>
    %24 = arith.mulf %22, %23 : vector<32x128xf32>
    %25 = vector.broadcast %4 : vector<1x128xf32> to vector<32x128xf32>
    %26 = arith.addf %24, %25 : vector<32x128xf32>
    %c0_8 = arith.constant 0 : index
    %c0_9 = arith.constant 0 : index
    %c0_10 = arith.constant 0 : index
    %27 = vector.load %arg1[%c0_8, %c0_9, %c0_10] : memref<4x1x8xf32, #tpu.memory_space<vmem>>, vector<4x1x8xf32>
    %cst_11 = arith.constant 1.000000e+00 : f32
    %28 = vector.broadcast %cst_11 : f32 to vector<4x1x8xf32>
    %29 = arith.subf %28, %27 : vector<4x1x8xf32>
    %cst_12 = arith.constant -1.000000e+09 : f32
    %30 = vector.broadcast %cst_12 : f32 to vector<4x1x8xf32>
    %31 = arith.mulf %29, %30 : vector<4x1x8xf32>
    %32 = tpu.concatenate %31, %31, %31, %31 in 0 : vector<4x1x8xf32>, vector<4x1x8xf32>, vector<4x1x8xf32>, vector<4x1x8xf32> -> vector<16x1x8xf32>
    %c0_13 = arith.constant 0 : index
    %c0_14 = arith.constant 0 : index
    %c0_15 = arith.constant 0 : index
    %33 = vector.load %arg6[%c0_13, %c0_14, %c0_15] : memref<2x10x256xf32, #tpu.memory_space<vmem>>, vector<1x10x256xf32>
    %34 = vector.shape_cast %33 : vector<1x10x256xf32> to vector<10x256xf32>
    %35 = arith.truncf %26 : vector<32x128xf32> to vector<32x128xbf16>
    %c0_16 = arith.constant 0 : index
    %c0_17 = arith.constant 0 : index
    %c0_18 = arith.constant 0 : index
    %36 = vector.load %arg2[%c0_16, %c0_17, %c0_18] : memref<2x128x384xbf16, #tpu.memory_space<vmem>>, vector<1x128x384xbf16>
    %37 = vector.shape_cast %36 : vector<1x128x384xbf16> to vector<128x384xbf16>
    %cst_19 = arith.constant dense<0.000000e+00> : vector<32x384xf32>
    %38 = tpu.matmul %35, %37, %cst_19 {dimension_numbers = #tpu.dot_dimension_numbers<[1], [0], [0], [1], [0, 0, 1, 1], [], []>} : vector<32x128xbf16>, vector<128x384xbf16>, vector<32x384xf32> -> vector<32x384xf32>
    %39 = vector.extract_strided_slice %38 {offsets = [0, 0], sizes = [32, 128], strides = [1, 1]} : vector<32x384xf32> to vector<32x128xf32>
    %40 = vector.extract_strided_slice %34 {offsets = [0, 0], sizes = [1, 128], strides = [1, 1]} : vector<10x256xf32> to vector<1x128xf32>
    %41 = vector.broadcast %40 : vector<1x128xf32> to vector<32x128xf32>
    %42 = arith.addf %39, %41 : vector<32x128xf32>
    %cst_20 = arith.constant 0.176776692 : f32
    %43 = vector.broadcast %cst_20 : f32 to vector<32x128xf32>
    %44 = arith.mulf %42, %43 : vector<32x128xf32>
    %45 = vector.extract_strided_slice %38 {offsets = [0, 128], sizes = [32, 128], strides = [1, 1]} : vector<32x384xf32> to vector<32x128xf32>
    %46 = vector.extract_strided_slice %34 {offsets = [1, 0], sizes = [1, 128], strides = [1, 1]} : vector<10x256xf32> to vector<1x128xf32>
    %47 = vector.broadcast %46 : vector<1x128xf32> to vector<32x128xf32>
    %48 = arith.addf %45, %47 : vector<32x128xf32>
    %49 = vector.extract_strided_slice %38 {offsets = [0, 256], sizes = [32, 128], strides = [1, 1]} : vector<32x384xf32> to vector<32x128xf32>
    %50 = vector.extract_strided_slice %34 {offsets = [2, 0], sizes = [1, 128], strides = [1, 1]} : vector<10x256xf32> to vector<1x128xf32>
    %51 = vector.broadcast %50 : vector<1x128xf32> to vector<32x128xf32>
    %52 = arith.addf %49, %51 : vector<32x128xf32>
    %53 = vector.extract_strided_slice %44 {offsets = [0, 0], sizes = [32, 32], strides = [1, 1]} : vector<32x128xf32> to vector<32x32xf32>
    %54 = vector.shape_cast %53 : vector<32x32xf32> to vector<4x8x32xf32>
    %55 = vector.extract_strided_slice %44 {offsets = [0, 32], sizes = [32, 32], strides = [1, 1]} : vector<32x128xf32> to vector<32x32xf32>
    %56 = vector.shape_cast %55 : vector<32x32xf32> to vector<4x8x32xf32>
    %57 = vector.extract_strided_slice %44 {offsets = [0, 64], sizes = [32, 32], strides = [1, 1]} : vector<32x128xf32> to vector<32x32xf32>
    %58 = vector.shape_cast %57 : vector<32x32xf32> to vector<4x8x32xf32>
    %59 = vector.extract_strided_slice %44 {offsets = [0, 96], sizes = [32, 32], strides = [1, 1]} : vector<32x128xf32> to vector<32x32xf32>
    %60 = vector.shape_cast %59 : vector<32x32xf32> to vector<4x8x32xf32>
    %61 = tpu.concatenate %54, %56, %58, %60 in 0 : vector<4x8x32xf32>, vector<4x8x32xf32>, vector<4x8x32xf32>, vector<4x8x32xf32> -> vector<16x8x32xf32>
    %62 = vector.extract_strided_slice %48 {offsets = [0, 0], sizes = [32, 32], strides = [1, 1]} : vector<32x128xf32> to vector<32x32xf32>
    %63 = vector.shape_cast %62 : vector<32x32xf32> to vector<4x8x32xf32>
    %64 = vector.extract_strided_slice %48 {offsets = [0, 32], sizes = [32, 32], strides = [1, 1]} : vector<32x128xf32> to vector<32x32xf32>
    %65 = vector.shape_cast %64 : vector<32x32xf32> to vector<4x8x32xf32>
    %66 = vector.extract_strided_slice %48 {offsets = [0, 64], sizes = [32, 32], strides = [1, 1]} : vector<32x128xf32> to vector<32x32xf32>
    %67 = vector.shape_cast %66 : vector<32x32xf32> to vector<4x8x32xf32>
    %68 = vector.extract_strided_slice %48 {offsets = [0, 96], sizes = [32, 32], strides = [1, 1]} : vector<32x128xf32> to vector<32x32xf32>
    %69 = vector.shape_cast %68 : vector<32x32xf32> to vector<4x8x32xf32>
    %70 = tpu.concatenate %63, %65, %67, %69 in 0 : vector<4x8x32xf32>, vector<4x8x32xf32>, vector<4x8x32xf32>, vector<4x8x32xf32> -> vector<16x8x32xf32>
    %71 = vector.extract_strided_slice %52 {offsets = [0, 0], sizes = [32, 32], strides = [1, 1]} : vector<32x128xf32> to vector<32x32xf32>
    %72 = vector.shape_cast %71 : vector<32x32xf32> to vector<4x8x32xf32>
    %73 = vector.extract_strided_slice %52 {offsets = [0, 32], sizes = [32, 32], strides = [1, 1]} : vector<32x128xf32> to vector<32x32xf32>
    %74 = vector.shape_cast %73 : vector<32x32xf32> to vector<4x8x32xf32>
    %75 = vector.extract_strided_slice %52 {offsets = [0, 64], sizes = [32, 32], strides = [1, 1]} : vector<32x128xf32> to vector<32x32xf32>
    %76 = vector.shape_cast %75 : vector<32x32xf32> to vector<4x8x32xf32>
    %77 = vector.extract_strided_slice %52 {offsets = [0, 96], sizes = [32, 32], strides = [1, 1]} : vector<32x128xf32> to vector<32x32xf32>
    %78 = vector.shape_cast %77 : vector<32x32xf32> to vector<4x8x32xf32>
    %79 = tpu.concatenate %72, %74, %76, %78 in 0 : vector<4x8x32xf32>, vector<4x8x32xf32>, vector<4x8x32xf32>, vector<4x8x32xf32> -> vector<16x8x32xf32>
    "tpu.trace_start"() <{level = 10 : i32, message = "bqd,bkd->bqk"}> : () -> ()
    %cst_21 = arith.constant dense<0.000000e+00> : vector<16x8x8xf32>
    %80 = tpu.matmul %61, %70, %cst_21 {dimension_numbers = #tpu.dot_dimension_numbers<[2], [2], [1], [1], [0, 0, 0, 1, 1, 1], [0], [0]>} : vector<16x8x32xf32>, vector<16x8x32xf32>, vector<16x8x8xf32> -> vector<16x8x8xf32>
    "tpu.trace_stop"() : () -> ()
    %81 = vector.broadcast %32 : vector<16x1x8xf32> to vector<16x8x8xf32>
    %82 = arith.addf %80, %81 : vector<16x8x8xf32>
    %cst_22 = arith.constant dense<0xFF800000> : vector<16x8xf32>
    %83 = vector.multi_reduction <maximumf>, %82, %cst_22 [2] : vector<16x8x8xf32> to vector<16x8xf32>
    %84 = vector.shape_cast %83 : vector<16x8xf32> to vector<16x8x1xf32>
    %85 = vector.broadcast %84 : vector<16x8x1xf32> to vector<16x8x8xf32>
    %86 = arith.subf %82, %85 : vector<16x8x8xf32>
    %87 = math.exp %86 : vector<16x8x8xf32>
    %cst_23 = arith.constant dense<0.000000e+00> : vector<16x8xf32>
    %88 = vector.multi_reduction <add>, %87, %cst_23 [2] : vector<16x8x8xf32> to vector<16x8xf32>
    %89 = vector.shape_cast %88 : vector<16x8xf32> to vector<16x8x1xf32>
    %90 = tpu.reciprocal %89 {approx = true} : vector<16x8x1xf32> -> vector<16x8x1xf32>
    %91 = vector.broadcast %90 : vector<16x8x1xf32> to vector<16x8x8xf32>
    %92 = arith.mulf %87, %91 : vector<16x8x8xf32>
    "tpu.trace_start"() <{level = 10 : i32, message = "bqk,bkd->bqd"}> : () -> ()
    %cst_24 = arith.constant dense<0.000000e+00> : vector<16x8x32xf32>
    %93 = tpu.matmul %92, %79, %cst_24 {dimension_numbers = #tpu.dot_dimension_numbers<[2], [1], [1], [2], [0, 0, 0, 1, 1, 2], [0], [0]>} : vector<16x8x8xf32>, vector<16x8x32xf32>, vector<16x8x32xf32> -> vector<16x8x32xf32>
    "tpu.trace_stop"() : () -> ()
    %94 = vector.extract_strided_slice %93 {offsets = [0, 0, 0], sizes = [4, 8, 32], strides = [1, 1, 1]} : vector<16x8x32xf32> to vector<4x8x32xf32>
    %95 = vector.shape_cast %94 : vector<4x8x32xf32> to vector<32x32xf32>
    %96 = vector.extract_strided_slice %93 {offsets = [4, 0, 0], sizes = [4, 8, 32], strides = [1, 1, 1]} : vector<16x8x32xf32> to vector<4x8x32xf32>
    %97 = vector.shape_cast %96 : vector<4x8x32xf32> to vector<32x32xf32>
    %98 = vector.extract_strided_slice %93 {offsets = [8, 0, 0], sizes = [4, 8, 32], strides = [1, 1, 1]} : vector<16x8x32xf32> to vector<4x8x32xf32>
    %99 = vector.shape_cast %98 : vector<4x8x32xf32> to vector<32x32xf32>
    %100 = vector.extract_strided_slice %93 {offsets = [12, 0, 0], sizes = [4, 8, 32], strides = [1, 1, 1]} : vector<16x8x32xf32> to vector<4x8x32xf32>
    %101 = vector.shape_cast %100 : vector<4x8x32xf32> to vector<32x32xf32>
    %102 = tpu.concatenate %95, %97, %99, %101 in 1 : vector<32x32xf32>, vector<32x32xf32>, vector<32x32xf32>, vector<32x32xf32> -> vector<32x128xf32>
    %103 = arith.truncf %102 : vector<32x128xf32> to vector<32x128xbf16>
    %c0_25 = arith.constant 0 : index
    %c0_26 = arith.constant 0 : index
    %c0_27 = arith.constant 0 : index
    %104 = vector.load %arg3[%c0_25, %c0_26, %c0_27] : memref<2x128x128xbf16, #tpu.memory_space<vmem>>, vector<1x128x128xbf16>
    %105 = vector.shape_cast %104 : vector<1x128x128xbf16> to vector<128x128xbf16>
    %cst_28 = arith.constant dense<0.000000e+00> : vector<32x128xf32>
    %106 = tpu.matmul %103, %105, %cst_28 {dimension_numbers = #tpu.dot_dimension_numbers<[1], [0], [0], [1], [0, 0, 1, 1], [], []>} : vector<32x128xbf16>, vector<128x128xbf16>, vector<32x128xf32> -> vector<32x128xf32>
    %107 = vector.extract_strided_slice %34 {offsets = [3, 0], sizes = [1, 128], strides = [1, 1]} : vector<10x256xf32> to vector<1x128xf32>
    %108 = vector.broadcast %107 : vector<1x128xf32> to vector<32x128xf32>
    %109 = arith.addf %106, %108 : vector<32x128xf32>
    %110 = arith.addf %26, %109 : vector<32x128xf32>
    %111 = vector.extract_strided_slice %34 {offsets = [4, 0], sizes = [1, 128], strides = [1, 1]} : vector<10x256xf32> to vector<1x128xf32>
    %112 = vector.extract_strided_slice %34 {offsets = [5, 0], sizes = [1, 128], strides = [1, 1]} : vector<10x256xf32> to vector<1x128xf32>
    %cst_29 = arith.constant dense<0.000000e+00> : vector<32xf32>
    %113 = vector.multi_reduction <add>, %110, %cst_29 [1] : vector<32x128xf32> to vector<32xf32>
    %114 = vector.shape_cast %113 : vector<32xf32> to vector<32x1xf32>
    %cst_30 = arith.constant 1.280000e+02 : f32
    %115 = vector.broadcast %cst_30 : f32 to vector<32x1xf32>
    %116 = arith.divf %114, %115 : vector<32x1xf32>
    %117 = vector.broadcast %116 : vector<32x1xf32> to vector<32x128xf32>
    %118 = arith.subf %110, %117 : vector<32x128xf32>
    %119 = arith.mulf %118, %118 : vector<32x128xf32>
    %cst_31 = arith.constant dense<0.000000e+00> : vector<32xf32>
    %120 = vector.multi_reduction <add>, %119, %cst_31 [1] : vector<32x128xf32> to vector<32xf32>
    %121 = vector.shape_cast %120 : vector<32xf32> to vector<32x1xf32>
    %cst_32 = arith.constant 1.280000e+02 : f32
    %122 = vector.broadcast %cst_32 : f32 to vector<32x1xf32>
    %123 = arith.divf %121, %122 : vector<32x1xf32>
    %124 = vector.broadcast %116 : vector<32x1xf32> to vector<32x128xf32>
    %125 = arith.subf %110, %124 : vector<32x128xf32>
    %cst_33 = arith.constant 9.99999996E-13 : f32
    %126 = vector.broadcast %cst_33 : f32 to vector<32x1xf32>
    %127 = arith.addf %123, %126 : vector<32x1xf32>
    %128 = math.rsqrt %127 : vector<32x1xf32>
    %129 = vector.broadcast %128 : vector<32x1xf32> to vector<32x128xf32>
    %130 = arith.mulf %125, %129 : vector<32x128xf32>
    %131 = vector.broadcast %111 : vector<1x128xf32> to vector<32x128xf32>
    %132 = arith.mulf %130, %131 : vector<32x128xf32>
    %133 = vector.broadcast %112 : vector<1x128xf32> to vector<32x128xf32>
    %134 = arith.addf %132, %133 : vector<32x128xf32>
    %135 = arith.truncf %134 : vector<32x128xf32> to vector<32x128xbf16>
    %c0_34 = arith.constant 0 : index
    %c0_35 = arith.constant 0 : index
    %c0_36 = arith.constant 0 : index
    %136 = vector.load %arg4[%c0_34, %c0_35, %c0_36] : memref<2x128x256xbf16, #tpu.memory_space<vmem>>, vector<1x128x256xbf16>
    %137 = vector.shape_cast %136 : vector<1x128x256xbf16> to vector<128x256xbf16>
    %cst_37 = arith.constant dense<0.000000e+00> : vector<32x256xf32>
    %138 = tpu.matmul %135, %137, %cst_37 {dimension_numbers = #tpu.dot_dimension_numbers<[1], [0], [0], [1], [0, 0, 1, 1], [], []>} : vector<32x128xbf16>, vector<128x256xbf16>, vector<32x256xf32> -> vector<32x256xf32>
    %139 = vector.extract_strided_slice %34 {offsets = [6, 0], sizes = [1, 256], strides = [1, 1]} : vector<10x256xf32> to vector<1x256xf32>
    %140 = vector.broadcast %139 : vector<1x256xf32> to vector<32x256xf32>
    %141 = arith.addf %138, %140 : vector<32x256xf32>
    %cst_38 = arith.constant 5.000000e-01 : f32
    %142 = vector.broadcast %cst_38 : f32 to vector<32x256xf32>
    %143 = arith.mulf %142, %141 : vector<32x256xf32>
    %cst_39 = arith.constant 4.471500e-02 : f32
    %144 = vector.broadcast %cst_39 : f32 to vector<32x256xf32>
    %145 = arith.mulf %144, %141 : vector<32x256xf32>
    %146 = arith.mulf %145, %141 : vector<32x256xf32>
    %147 = arith.mulf %146, %141 : vector<32x256xf32>
    %148 = arith.addf %141, %147 : vector<32x256xf32>
    %cst_40 = arith.constant 0.797884583 : f32
    %149 = vector.broadcast %cst_40 : f32 to vector<32x256xf32>
    %150 = arith.mulf %149, %148 : vector<32x256xf32>
    %151 = math.tanh %150 : vector<32x256xf32>
    %cst_41 = arith.constant 1.000000e+00 : f32
    %152 = vector.broadcast %cst_41 : f32 to vector<32x256xf32>
    %153 = arith.addf %152, %151 : vector<32x256xf32>
    %154 = arith.mulf %143, %153 : vector<32x256xf32>
    %155 = arith.truncf %154 : vector<32x256xf32> to vector<32x256xbf16>
    %c0_42 = arith.constant 0 : index
    %c0_43 = arith.constant 0 : index
    %c0_44 = arith.constant 0 : index
    %156 = vector.load %arg5[%c0_42, %c0_43, %c0_44] : memref<2x256x128xbf16, #tpu.memory_space<vmem>>, vector<1x256x128xbf16>
    %157 = vector.shape_cast %156 : vector<1x256x128xbf16> to vector<256x128xbf16>
    %cst_45 = arith.constant dense<0.000000e+00> : vector<32x128xf32>
    %158 = tpu.matmul %155, %157, %cst_45 {dimension_numbers = #tpu.dot_dimension_numbers<[1], [0], [0], [1], [0, 0, 1, 1], [], []>} : vector<32x256xbf16>, vector<256x128xbf16>, vector<32x128xf32> -> vector<32x128xf32>
    %159 = vector.extract_strided_slice %34 {offsets = [7, 0], sizes = [1, 128], strides = [1, 1]} : vector<10x256xf32> to vector<1x128xf32>
    %160 = vector.broadcast %159 : vector<1x128xf32> to vector<32x128xf32>
    %161 = arith.addf %158, %160 : vector<32x128xf32>
    %162 = arith.addf %134, %161 : vector<32x128xf32>
    %163 = vector.extract_strided_slice %34 {offsets = [8, 0], sizes = [1, 128], strides = [1, 1]} : vector<10x256xf32> to vector<1x128xf32>
    %164 = vector.extract_strided_slice %34 {offsets = [9, 0], sizes = [1, 128], strides = [1, 1]} : vector<10x256xf32> to vector<1x128xf32>
    %cst_46 = arith.constant dense<0.000000e+00> : vector<32xf32>
    %165 = vector.multi_reduction <add>, %162, %cst_46 [1] : vector<32x128xf32> to vector<32xf32>
    %166 = vector.shape_cast %165 : vector<32xf32> to vector<32x1xf32>
    %cst_47 = arith.constant 1.280000e+02 : f32
    %167 = vector.broadcast %cst_47 : f32 to vector<32x1xf32>
    %168 = arith.divf %166, %167 : vector<32x1xf32>
    %169 = vector.broadcast %168 : vector<32x1xf32> to vector<32x128xf32>
    %170 = arith.subf %162, %169 : vector<32x128xf32>
    %171 = arith.mulf %170, %170 : vector<32x128xf32>
    %cst_48 = arith.constant dense<0.000000e+00> : vector<32xf32>
    %172 = vector.multi_reduction <add>, %171, %cst_48 [1] : vector<32x128xf32> to vector<32xf32>
    %173 = vector.shape_cast %172 : vector<32xf32> to vector<32x1xf32>
    %cst_49 = arith.constant 1.280000e+02 : f32
    %174 = vector.broadcast %cst_49 : f32 to vector<32x1xf32>
    %175 = arith.divf %173, %174 : vector<32x1xf32>
    %176 = vector.broadcast %168 : vector<32x1xf32> to vector<32x128xf32>
    %177 = arith.subf %162, %176 : vector<32x128xf32>
    %cst_50 = arith.constant 9.99999996E-13 : f32
    %178 = vector.broadcast %cst_50 : f32 to vector<32x1xf32>
    %179 = arith.addf %175, %178 : vector<32x1xf32>
    %180 = math.rsqrt %179 : vector<32x1xf32>
    %181 = vector.broadcast %180 : vector<32x1xf32> to vector<32x128xf32>
    %182 = arith.mulf %177, %181 : vector<32x128xf32>
    %183 = vector.broadcast %163 : vector<1x128xf32> to vector<32x128xf32>
    %184 = arith.mulf %182, %183 : vector<32x128xf32>
    %185 = vector.broadcast %164 : vector<1x128xf32> to vector<32x128xf32>
    %186 = arith.addf %184, %185 : vector<32x128xf32>
    %c1 = arith.constant 1 : index
    %c0_51 = arith.constant 0 : index
    %c0_52 = arith.constant 0 : index
    %187 = vector.load %arg6[%c1, %c0_51, %c0_52] : memref<2x10x256xf32, #tpu.memory_space<vmem>>, vector<1x10x256xf32>
    %188 = vector.shape_cast %187 : vector<1x10x256xf32> to vector<10x256xf32>
    %189 = arith.truncf %186 : vector<32x128xf32> to vector<32x128xbf16>
    %c1_53 = arith.constant 1 : index
    %c0_54 = arith.constant 0 : index
    %c0_55 = arith.constant 0 : index
    %190 = vector.load %arg2[%c1_53, %c0_54, %c0_55] : memref<2x128x384xbf16, #tpu.memory_space<vmem>>, vector<1x128x384xbf16>
    %191 = vector.shape_cast %190 : vector<1x128x384xbf16> to vector<128x384xbf16>
    %cst_56 = arith.constant dense<0.000000e+00> : vector<32x384xf32>
    %192 = tpu.matmul %189, %191, %cst_56 {dimension_numbers = #tpu.dot_dimension_numbers<[1], [0], [0], [1], [0, 0, 1, 1], [], []>} : vector<32x128xbf16>, vector<128x384xbf16>, vector<32x384xf32> -> vector<32x384xf32>
    %193 = vector.extract_strided_slice %192 {offsets = [0, 0], sizes = [32, 128], strides = [1, 1]} : vector<32x384xf32> to vector<32x128xf32>
    %194 = vector.extract_strided_slice %188 {offsets = [0, 0], sizes = [1, 128], strides = [1, 1]} : vector<10x256xf32> to vector<1x128xf32>
    %195 = vector.broadcast %194 : vector<1x128xf32> to vector<32x128xf32>
    %196 = arith.addf %193, %195 : vector<32x128xf32>
    %cst_57 = arith.constant 0.176776692 : f32
    %197 = vector.broadcast %cst_57 : f32 to vector<32x128xf32>
    %198 = arith.mulf %196, %197 : vector<32x128xf32>
    %199 = vector.extract_strided_slice %192 {offsets = [0, 128], sizes = [32, 128], strides = [1, 1]} : vector<32x384xf32> to vector<32x128xf32>
    %200 = vector.extract_strided_slice %188 {offsets = [1, 0], sizes = [1, 128], strides = [1, 1]} : vector<10x256xf32> to vector<1x128xf32>
    %201 = vector.broadcast %200 : vector<1x128xf32> to vector<32x128xf32>
    %202 = arith.addf %199, %201 : vector<32x128xf32>
    %203 = vector.extract_strided_slice %192 {offsets = [0, 256], sizes = [32, 128], strides = [1, 1]} : vector<32x384xf32> to vector<32x128xf32>
    %204 = vector.extract_strided_slice %188 {offsets = [2, 0], sizes = [1, 128], strides = [1, 1]} : vector<10x256xf32> to vector<1x128xf32>
    %205 = vector.broadcast %204 : vector<1x128xf32> to vector<32x128xf32>
    %206 = arith.addf %203, %205 : vector<32x128xf32>
    %207 = vector.extract_strided_slice %198 {offsets = [0, 0], sizes = [32, 32], strides = [1, 1]} : vector<32x128xf32> to vector<32x32xf32>
    %208 = vector.shape_cast %207 : vector<32x32xf32> to vector<4x8x32xf32>
    %209 = vector.extract_strided_slice %198 {offsets = [0, 32], sizes = [32, 32], strides = [1, 1]} : vector<32x128xf32> to vector<32x32xf32>
    %210 = vector.shape_cast %209 : vector<32x32xf32> to vector<4x8x32xf32>
    %211 = vector.extract_strided_slice %198 {offsets = [0, 64], sizes = [32, 32], strides = [1, 1]} : vector<32x128xf32> to vector<32x32xf32>
    %212 = vector.shape_cast %211 : vector<32x32xf32> to vector<4x8x32xf32>
    %213 = vector.extract_strided_slice %198 {offsets = [0, 96], sizes = [32, 32], strides = [1, 1]} : vector<32x128xf32> to vector<32x32xf32>
    %214 = vector.shape_cast %213 : vector<32x32xf32> to vector<4x8x32xf32>
    %215 = tpu.concatenate %208, %210, %212, %214 in 0 : vector<4x8x32xf32>, vector<4x8x32xf32>, vector<4x8x32xf32>, vector<4x8x32xf32> -> vector<16x8x32xf32>
    %216 = vector.extract_strided_slice %202 {offsets = [0, 0], sizes = [32, 32], strides = [1, 1]} : vector<32x128xf32> to vector<32x32xf32>
    %217 = vector.shape_cast %216 : vector<32x32xf32> to vector<4x8x32xf32>
    %218 = vector.extract_strided_slice %202 {offsets = [0, 32], sizes = [32, 32], strides = [1, 1]} : vector<32x128xf32> to vector<32x32xf32>
    %219 = vector.shape_cast %218 : vector<32x32xf32> to vector<4x8x32xf32>
    %220 = vector.extract_strided_slice %202 {offsets = [0, 64], sizes = [32, 32], strides = [1, 1]} : vector<32x128xf32> to vector<32x32xf32>
    %221 = vector.shape_cast %220 : vector<32x32xf32> to vector<4x8x32xf32>
    %222 = vector.extract_strided_slice %202 {offsets = [0, 96], sizes = [32, 32], strides = [1, 1]} : vector<32x128xf32> to vector<32x32xf32>
    %223 = vector.shape_cast %222 : vector<32x32xf32> to vector<4x8x32xf32>
    %224 = tpu.concatenate %217, %219, %221, %223 in 0 : vector<4x8x32xf32>, vector<4x8x32xf32>, vector<4x8x32xf32>, vector<4x8x32xf32> -> vector<16x8x32xf32>
    %225 = vector.extract_strided_slice %206 {offsets = [0, 0], sizes = [32, 32], strides = [1, 1]} : vector<32x128xf32> to vector<32x32xf32>
    %226 = vector.shape_cast %225 : vector<32x32xf32> to vector<4x8x32xf32>
    %227 = vector.extract_strided_slice %206 {offsets = [0, 32], sizes = [32, 32], strides = [1, 1]} : vector<32x128xf32> to vector<32x32xf32>
    %228 = vector.shape_cast %227 : vector<32x32xf32> to vector<4x8x32xf32>
    %229 = vector.extract_strided_slice %206 {offsets = [0, 64], sizes = [32, 32], strides = [1, 1]} : vector<32x128xf32> to vector<32x32xf32>
    %230 = vector.shape_cast %229 : vector<32x32xf32> to vector<4x8x32xf32>
    %231 = vector.extract_strided_slice %206 {offsets = [0, 96], sizes = [32, 32], strides = [1, 1]} : vector<32x128xf32> to vector<32x32xf32>
    %232 = vector.shape_cast %231 : vector<32x32xf32> to vector<4x8x32xf32>
    %233 = tpu.concatenate %226, %228, %230, %232 in 0 : vector<4x8x32xf32>, vector<4x8x32xf32>, vector<4x8x32xf32>, vector<4x8x32xf32> -> vector<16x8x32xf32>
    "tpu.trace_start"() <{level = 10 : i32, message = "bqd,bkd->bqk"}> : () -> ()
    %cst_58 = arith.constant dense<0.000000e+00> : vector<16x8x8xf32>
    %234 = tpu.matmul %215, %224, %cst_58 {dimension_numbers = #tpu.dot_dimension_numbers<[2], [2], [1], [1], [0, 0, 0, 1, 1, 1], [0], [0]>} : vector<16x8x32xf32>, vector<16x8x32xf32>, vector<16x8x8xf32> -> vector<16x8x8xf32>
    "tpu.trace_stop"() : () -> ()
    %235 = vector.broadcast %32 : vector<16x1x8xf32> to vector<16x8x8xf32>
    %236 = arith.addf %234, %235 : vector<16x8x8xf32>
    %cst_59 = arith.constant dense<0xFF800000> : vector<16x8xf32>
    %237 = vector.multi_reduction <maximumf>, %236, %cst_59 [2] : vector<16x8x8xf32> to vector<16x8xf32>
    %238 = vector.shape_cast %237 : vector<16x8xf32> to vector<16x8x1xf32>
    %239 = vector.broadcast %238 : vector<16x8x1xf32> to vector<16x8x8xf32>
    %240 = arith.subf %236, %239 : vector<16x8x8xf32>
    %241 = math.exp %240 : vector<16x8x8xf32>
    %cst_60 = arith.constant dense<0.000000e+00> : vector<16x8xf32>
    %242 = vector.multi_reduction <add>, %241, %cst_60 [2] : vector<16x8x8xf32> to vector<16x8xf32>
    %243 = vector.shape_cast %242 : vector<16x8xf32> to vector<16x8x1xf32>
    %244 = tpu.reciprocal %243 {approx = true} : vector<16x8x1xf32> -> vector<16x8x1xf32>
    %245 = vector.broadcast %244 : vector<16x8x1xf32> to vector<16x8x8xf32>
    %246 = arith.mulf %241, %245 : vector<16x8x8xf32>
    "tpu.trace_start"() <{level = 10 : i32, message = "bqk,bkd->bqd"}> : () -> ()
    %cst_61 = arith.constant dense<0.000000e+00> : vector<16x8x32xf32>
    %247 = tpu.matmul %246, %233, %cst_61 {dimension_numbers = #tpu.dot_dimension_numbers<[2], [1], [1], [2], [0, 0, 0, 1, 1, 2], [0], [0]>} : vector<16x8x8xf32>, vector<16x8x32xf32>, vector<16x8x32xf32> -> vector<16x8x32xf32>
    "tpu.trace_stop"() : () -> ()
    %248 = vector.extract_strided_slice %247 {offsets = [0, 0, 0], sizes = [4, 8, 32], strides = [1, 1, 1]} : vector<16x8x32xf32> to vector<4x8x32xf32>
    %249 = vector.shape_cast %248 : vector<4x8x32xf32> to vector<32x32xf32>
    %250 = vector.extract_strided_slice %247 {offsets = [4, 0, 0], sizes = [4, 8, 32], strides = [1, 1, 1]} : vector<16x8x32xf32> to vector<4x8x32xf32>
    %251 = vector.shape_cast %250 : vector<4x8x32xf32> to vector<32x32xf32>
    %252 = vector.extract_strided_slice %247 {offsets = [8, 0, 0], sizes = [4, 8, 32], strides = [1, 1, 1]} : vector<16x8x32xf32> to vector<4x8x32xf32>
    %253 = vector.shape_cast %252 : vector<4x8x32xf32> to vector<32x32xf32>
    %254 = vector.extract_strided_slice %247 {offsets = [12, 0, 0], sizes = [4, 8, 32], strides = [1, 1, 1]} : vector<16x8x32xf32> to vector<4x8x32xf32>
    %255 = vector.shape_cast %254 : vector<4x8x32xf32> to vector<32x32xf32>
    %256 = tpu.concatenate %249, %251, %253, %255 in 1 : vector<32x32xf32>, vector<32x32xf32>, vector<32x32xf32>, vector<32x32xf32> -> vector<32x128xf32>
    %257 = arith.truncf %256 : vector<32x128xf32> to vector<32x128xbf16>
    %c1_62 = arith.constant 1 : index
    %c0_63 = arith.constant 0 : index
    %c0_64 = arith.constant 0 : index
    %258 = vector.load %arg3[%c1_62, %c0_63, %c0_64] : memref<2x128x128xbf16, #tpu.memory_space<vmem>>, vector<1x128x128xbf16>
    %259 = vector.shape_cast %258 : vector<1x128x128xbf16> to vector<128x128xbf16>
    %cst_65 = arith.constant dense<0.000000e+00> : vector<32x128xf32>
    %260 = tpu.matmul %257, %259, %cst_65 {dimension_numbers = #tpu.dot_dimension_numbers<[1], [0], [0], [1], [0, 0, 1, 1], [], []>} : vector<32x128xbf16>, vector<128x128xbf16>, vector<32x128xf32> -> vector<32x128xf32>
    %261 = vector.extract_strided_slice %188 {offsets = [3, 0], sizes = [1, 128], strides = [1, 1]} : vector<10x256xf32> to vector<1x128xf32>
    %262 = vector.broadcast %261 : vector<1x128xf32> to vector<32x128xf32>
    %263 = arith.addf %260, %262 : vector<32x128xf32>
    %264 = arith.addf %186, %263 : vector<32x128xf32>
    %265 = vector.extract_strided_slice %188 {offsets = [4, 0], sizes = [1, 128], strides = [1, 1]} : vector<10x256xf32> to vector<1x128xf32>
    %266 = vector.extract_strided_slice %188 {offsets = [5, 0], sizes = [1, 128], strides = [1, 1]} : vector<10x256xf32> to vector<1x128xf32>
    %cst_66 = arith.constant dense<0.000000e+00> : vector<32xf32>
    %267 = vector.multi_reduction <add>, %264, %cst_66 [1] : vector<32x128xf32> to vector<32xf32>
    %268 = vector.shape_cast %267 : vector<32xf32> to vector<32x1xf32>
    %cst_67 = arith.constant 1.280000e+02 : f32
    %269 = vector.broadcast %cst_67 : f32 to vector<32x1xf32>
    %270 = arith.divf %268, %269 : vector<32x1xf32>
    %271 = vector.broadcast %270 : vector<32x1xf32> to vector<32x128xf32>
    %272 = arith.subf %264, %271 : vector<32x128xf32>
    %273 = arith.mulf %272, %272 : vector<32x128xf32>
    %cst_68 = arith.constant dense<0.000000e+00> : vector<32xf32>
    %274 = vector.multi_reduction <add>, %273, %cst_68 [1] : vector<32x128xf32> to vector<32xf32>
    %275 = vector.shape_cast %274 : vector<32xf32> to vector<32x1xf32>
    %cst_69 = arith.constant 1.280000e+02 : f32
    %276 = vector.broadcast %cst_69 : f32 to vector<32x1xf32>
    %277 = arith.divf %275, %276 : vector<32x1xf32>
    %278 = vector.broadcast %270 : vector<32x1xf32> to vector<32x128xf32>
    %279 = arith.subf %264, %278 : vector<32x128xf32>
    %cst_70 = arith.constant 9.99999996E-13 : f32
    %280 = vector.broadcast %cst_70 : f32 to vector<32x1xf32>
    %281 = arith.addf %277, %280 : vector<32x1xf32>
    %282 = math.rsqrt %281 : vector<32x1xf32>
    %283 = vector.broadcast %282 : vector<32x1xf32> to vector<32x128xf32>
    %284 = arith.mulf %279, %283 : vector<32x128xf32>
    %285 = vector.broadcast %265 : vector<1x128xf32> to vector<32x128xf32>
    %286 = arith.mulf %284, %285 : vector<32x128xf32>
    %287 = vector.broadcast %266 : vector<1x128xf32> to vector<32x128xf32>
    %288 = arith.addf %286, %287 : vector<32x128xf32>
    %289 = arith.truncf %288 : vector<32x128xf32> to vector<32x128xbf16>
    %c1_71 = arith.constant 1 : index
    %c0_72 = arith.constant 0 : index
    %c0_73 = arith.constant 0 : index
    %290 = vector.load %arg4[%c1_71, %c0_72, %c0_73] : memref<2x128x256xbf16, #tpu.memory_space<vmem>>, vector<1x128x256xbf16>
    %291 = vector.shape_cast %290 : vector<1x128x256xbf16> to vector<128x256xbf16>
    %cst_74 = arith.constant dense<0.000000e+00> : vector<32x256xf32>
    %292 = tpu.matmul %289, %291, %cst_74 {dimension_numbers = #tpu.dot_dimension_numbers<[1], [0], [0], [1], [0, 0, 1, 1], [], []>} : vector<32x128xbf16>, vector<128x256xbf16>, vector<32x256xf32> -> vector<32x256xf32>
    %293 = vector.extract_strided_slice %188 {offsets = [6, 0], sizes = [1, 256], strides = [1, 1]} : vector<10x256xf32> to vector<1x256xf32>
    %294 = vector.broadcast %293 : vector<1x256xf32> to vector<32x256xf32>
    %295 = arith.addf %292, %294 : vector<32x256xf32>
    %cst_75 = arith.constant 5.000000e-01 : f32
    %296 = vector.broadcast %cst_75 : f32 to vector<32x256xf32>
    %297 = arith.mulf %296, %295 : vector<32x256xf32>
    %cst_76 = arith.constant 4.471500e-02 : f32
    %298 = vector.broadcast %cst_76 : f32 to vector<32x256xf32>
    %299 = arith.mulf %298, %295 : vector<32x256xf32>
    %300 = arith.mulf %299, %295 : vector<32x256xf32>
    %301 = arith.mulf %300, %295 : vector<32x256xf32>
    %302 = arith.addf %295, %301 : vector<32x256xf32>
    %cst_77 = arith.constant 0.797884583 : f32
    %303 = vector.broadcast %cst_77 : f32 to vector<32x256xf32>
    %304 = arith.mulf %303, %302 : vector<32x256xf32>
    %305 = math.tanh %304 : vector<32x256xf32>
    %cst_78 = arith.constant 1.000000e+00 : f32
    %306 = vector.broadcast %cst_78 : f32 to vector<32x256xf32>
    %307 = arith.addf %306, %305 : vector<32x256xf32>
    %308 = arith.mulf %297, %307 : vector<32x256xf32>
    %309 = arith.truncf %308 : vector<32x256xf32> to vector<32x256xbf16>
    %c1_79 = arith.constant 1 : index
    %c0_80 = arith.constant 0 : index
    %c0_81 = arith.constant 0 : index
    %310 = vector.load %arg5[%c1_79, %c0_80, %c0_81] : memref<2x256x128xbf16, #tpu.memory_space<vmem>>, vector<1x256x128xbf16>
    %311 = vector.shape_cast %310 : vector<1x256x128xbf16> to vector<256x128xbf16>
    %cst_82 = arith.constant dense<0.000000e+00> : vector<32x128xf32>
    %312 = tpu.matmul %309, %311, %cst_82 {dimension_numbers = #tpu.dot_dimension_numbers<[1], [0], [0], [1], [0, 0, 1, 1], [], []>} : vector<32x256xbf16>, vector<256x128xbf16>, vector<32x128xf32> -> vector<32x128xf32>
    %313 = vector.extract_strided_slice %188 {offsets = [7, 0], sizes = [1, 128], strides = [1, 1]} : vector<10x256xf32> to vector<1x128xf32>
    %314 = vector.broadcast %313 : vector<1x128xf32> to vector<32x128xf32>
    %315 = arith.addf %312, %314 : vector<32x128xf32>
    %316 = arith.addf %288, %315 : vector<32x128xf32>
    %317 = vector.extract_strided_slice %188 {offsets = [8, 0], sizes = [1, 128], strides = [1, 1]} : vector<10x256xf32> to vector<1x128xf32>
    %318 = vector.extract_strided_slice %188 {offsets = [9, 0], sizes = [1, 128], strides = [1, 1]} : vector<10x256xf32> to vector<1x128xf32>
    %cst_83 = arith.constant dense<0.000000e+00> : vector<32xf32>
    %319 = vector.multi_reduction <add>, %316, %cst_83 [1] : vector<32x128xf32> to vector<32xf32>
    %320 = vector.shape_cast %319 : vector<32xf32> to vector<32x1xf32>
    %cst_84 = arith.constant 1.280000e+02 : f32
    %321 = vector.broadcast %cst_84 : f32 to vector<32x1xf32>
    %322 = arith.divf %320, %321 : vector<32x1xf32>
    %323 = vector.broadcast %322 : vector<32x1xf32> to vector<32x128xf32>
    %324 = arith.subf %316, %323 : vector<32x128xf32>
    %325 = arith.mulf %324, %324 : vector<32x128xf32>
    %cst_85 = arith.constant dense<0.000000e+00> : vector<32xf32>
    %326 = vector.multi_reduction <add>, %325, %cst_85 [1] : vector<32x128xf32> to vector<32xf32>
    %327 = vector.shape_cast %326 : vector<32xf32> to vector<32x1xf32>
    %cst_86 = arith.constant 1.280000e+02 : f32
    %328 = vector.broadcast %cst_86 : f32 to vector<32x1xf32>
    %329 = arith.divf %327, %328 : vector<32x1xf32>
    %330 = vector.broadcast %322 : vector<32x1xf32> to vector<32x128xf32>
    %331 = arith.subf %316, %330 : vector<32x128xf32>
    %cst_87 = arith.constant 9.99999996E-13 : f32
    %332 = vector.broadcast %cst_87 : f32 to vector<32x1xf32>
    %333 = arith.addf %329, %332 : vector<32x1xf32>
    %334 = math.rsqrt %333 : vector<32x1xf32>
    %335 = vector.broadcast %334 : vector<32x1xf32> to vector<32x128xf32>
    %336 = arith.mulf %331, %335 : vector<32x128xf32>
    %337 = vector.broadcast %317 : vector<1x128xf32> to vector<32x128xf32>
    %338 = arith.mulf %336, %337 : vector<32x128xf32>
    %339 = vector.broadcast %318 : vector<1x128xf32> to vector<32x128xf32>
    %340 = arith.addf %338, %339 : vector<32x128xf32>
    %341 = vector.shape_cast %340 : vector<32x128xf32> to vector<4x8x128xf32>
    %342 = vector.extract_strided_slice %341 {offsets = [0, 0, 0], sizes = [4, 1, 128], strides = [1, 1, 1]} : vector<4x8x128xf32> to vector<4x1x128xf32>
    %343 = vector.shape_cast %342 : vector<4x1x128xf32> to vector<4x128xf32>
    %344 = vector.extract_strided_slice %343 {offsets = [0, 0], sizes = [2, 128], strides = [1, 1]} : vector<4x128xf32> to vector<2x128xf32>
    %345 = vector.extract_strided_slice %343 {offsets = [2, 0], sizes = [2, 128], strides = [1, 1]} : vector<4x128xf32> to vector<2x128xf32>
    %346 = tpu.concatenate %344, %345 in 1 : vector<2x128xf32>, vector<2x128xf32> -> vector<2x256xf32>
    %c0_88 = arith.constant 0 : index
    %c0_89 = arith.constant 0 : index
    %347 = vector.load %arg7[%c0_88, %c0_89] : memref<384x128xbf16, #tpu.memory_space<vmem>>, vector<256x128xbf16>
    %c256 = arith.constant 256 : index
    %c0_90 = arith.constant 0 : index
    %348 = vector.load %arg7[%c256, %c0_90] : memref<384x128xbf16, #tpu.memory_space<vmem>>, vector<128x128xbf16>
    %349 = arith.truncf %346 : vector<2x256xf32> to vector<2x256xbf16>
    %cst_91 = arith.constant dense<0.000000e+00> : vector<2x128xf32>
    %350 = tpu.matmul %349, %347, %cst_91 {dimension_numbers = #tpu.dot_dimension_numbers<[1], [0], [0], [1], [0, 0, 1, 1], [], []>} : vector<2x256xbf16>, vector<256x128xbf16>, vector<2x128xf32> -> vector<2x128xf32>
    %351 = vector.extract_strided_slice %2 {offsets = [2, 0], sizes = [1, 128], strides = [1, 1]} : vector<4x128xf32> to vector<1x128xf32>
    %352 = vector.broadcast %351 : vector<1x128xf32> to vector<2x128xf32>
    %353 = arith.addf %350, %352 : vector<2x128xf32>
    %cst_92 = arith.constant 0.000000e+00 : f32
    %354 = vector.broadcast %cst_92 : f32 to vector<2x128xf32>
    %355 = arith.maximumf %353, %354 : vector<2x128xf32>
    %356 = arith.truncf %355 : vector<2x128xf32> to vector<2x128xbf16>
    %cst_93 = arith.constant dense<0.000000e+00> : vector<2x128xf32>
    %357 = tpu.matmul %356, %348, %cst_93 {dimension_numbers = #tpu.dot_dimension_numbers<[1], [0], [0], [1], [0, 0, 1, 1], [], []>} : vector<2x128xbf16>, vector<128x128xbf16>, vector<2x128xf32> -> vector<2x128xf32>
    %358 = vector.extract_strided_slice %2 {offsets = [3, 0], sizes = [1, 128], strides = [1, 1]} : vector<4x128xf32> to vector<1x128xf32>
    %359 = vector.broadcast %358 : vector<1x128xf32> to vector<2x128xf32>
    %360 = arith.addf %357, %359 : vector<2x128xf32>
    %c0_94 = arith.constant 0 : index
    %c0_95 = arith.constant 0 : index
    %361 = vector.load %arg9[%c0_94, %c0_95] : memref<2x128xf32, #tpu.memory_space<vmem>>, vector<2x128xf32>
    tpu.vector_store %arg9[%c0_94, %c0_95], %360 {strides = array<i32>} : memref<2x128xf32, #tpu.memory_space<vmem>>, vector<2x128xf32>,
    return
  }
}

</mosaic_0001>

<bundles_post_ra>
// kernel: forward.1
= control target key start
LH: loop header
LB: loop body
LE: loop exit
PB: predicated region body
PF: predicated region fallthrough
CT: control target
= control target key end

     0   :  { %14 = vsyncpa [#allocation3], 0  ;;  %s10910_s0 = inlined_call_operand.vmem [shape: f32[4,8,128], index: 0, kind: input, shape index: {}]   ;;  %s10911_s1 = inlined_call_operand.vmem [shape: f32[4,1,8], index: 1, kind: input, shape index: {}]   ;;  %s10912_s2 = inlined_call_operand.vmem [shape: bf16[2,128,384], index: 2, kind: input, shape index: {}]   ;;  %s10913_s3 = inlined_call_operand.vmem [shape: bf16[2,128,128], index: 3, kind: input, shape index: {}]   ;;  %s10914_s4 = inlined_call_operand.hbm [shape: bf16[2,128,256], index: 4, kind: input, shape index: {}]   ;;  %s10915_s5 = inlined_call_operand.hbm [shape: bf16[2,256,128], index: 5, kind: input, shape index: {}]   ;;  %s10916_s6 = inlined_call_operand.vmem [shape: f32[2,10,256], index: 6, kind: input, shape index: {}]   ;;  %s10917_s7 = inlined_call_operand.hbm [shape: bf16[384,128], index: 7, kind: input, shape index: {}]   ;;  %s10918_s8 = inlined_call_operand.hbm [shape: f32[4,128], index: 8, kind: input, shape index: {}]   ;;  %s10919_s9 = inlined_call_operand.hbm [shape: f32[2,128], index: 9, kind: output, shape index: {}]  }
   0x1   :  { %15 = vsyncpa [#allocation6], 0 }
   0x2   :  { %16 = vsyncpa [#allocation9], 0 }
   0x3   :  { %17 = vsyncpa [#allocation4], 0  ;;  %s9348_s30 = smov [#allocation5]   ;;  %s9230_s13 = scalar_lea.hbm %s10915_s5, 4096 }
   0x4   :  { %s43_s10 = sshll.u32 %s9348_s30, 4  ;;  %p9231_p0 = scmp.ne.s32.totalorder %s10915_s5, %s9230_s13  ;;  %s44_s10 = int_to_ptr.vmem [resolvable:$true] %s43_s10 }
   0x5   :  { %p9234_p1 = scmp.lt.u32.totalorder %s9230_s13, %s10915_s5 }
   0x7   :  { %p9236_p2 = pnand %p9234_p1, %p9231_p0 }
   0x9   :  { %9239 = shalt.err (!%p9236_p2)
}
   0xa   :  { %s9240_s18 = scalar_lea.vmem %s44_s10, 4096  ;;  %p9245_p4 = scmp.lt.s32.totalorder %s44_s10, %s44_s10 }
   0xb   :  { %p9241_p3 = scmp.ne.s32.totalorder %s44_s10, %s9240_s18  ;;  %p9246_p5 = scmp.lt.s32.totalorder %s9240_s18, %s9240_s18 }
   0xd   :  { %p9247_p6 = por %p9246_p5, %p9245_p4 }
   0xf   :  { %p9248_p7 = pnand %p9247_p6, %p9241_p3 }
  0x11   :  { %9251 = shalt.err (!%p9248_p7)
}
  0x12   :  { %s9349_s19 = smov 64   ;;  %s9350_s20 = smov 4  }
  0x13   :  { %49 = dma.hbm_to_vmem [thread:$0]  %s10915_s5, 4096, %s44_s10, [#allocation6], %s9349_s19, %s9349_s19, %s9350_s20  }
  0x14   :  { %s9351_s23 = smov [#allocation2]   ;;  %s9252_s27 = scalar_lea.hbm %s10914_s4, 4096 }
  0x15   :  { %s31_s24 = sshll.u32 %s9351_s23, 4  ;;  %p9253_p8 = scmp.ne.s32.totalorder %s10914_s4, %s9252_s27  ;;  %s32_s24 = int_to_ptr.vmem [resolvable:$true] %s31_s24 }
  0x16   :  { %p9256_p9 = scmp.lt.u32.totalorder %s9252_s27, %s10914_s4 }
  0x18   :  { %p9258_p10 = pnand %p9256_p9, %p9253_p8 }
  0x1a   :  { %9261 = shalt.err (!%p9258_p10)
}
  0x1b   :  { %s9262_s12 = scalar_lea.vmem %s32_s24, 4096  ;;  %p9267_p12 = scmp.lt.s32.totalorder %s32_s24, %s32_s24 }
  0x1c   :  { %p9263_p11 = scmp.ne.s32.totalorder %s32_s24, %s9262_s12  ;;  %p9268_p13 = scmp.lt.s32.totalorder %s9262_s12, %s9262_s12 }
  0x1e   :  { %p9269_p0 = por %p9268_p13, %p9267_p12 }
  0x20   :  { %p9270_p1 = pnand %p9269_p0, %p9263_p11 }
  0x22   :  { %9273 = shalt.err (!%p9270_p1)
}
  0x23   :  { %s9352_s5 = smov 128   ;;  %s9353_s10 = smov 8  }
  0x24   :  { %37 = dma.hbm_to_vmem [thread:$0]  %s10914_s4, 4096, %s32_s24, [#allocation3], %s9352_s5, %s9352_s5, %s9353_s10  }
  0x25   :  { %s9354_s15 = smov [#allocation7]   ;;  %s9355_s17 = smov [#allocation8]  }
  0x26   :  { %s57_s16 = sshll.u32 %s9354_s15, 4  ;;  %s70_s18 = sshll.u32 %s9355_s17, 4  ;;  %s58_s16 = int_to_ptr.vmem [resolvable:$true] %s57_s16  ;;  %s71_s18 = int_to_ptr.vmem [resolvable:$true] %s70_s18 }
  0x27   :  { %s9274_s23 = scalar_lea.hbm %s10917_s7, 3072 }
  0x28   :  { %p9275_p2 = scmp.ne.s32.totalorder %s10917_s7, %s9274_s23  ;;  %p9278_p3 = scmp.lt.u32.totalorder %s9274_s23, %s10917_s7 }
  0x2a   :  { %p9280_p4 = pnand %p9278_p3, %p9275_p2 }
  0x2c   :  { %9283 = shalt.err (!%p9280_p4)
}
  0x2d   :  { %s9284_s4 = scalar_lea.vmem %s58_s16, 3072  ;;  %p9289_p6 = scmp.lt.s32.totalorder %s58_s16, %s58_s16 }
  0x2e   :  { %p9285_p5 = scmp.ne.s32.totalorder %s58_s16, %s9284_s4  ;;  %p9290_p7 = scmp.lt.s32.totalorder %s9284_s4, %s9284_s4 }
  0x30   :  { %p9291_p8 = por %p9290_p7, %p9289_p6 }
  0x32   :  { %p9292_p9 = pnand %p9291_p8, %p9285_p5 }
  0x34   :  { %9295 = shalt.err (!%p9292_p9)
}
  0x35   :  { %63 = dma.hbm_to_vmem [thread:$0]  %s10917_s7, 3072, %s58_s16, [#allocation6], %s9349_s19, %s9349_s19, %s9350_s20  }
  0x36   :  { %s9296_s12 = scalar_lea.hbm %s10918_s8, 64 }
  0x37   :  { %p9297_p10 = scmp.ne.s32.totalorder %s10918_s8, %s9296_s12  ;;  %p9300_p11 = scmp.lt.u32.totalorder %s9296_s12, %s10918_s8 }
  0x39   :  { %p9302_p12 = pnand %p9300_p11, %p9297_p10 }
  0x3b   :  { %9305 = shalt.err (!%p9302_p12)
}
  0x3c   :  { %s9306_s15 = scalar_lea.vmem %s71_s18, 64  ;;  %p9311_p0 = scmp.lt.s32.totalorder %s71_s18, %s71_s18 }
  0x3d   :  { %p9307_p13 = scmp.ne.s32.totalorder %s71_s18, %s9306_s15  ;;  %p9312_p1 = scmp.lt.s32.totalorder %s9306_s15, %s9306_s15 }
  0x3f   :  { %p9313_p2 = por %p9312_p1, %p9311_p0 }
  0x41   :  { %p9314_p3 = pnand %p9313_p2, %p9307_p13 }
  0x43   :  { %9317 = shalt.err (!%p9314_p3)
}
  0x44   :  { %73 = dma.hbm_to_vmem [thread:$0]  %s10918_s8, 64, %s71_s18, [#allocation9]  }
  0x45   :  { %9340 = dma.done.wait [#allocation3], 4096  }
  0x46   :  { %9341 = vsyncadd [#allocation3], 4294963200 }
  0x47   :  { %9342 = dma.done.wait [#allocation6], 7168  }
  0x48   :  { %9343 = vsyncadd [#allocation6], 4294960128 }
  0x49   :  { %9344 = dma.done.wait [#allocation9], 64  }
  0x4a   :  { %9345 = vsyncadd [#allocation9], 4294967232  ;;  %v87_v0 = vld [vmem:[%s10910_s0] sm:$0xff]  ;;  %v89_v1 = vld [vmem:[%s10910_s0 + $0x10] sm:$0xff]  ;;  %v9356_v39 = vmov 0   ;;  %v137_v50 = vlaneseq  ;;  %vm9358_vm0 = vmmov 0  }
  0x4b   :  { %v88_v2 = vld [vmem:[%s10910_s0 + $0x8] sm:$0xff]  ;;  %92 = vadd.xlane.f32.xlu0 %v87_v0  ;;  %96 = vadd.xlane.f32.xlu1 %v89_v1  ;;  %v90_v3 = vld [vmem:[%s10910_s0 + $0x18] sm:$0xff]  ;;  %v8843_v4 = vld [vmem:[%s10912_s2 + $0x4] ss:$12 sps:$4 sm:$0xff]   ;;  %vm580_vm1 = vcmask 261120   ;;  %s9359_s26 = smov 96  }
  0x4c   :  { %v8845_v5 = vld [vmem:[%s10912_s2] ss:$12 sps:$4 sm:$0xff]   ;;  %v8846_v6 = vld [vmem:[%s10912_s2 + $0x1c] ss:$12 sps:$4 sm:$0xff]   ;;  %330 = vmatprep.subr.bf16.mxu0 %v8843_v4  ;;  %v8849_v24 = vld [vmem:[%s10912_s2 + $0x18] ss:$12 sps:$4 sm:$0xff]   ;;  %362 = vmatprep.mubr.bf16.mxu0 %v9356_v39 }
  0x4d   :  { %v8848_v7 = vld [vmem:[%s10912_s2 + $0x8] ss:$12 sps:$4 sm:$0xff]   ;;  %331 = vmatpush1.bf16.msra.mxu0 %v8845_v5  ;;  %v8852_v26 = vld [vmem:[%s10912_s2 + $0x20] ss:$12 sps:$4 sm:$0xff]   ;;  %v8853_v27 = vld [vmem:[%s10912_s2 + $0x30] ss:$12 sps:$4 sm:$0xff]  }
  0x4e   :  { %8349 = vmatprep.subr.bf16.mxu1 %v8848_v7  ;;  %332 = vmatprep.subr.bf16.mxu0 %v8846_v6  ;;  %v8850_v25 = vld [vmem:[%s10912_s2 + $0x34] ss:$12 sps:$4 sm:$0xff]   ;;  %v8854_v28 = vld [vmem:[%s10912_s2 + $0x4c] ss:$12 sps:$4 sm:$0xff]   ;;  %v8858_v31 = vld [vmem:[%s10912_s2 + $0x64] ss:$12 sps:$4 sm:$0xff]  }
  0x4f   :  { %94 = vadd.xlane.f32.xlu0 %v88_v2  ;;  %98 = vadd.xlane.f32.xlu1 %v90_v3  ;;  %v8856_v29 = vld [vmem:[%s10912_s2 + $0x38] ss:$12 sps:$4 sm:$0xff]   ;;  %v8857_v30 = vld [vmem:[%s10912_s2 + $0x48] ss:$12 sps:$4 sm:$0xff]   ;;  %v8860_v32 = vld [vmem:[%s10912_s2 + $0x50] ss:$12 sps:$4 sm:$0xff]  }
  0x50   :  { %8350 = vmatpush3.bf16.msra.mxu1 %v8848_v7  ;;  %v8861_v33 = vld [vmem:[%s10912_s2 + $0x60] ss:$12 sps:$4 sm:$0xff]   ;;  %v8862_v34 = vld [vmem:[%s10912_s2 + $0x7c] ss:$12 sps:$4 sm:$0xff]   ;;  %v8865_v36 = vld [vmem:[%s10912_s2 + $0x78] ss:$12 sps:$4 sm:$0xff]  }
  0x51   :  { %333 = vmatpush1.bf16.msra.mxu0 %v8849_v24  ;;  %8351 = vmatprep.subr.bf16.mxu1 %v8852_v26  ;;  %v8864_v35 = vld [vmem:[%s10912_s2 + $0x68] ss:$12 sps:$4 sm:$0xff]   ;;  %v8868_v38 = vld [vmem:[%s10912_s2 + $0x80] ss:$12 sps:$4 sm:$0xff]   ;;  %v8869_v40 = vld [vmem:[%s10912_s2 + $0x90] ss:$12 sps:$4 sm:$0xff]  }
  0x52   :  { %334 = vmatprep.subr.bf16.mxu0 %v8850_v25  ;;  %v8866_v37 = vld [vmem:[%s10912_s2 + $0x94] ss:$12 sps:$4 sm:$0xff]   ;;  %v8870_v41 = vld [vmem:[%s10912_s2 + $0xac] ss:$12 sps:$4 sm:$0xff]   ;;  %v8874_v44 = vld [vmem:[%s10912_s2 + $0xb0] ss:$12 sps:$4 sm:$0xff]  }
  0x53   :  { %v8872_v42 = vld [vmem:[%s10912_s2 + $0x98] ss:$12 sps:$4 sm:$0xff]   ;;  %v8873_v43 = vld [vmem:[%s10912_s2 + $0xa8] ss:$12 sps:$4 sm:$0xff]   ;;  %v9567_v56 = vshrl.u32 %v137_v50, 7  ;;  %s9360_s27 = smov 32  }
  0x54   :  { %8352 = vmatpush3.bf16.msra.mxu1 %v8852_v26  ;;  %v91_v60 = vld [vmem:[#allocation8] sm:$0xf]  ;;  %vm1765_vm2 = vcmask 64512   ;;  %vm3162_vm3 = vcmask 523264   ;;  %vm3167_vm4 = vcmask 785408   ;;  %vm7485_vm5 = vcmask 1041409  }
  0x55   :  { %335 = vmatpush1.bf16.msra.mxu0 %v8853_v27  ;;  %8353 = vmatprep.subr.bf16.mxu1 %v8856_v29  ;;  %v9570_v59 = vsub.s32 0, %v9567_v56 }
  0x56   :  { %336 = vmatprep.subr.bf16.mxu0 %v8854_v28 }
  0x57   :  { %v140_v63 = vrot.slane %v91_v60, %v9570_v59 }
  0x58   :  { %8354 = vmatpush3.bf16.msra.mxu1 %v8856_v29 }
  0x59   :  { %337 = vmatpush1.bf16.msra.mxu0 %v8857_v30  ;;  %8355 = vmatprep.subr.bf16.mxu1 %v8860_v32 }
  0x5a   :  { %338 = vmatprep.subr.bf16.mxu0 %v8858_v31 }
  0x5c   :  { %8356 = vmatpush3.bf16.msra.mxu1 %v8860_v32 }
  0x5d   :  { %339 = vmatpush1.bf16.msra.mxu0 %v8861_v33  ;;  %8357 = vmatprep.subr.bf16.mxu1 %v8864_v35 }
  0x5e   :  { %340 = vmatprep.subr.bf16.mxu0 %v8862_v34 }
  0x60   :  { %8358 = vmatpush3.bf16.msra.mxu1 %v8864_v35 }
  0x61   :  { %341 = vmatpush1.bf16.msra.mxu0 %v8865_v36  ;;  %8359 = vmatprep.subr.bf16.mxu1 %v8868_v38 }
  0x62   :  { %342 = vmatprep.subr.bf16.mxu0 %v8866_v37 }
  0x64   :  { %8360 = vmatpush3.bf16.msra.mxu1 %v8868_v38 }
  0x65   :  { %343 = vmatpush1.bf16.msra.mxu0 %v8869_v40  ;;  %8361 = vmatprep.subr.bf16.mxu1 %v8872_v42 }
  0x66   :  { %344 = vmatprep.subr.bf16.mxu0 %v8870_v41 }
  0x68   :  { %8362 = vmatpush3.bf16.msra.mxu1 %v8872_v42 }
  0x69   :  { %345 = vmatpush1.bf16.msra.mxu0 %v8873_v43  ;;  %8363 = vmatprep.subr.bf16.mxu1 %v8874_v44 }
  0x6c   :  { %8364 = vmatpush3.bf16.msra.mxu1 %v8874_v44 }
  0xd8   :  { %v93_v8 = vpop.xlane.xlu0 %92  ;;  %v97_v9 = vpop.xlane.xlu1 %96 }
  0xd9   :  { %v101_v10 = vmul.f32 0.0078125, %v93_v8  ;;  %v103_v11 = vmul.f32 0.0078125, %v97_v9 }
  0xdb   :  { %v9490_v12 = vsub.f32 %v87_v0, %v101_v10  ;;  %v9492_v13 = vsub.f32 %v89_v1, %v103_v11  ;;  %v9575_v0 = vsub.s32 1, %v9567_v56 }
  0xdc   :  { %v95_v14 = vpop.xlane.xlu0 %94  ;;  %v99_v15 = vpop.xlane.xlu1 %98 }
  0xdd   :  { %v102_v16 = vmul.f32 0.0078125, %v95_v14  ;;  %v109_v17 = vmul.f32 %v9490_v12, %v9490_v12  ;;  %v104_v18 = vmul.f32 0.0078125, %v99_v15  ;;  %v111_v19 = vmul.f32 %v9492_v13, %v9492_v13 }
  0xde   :  { %v148_v5 = vrot.slane %v91_v60, %v9575_v0 }
  0xdf   :  { %113 = vadd.xlane.f32.xlu0 %v109_v17  ;;  %v9498_v20 = vsub.f32 %v88_v2, %v102_v16  ;;  %v9500_v21 = vsub.f32 %v90_v3, %v104_v18  ;;  %v9357_v18 = vmov 0.0  }
  0xe0   :  { %8369 = vmatprep.subr.mxu0 %v9357_v18  ;;  %8384 = vmatprep.subr.mxu1 %v9357_v18 }
  0xe1   :  { %v110_v22 = vmul.f32 %v9498_v20, %v9498_v20  ;;  %v112_v23 = vmul.f32 %v9500_v21, %v9500_v21 }
  0xe3   :  { %117 = vadd.xlane.f32.xlu0 %v111_v19  ;;  %115 = vadd.xlane.f32.xlu1 %v110_v22  ;;  %v9603_v19 = vld [vmem:[%s10916_s6] sm:$0xff] }
  0xe7   :  { %119 = vadd.xlane.f32.xlu1 %v112_v23 }
 0x16c   :  { %v114_v45 = vpop.xlane.xlu0 %113 }
 0x16d   :  { %v121_v46 = vmul.f32 0.0078125, %v114_v45 }
 0x16f   :  { %v125_v47 = vadd.f32 1e-12, %v121_v46 }
 0x170   :  { %v116_v48 = vpop.xlane.xlu1 %115  ;;  %v118_v49 = vpop.xlane.xlu0 %117 }
 0x171   :  { %9027 = vrsqrt.f32 %v125_v47  ;;  %v122_v51 = vmul.f32 0.0078125, %v116_v48  ;;  %v123_v52 = vmul.f32 0.0078125, %v118_v49  ;;  %v9650_v47 = vsub.s32 2, %v9567_v56 }
 0x173   :  { %v126_v53 = vadd.f32 1e-12, %v122_v51  ;;  %v127_v54 = vadd.f32 1e-12, %v123_v52  ;;  %v455_v48 = vrot.slane %v9603_v19, %v9650_v47 }
 0x174   :  { %v120_v55 = vpop.xlane.xlu1 %119 }
 0x175   :  { %9029 = vrsqrt.f32 %v126_v53  ;;  %v124_v57 = vmul.f32 0.0078125, %v120_v55 }
 0x176   :  { %9031 = vrsqrt.f32 %v127_v54 }
 0x177   :  { %v128_v58 = vadd.f32 1e-12, %v124_v57 }
 0x179   :  { %9033 = vrsqrt.f32 %v128_v58 }
 0x17b   :  { %v9028_v61 = vpop.eup %9027 }
 0x17c   :  { %v133_v62 = vmul.f32 %v9028_v61, %v9490_v12 }
 0x17e   :  { %v141_v4 = vmul.f32 %v140_v63, %v133_v62 }
 0x17f   :  { %v9030_v1 = vpop.eup %9029 }
 0x180   :  { %v9032_v2 = vpop.eup %9031  ;;  %v134_v3 = vmul.f32 %v9030_v1, %v9498_v20  ;;  %v9580_v9 = vadd.f32 %v148_v5, %v141_v4  ;;  %v435_v20 = vrot.slane %v9603_v19, %v9570_v59 }
 0x181   :  { %v135_v6 = vmul.f32 %v9032_v2, %v9492_v13 }
 0x182   :  { %v142_v7 = vmul.f32 %v140_v63, %v134_v3 }
 0x183   :  { %v9034_v8 = vpop.eup %9033  ;;  %v143_v12 = vmul.f32 %v140_v63, %v135_v6 }
 0x184   :  { %v9582_v10 = vadd.f32 %v148_v5, %v142_v7  ;;  %v136_v11 = vmul.f32 %v9034_v8, %v9500_v21  ;;  %v447_v21 = vrot.slane %v9603_v19, %v9575_v0 }
 0x185   :  { %v9587_v16 = vadd.f32 %v148_v5, %v143_v12 }
 0x186   :  { %v168_v14 = vpack.c.bf16 %v9582_v10, %v9580_v9  ;;  %v144_v15 = vmul.f32 %v140_v63, %v136_v11 }
 0x188   :  { %363 = vmatmul.mubr.bf16.vlgmr.msra.gmra.mrb[0].mxu0 %v168_v14  ;;  %8365 = vmatprep.mubr.bf16.mxu1 %v168_v14  ;;  %v9589_v17 = vadd.f32 %v148_v5, %v144_v15 }
 0x189   :  { %372 = vmatprep.mubr.bf16.mxu0 %v9356_v39 }
 0x18a   :  { %v169_v13 = vpack.c.bf16 %v9589_v17, %v9587_v16 }
 0x18c   :  { %8366 = vmatmul.mubr.bf16.vlgmr.msra.gmra.mrb[0].mxu1 %v169_v13 }
 0x18d   :  { %8386 = vmatprep.mubr.msk.f32.mxu1 %vm9358_vm0, %v9357_v18 }
 0x190   :  { %373 = vmatmul.mubr.bf16.gmra.mrb[4].mxu0 %v169_v13 }
 0x191   :  { %8371 = vmatprep.mubr.msk.f32.mxu0 %vm9358_vm0, %v9357_v18 }
 0x25b   :  { %v364_v22 = vpop.f32.mrb[0].mxu0 }
 0x25c   :  { %v436_v23 = vadd.f32 %v435_v20, %v364_v22  ;;  %v366_v24 = vpop.f32.mrb[1].mxu0 }
 0x25d   :  { %v448_v25 = vadd.f32 %v447_v21, %v366_v24  ;;  %v368_v26 = vpop.f32.mrb[2].mxu0 }
 0x25e   :  { %v440_v27 = vmul.f32 0.17677669, %v436_v23  ;;  %v370_v28 = vpop.f32.mrb[3].mxu0  ;;  %v437_v30 = vadd.f32 %v435_v20, %v368_v26  ;;  %v154_v23 = vld [vmem:[%s10911_s1 + $0x1] sm:$0x1] }
 0x25f   :  { %492 = vrot.lane.b32.xlu0 %v448_v25, %s9359_s26  ;;  %v9610_v29 = vpop.f32.mrb[0].mxu1  ;;  %8370 = vmatpush3.xpose.msk.msra.mxu0 %vm580_vm1, %v448_v25  ;;  %v449_v32 = vadd.f32 %v447_v21, %v370_v28  ;;  %v155_v26 = vld [vmem:[%s10911_s1 + $0x2] sm:$0x1] }
 0x260   :  { %464 = vrot.lane.b32.xlu1 %v440_v27, %s9359_s26  ;;  %v417_v31 = vpop.f32.mrb[1].mxu1  ;;  %8374 = vmatprep.subr.mxu0 %v9357_v18  ;;  %v441_v36 = vmul.f32 0.17677669, %v437_v30  ;;  %v9671_v51 = vadd.f32 %v9610_v29, %v455_v48  ;;  %v159_v30 = vsub.f32 1.0, %v155_v26 }
 0x261   :  { %v8368_v33 = vpop.f32.mrb[2].mxu1  ;;  %v9658_v49 = vadd.f32 %v455_v48, %v417_v31 }
 0x262   :  { %v420_v34 = vpop.f32.mrb[3].mxu1  ;;  %8372 = vmatmul.mubr.msk.f32.vlgmr.msra.gmra.mrb[8].mxu0 %vm580_vm1, %v440_v27  ;;  %v9675_v52 = vadd.f32 %v8368_v33, %v455_v48 }
 0x263   :  { %500 = vrot.lane.b32.xlu0 %v448_v25, %s9349_s19  ;;  %v374_v35 = vpop.f32.mrb[4].mxu0  ;;  %8375 = vmatpush3.xpose.msk.msra.mxu0 %vm580_vm1, %v449_v32  ;;  %v9666_v50 = vadd.f32 %v455_v48, %v420_v34 }
 0x264   :  { %v438_v37 = vadd.f32 %v435_v20, %v374_v35  ;;  %494 = vrot.lane.b32.xlu1 %v449_v32, %s9359_s26  ;;  %v376_v38 = vpop.f32.mrb[5].mxu0  ;;  %8376 = vmatprep.mubr.msk.f32.mxu0 %vm9358_vm0, %v9357_v18 }
 0x265   :  { %v450_v40 = vadd.f32 %v447_v21, %v376_v38  ;;  %v378_v41 = vpop.f32.mrb[6].mxu0  ;;  %8379 = vmatprep.subr.mxu0 %v9357_v18 }
 0x266   :  { %v439_v42 = vadd.f32 %v435_v20, %v378_v41  ;;  %v380_v43 = vpop.f32.mrb[7].mxu0  ;;  %8377 = vmatmul.mubr.msk.f32.vlgmr.msra.gmra.mrb[10].mxu0 %vm580_vm1, %v441_v36  ;;  %v442_v45 = vmul.f32 0.17677669, %v438_v37 }
 0x267   :  { %v451_v44 = vadd.f32 %v447_v21, %v380_v43  ;;  %508 = vrot.lane.b32.xlu0 %v448_v25, %s9360_s27  ;;  %8380 = vmatpush3.xpose.msk.msra.mxu0 %vm580_vm1, %v450_v40  ;;  %v153_v21 = vld [vmem:[%s10911_s1] sm:$0x1]  ;;  %v158_v25 = vsub.f32 1.0, %v154_v23 }
 0x268   :  { %502 = vrot.lane.b32.xlu1 %v449_v32, %s9349_s19  ;;  %8381 = vmatprep.mubr.msk.f32.mxu0 %vm9358_vm0, %v9357_v18  ;;  %v443_v46 = vmul.f32 0.17677669, %v439_v42  ;;  %v157_v22 = vsub.f32 1.0, %v153_v21 }
 0x269   :  { %8385 = vmatpush3.xpose.msk.msra.mxu1 %vm580_vm1, %v451_v44  ;;  %8389 = vmatprep.subr.mxu0 %v9357_v18  ;;  %v162_v29 = vmul.f32 -1e+09, %v158_v25 }
 0x26a   :  { %8382 = vmatmul.mubr.msk.f32.vlgmr.msra.gmra.mrb[12].mxu0 %vm580_vm1, %v442_v45  ;;  %8394 = vmatprep.subr.mxu1 %v9357_v18  ;;  %v161_v24 = vmul.f32 -1e+09, %v157_v22 }
 0x26b   :  { %472 = vrot.lane.b32.xlu0 %v440_v27, %s9349_s19  ;;  %8391 = vmatprep.mubr.msk.f32.mxu0 %vm9358_vm0, %v9357_v18  ;;  %v9764_v35 = vrot.slane %v162_v29, %v9570_v59 }
 0x26c   :  { %510 = vrot.lane.b32.xlu1 %v449_v32, %s9360_s27  ;;  %8387 = vmatmul.mubr.msk.f32.vlgmr.msra.gmra.mrb[4].mxu1 %vm580_vm1, %v443_v46  ;;  %v9758_v28 = vrot.slane %v161_v24, %v9570_v59 }
 0x26d   :  { %8396 = vmatprep.mubr.msk.f32.mxu1 %vm9358_vm0, %v9357_v18 }
 0x26f   :  { %496 = vrot.lane.b32.xlu0 %v450_v40, %s9359_s26 }
 0x270   :  { %466 = vrot.lane.b32.xlu1 %v441_v36, %s9359_s26 }
 0x273   :  { %504 = vrot.lane.b32.xlu0 %v450_v40, %s9349_s19 }
 0x274   :  { %474 = vrot.lane.b32.xlu1 %v441_v36, %s9349_s19 }
 0x277   :  { %468 = vrot.lane.b32.xlu0 %v442_v45, %s9359_s26 }
 0x278   :  { %498 = vrot.lane.b32.xlu1 %v451_v44, %s9359_s26 }
 0x27b   :  { %480 = vrot.lane.b32.xlu0 %v440_v27, %s9360_s27  ;;  %v156_v27 = vld [vmem:[%s10911_s1 + $0x3] sm:$0x1] }
 0x27c   :  { %506 = vrot.lane.b32.xlu1 %v451_v44, %s9349_s19  ;;  %v160_v31 = vsub.f32 1.0, %v156_v27 }
 0x27e   :  { %v164_v38 = vmul.f32 -1e+09, %v160_v31 }
 0x27f   :  { %476 = vrot.lane.b32.xlu0 %v442_v45, %s9349_s19 }
 0x280   :  { %470 = vrot.lane.b32.xlu1 %v443_v46, %s9359_s26 }
 0x283   :  { %512 = vrot.lane.b32.xlu0 %v450_v40, %s9360_s27 }
 0x284   :  { %482 = vrot.lane.b32.xlu1 %v441_v36, %s9360_s27  ;;  %v163_v36 = vmul.f32 -1e+09, %v159_v30 }
 0x286   :  { %v9772_v43 = vrot.slane %v163_v36, %v9570_v59 }
 0x287   :  { %484 = vrot.lane.b32.xlu0 %v442_v45, %s9360_s27  ;;  %v9777_v45 = vrot.slane %v164_v38, %v9570_v59 }
 0x288   :  { %478 = vrot.lane.b32.xlu1 %v443_v46, %s9349_s19 }
 0x28b   :  { %520 = vrot.lane.b32.xlu0 %v9658_v49, %s9359_s26 }
 0x28c   :  { %514 = vrot.lane.b32.xlu1 %v451_v44, %s9360_s27 }
 0x28f   :  { %532 = vrot.lane.b32.xlu0 %v9658_v49, %s9349_s19 }
 0x290   :  { %486 = vrot.lane.b32.xlu1 %v443_v46, %s9360_s27 }
 0x294   :  { %522 = vrot.lane.b32.xlu1 %v9666_v50, %s9359_s26 }
 0x298   :  { %524 = vrot.lane.b32.xlu1 %v9671_v51, %s9359_s26 }
 0x29c   :  { %526 = vrot.lane.b32.xlu1 %v9675_v52, %s9359_s26 }
 0x2a0   :  { %534 = vrot.lane.b32.xlu1 %v9666_v50, %s9349_s19 }
 0x2d1   :  { %v493_v53 = vpop.permute.xlu0 %492 }
 0x2d2   :  { %v465_v54 = vpop.permute.xlu1 %464  ;;  %8390 = vmatpush3.xpose.msk.msra.mxu0 %vm580_vm1, %v493_v53 }
 0x2d3   :  { %8399 = vmatprep.subr.mxu0 %v9357_v18 }
 0x2d5   :  { %8392 = vmatmul.mubr.msk.f32.vlgmr.msra.gmra.mrb[14].mxu0 %vm580_vm1, %v465_v54  ;;  %v501_v55 = vpop.permute.xlu0 %500 }
 0x2d6   :  { %v495_v57 = vpop.permute.xlu1 %494  ;;  %8401 = vmatprep.mubr.msk.f32.mxu0 %vm9358_vm0, %v9357_v18 }
 0x2d7   :  { %8395 = vmatpush3.xpose.msk.msra.mxu1 %vm580_vm1, %v495_v57 }
 0x2d8   :  { %8404 = vmatprep.subr.mxu1 %v9357_v18 }
 0x2d9   :  { %v509_v58 = vpop.permute.xlu0 %508 }
 0x2da   :  { %v503_v60 = vpop.permute.xlu1 %502 }
 0x2dd   :  { %v473_v61 = vpop.permute.xlu0 %472 }
 0x2de   :  { %v511_v62 = vpop.permute.xlu1 %510 }
 0x2e1   :  { %v497_v63 = vpop.permute.xlu0 %496 }
 0x2e2   :  { %v467_v1 = vpop.permute.xlu1 %466  ;;  %8400 = vmatpush3.xpose.msk.msra.mxu0 %vm580_vm1, %v497_v63 }
 0x2e3   :  { %8397 = vmatmul.mubr.msk.f32.vlgmr.msra.gmra.mrb[6].mxu1 %vm580_vm1, %v467_v1  ;;  %8409 = vmatprep.subr.mxu0 %v9357_v18 }
 0x2e4   :  { %8406 = vmatprep.mubr.msk.f32.mxu1 %vm9358_vm0, %v9357_v18 }
 0x2e5   :  { %v505_v2 = vpop.permute.xlu0 %504 }
 0x2e6   :  { %v475_v3 = vpop.permute.xlu1 %474 }
 0x2e9   :  { %v469_v4 = vpop.permute.xlu0 %468 }
 0x2ea   :  { %v499_v5 = vpop.permute.xlu1 %498  ;;  %8402 = vmatmul.mubr.msk.f32.vlgmr.msra.gmra.mrb[16].mxu0 %vm580_vm1, %v469_v4 }
 0x2eb   :  { %8410 = vmatpush3.xpose.msk.msra.mxu0 %vm580_vm1, %v501_v55  ;;  %8405 = vmatpush3.xpose.msk.msra.mxu1 %vm580_vm1, %v499_v5 }
 0x2ec   :  { %8411 = vmatprep.mubr.msk.f32.mxu0 %vm9358_vm0, %v9357_v18  ;;  %8419 = vmatprep.subr.mxu0 %v9357_v18 }
 0x2ed   :  { %v481_v6 = vpop.permute.xlu0 %480  ;;  %8414 = vmatprep.subr.mxu1 %v9357_v18 }
 0x2ee   :  { %v507_v7 = vpop.permute.xlu1 %506  ;;  %8412 = vmatmul.mubr.msk.f32.vlgmr.msra.gmra.mrb[18].mxu0 %vm580_vm1, %v473_v61 }
 0x2ef   :  { %8420 = vmatpush3.xpose.msk.msra.mxu0 %vm580_vm1, %v505_v2  ;;  %8421 = vmatprep.mubr.msk.f32.mxu0 %vm9358_vm0, %v9357_v18 }
 0x2f0   :  { %8429 = vmatprep.subr.mxu0 %v9357_v18 }
 0x2f1   :  { %v477_v8 = vpop.permute.xlu0 %476 }
 0x2f2   :  { %v471_v11 = vpop.permute.xlu1 %470  ;;  %8422 = vmatmul.mubr.msk.f32.vlgmr.msra.gmra.mrb[20].mxu0 %vm580_vm1, %v477_v8 }
 0x2f3   :  { %8430 = vmatpush3.xpose.msk.msra.mxu0 %vm580_vm1, %v509_v58  ;;  %8407 = vmatmul.mubr.msk.f32.vlgmr.msra.gmra.mrb[8].mxu1 %vm580_vm1, %v471_v11 }
 0x2f4   :  { %8415 = vmatpush3.xpose.msk.msra.mxu1 %vm580_vm1, %v503_v60  ;;  %8431 = vmatprep.mubr.msk.f32.mxu0 %vm9358_vm0, %v9357_v18 }
 0x2f5   :  { %8439 = vmatprep.subr.mxu0 %v9357_v18  ;;  %v513_v12 = vpop.permute.xlu0 %512  ;;  %8416 = vmatprep.mubr.msk.f32.mxu1 %vm9358_vm0, %v9357_v18 }
 0x2f6   :  { %v483_v14 = vpop.permute.xlu1 %482  ;;  %8424 = vmatprep.subr.mxu1 %v9357_v18  ;;  %8432 = vmatmul.mubr.msk.f32.vlgmr.msra.gmra.mrb[22].mxu0 %vm580_vm1, %v481_v6 }
 0x2f7   :  { %8440 = vmatpush3.xpose.msk.msra.mxu0 %vm580_vm1, %v513_v12  ;;  %8417 = vmatmul.mubr.msk.f32.vlgmr.msra.gmra.mrb[10].mxu1 %vm580_vm1, %v475_v3 }
 0x2f8   :  { %8425 = vmatpush3.xpose.msk.msra.mxu1 %vm580_vm1, %v507_v7  ;;  %8441 = vmatprep.mubr.msk.f32.mxu0 %vm9358_vm0, %v9357_v18 }
 0x2f9   :  { %8449 = vmatprep.subr.mxu0 %v9357_v18  ;;  %v485_v15 = vpop.permute.xlu0 %484  ;;  %8426 = vmatprep.mubr.msk.f32.mxu1 %vm9358_vm0, %v9357_v18 }
 0x2fa   :  { %v479_v13 = vpop.permute.xlu1 %478  ;;  %8434 = vmatprep.subr.mxu1 %v9357_v18  ;;  %8442 = vmatmul.mubr.msk.f32.vlgmr.msra.gmra.mrb[24].mxu0 %vm580_vm1, %v485_v15 }
 0x2fb   :  { %8450 = vmatpush3.msra.mxu0 %v9658_v49  ;;  %8427 = vmatmul.mubr.msk.f32.vlgmr.msra.gmra.mrb[12].mxu1 %vm580_vm1, %v479_v13 }
 0x2fc   :  { %8435 = vmatpush3.xpose.msk.msra.mxu1 %vm580_vm1, %v511_v62  ;;  %8436 = vmatprep.mubr.msk.f32.mxu1 %vm9358_vm0, %v9357_v18 }
 0x2fd   :  { %8444 = vmatprep.subr.mxu1 %v9357_v18  ;;  %8451 = vmatprep.mubr.msk.f32.mxu0 %vm9358_vm0, %v9357_v18 }
 0x2fe   :  { %v515_v19 = vpop.permute.xlu1 %514  ;;  %8459 = vmatprep.subr.mxu0 %v9357_v18 }
 0x2ff   :  { %8437 = vmatmul.mubr.msk.f32.vlgmr.msra.gmra.mrb[14].mxu1 %vm580_vm1, %v483_v14 }
 0x300   :  { %8445 = vmatpush3.xpose.msk.msra.mxu1 %vm580_vm1, %v515_v19  ;;  %8446 = vmatprep.mubr.msk.f32.mxu1 %vm9358_vm0, %v9357_v18 }
 0x301   :  { %8454 = vmatprep.subr.mxu1 %v9357_v18 }
 0x302   :  { %v487_v20 = vpop.permute.xlu1 %486 }
 0x303   :  { %8447 = vmatmul.mubr.msk.f32.vlgmr.msra.gmra.mrb[16].mxu1 %vm580_vm1, %v487_v20 }
 0x304   :  { %8455 = vmatpush3.msra.mxu1 %v9666_v50  ;;  %8456 = vmatprep.mubr.msk.f32.mxu1 %vm9358_vm0, %v9357_v18 }
 0x305   :  { %8464 = vmatprep.subr.mxu1 %v9357_v18 }
 0x335   :  { %v651_v32 = vpop.f32.mrb[8].mxu0 }
 0x336   :  { %v9761_v33 = vadd.f32 %v651_v32, %v9758_v28  ;;  %v8373_v34 = vpop.f32.mrb[9].mxu0 }
 0x338   :  { %v1766_v37 = vsel %vm1765_vm2, %v9761_v33, -inf }
 0x339   :  { %1767 = vmax.xlane.f32.xlu0 %v1766_v37  ;;  %v725_v40 = vpop.f32.mrb[10].mxu0 }
 0x33a   :  { %v9769_v41 = vadd.f32 %v725_v40, %v9764_v35  ;;  %v8378_v42 = vpop.f32.mrb[11].mxu0 }
 0x33c   :  { %v1769_v44 = vsel %vm1765_vm2, %v9769_v41, -inf }
 0x33d   :  { %v799_v46 = vpop.f32.mrb[12].mxu0  ;;  %1770 = vmax.xlane.f32.xlu1 %v1769_v44 }
 0x33e   :  { %v9780_v48 = vadd.f32 %v799_v46, %v9772_v43  ;;  %v8383_v53 = vpop.f32.mrb[13].mxu0 }
 0x33f   :  { %v873_v54 = vpop.f32.mrb[4].mxu1 }
 0x340   :  { %v9783_v55 = vadd.f32 %v873_v54, %v9777_v45  ;;  %v8388_v57 = vpop.f32.mrb[5].mxu1  ;;  %v1772_v58 = vsel %vm1765_vm2, %v9780_v48, -inf }
 0x341   :  { %1773 = vmax.xlane.f32.xlu0 %v1772_v58 }
 0x342   :  { %v1775_v60 = vsel %vm1765_vm2, %v9783_v55, -inf }
 0x345   :  { %1776 = vmax.xlane.f32.xlu0 %v1775_v60 }
 0x3a8   :  { %v947_v61 = vpop.f32.mrb[14].mxu0 }
 0x3a9   :  { %v9790_v62 = vadd.f32 %v947_v61, %v9758_v28  ;;  %v8393_v63 = vpop.f32.mrb[15].mxu0 }
 0x3ab   :  { %v1778_v1 = vsel %vm1765_vm2, %v9790_v62, -inf }
 0x3ac   :  { %1779 = vmax.xlane.f32.xlu0 %v1778_v1 }
 0x3b6   :  { %v1021_v2 = vpop.f32.mrb[6].mxu1 }
 0x3b7   :  { %v9795_v3 = vadd.f32 %v1021_v2, %v9764_v35  ;;  %v8398_v4 = vpop.f32.mrb[7].mxu1 }
 0x3b8   :  { %v9844_v4 = vpop.permute.xlu0 %520 }
 0x3b9   :  { %v1781_v5 = vsel %vm1765_vm2, %v9795_v3, -inf }
 0x3ba   :  { %1782 = vmax.xlane.f32.xlu1 %v1781_v5 }
 0x3bc   :  { %v9852_v5 = vpop.permute.xlu0 %532 }
 0x3bd   :  { %v1095_v6 = vpop.f32.mrb[16].mxu0 }
 0x3be   :  { %v9800_v7 = vadd.f32 %v1095_v6, %v9772_v43  ;;  %v8403_v8 = vpop.f32.mrb[17].mxu0 }
 0x3c0   :  { %v1784_v11 = vsel %vm1765_vm2, %v9800_v7, -inf }
 0x3c1   :  { %1785 = vmax.xlane.f32.xlu0 %v1784_v11  ;;  %v1243_v12 = vpop.f32.mrb[18].mxu0 }
 0x3c2   :  { %v9805_v14 = vadd.f32 %v1243_v12, %v9758_v28  ;;  %v8413_v15 = vpop.f32.mrb[19].mxu0 }
 0x3c4   :  { %v1790_v13 = vsel %vm1765_vm2, %v9805_v14, -inf }
 0x3c5   :  { %1791 = vmax.xlane.f32.xlu0 %v1790_v13  ;;  %v1391_v19 = vpop.f32.mrb[20].mxu0 }
 0x3c6   :  { %v9810_v20 = vadd.f32 %v1391_v19, %v9772_v43  ;;  %v1169_v21 = vpop.f32.mrb[8].mxu1  ;;  %v8423_v22 = vpop.f32.mrb[21].mxu0 }
 0x3c7   :  { %v9813_v23 = vadd.f32 %v1169_v21, %v9777_v45  ;;  %v8408_v24 = vpop.f32.mrb[9].mxu1  ;;  %v1768_v6 = vpop.xlane.xlu0 %1767 }
 0x3c8   :  { %v1796_v25 = vsel %vm1765_vm2, %v9810_v20, -inf  ;;  %v1814_v8 = vsub.f32 %v9761_v33, %v1768_v6  ;;  %v9869_v24 = vpop.permute.xlu1 %522 }
 0x3c9   :  { %1797 = vmax.xlane.f32.xlu0 %v1796_v25  ;;  %v1539_v26 = vpop.f32.mrb[22].mxu0  ;;  %v1787_v27 = vsel %vm1765_vm2, %v9813_v23, -inf }
 0x3ca   :  { %v9820_v29 = vadd.f32 %v1539_v26, %v9758_v28  ;;  %1788 = vmax.xlane.f32.xlu1 %v1787_v27  ;;  %v1317_v30 = vpop.f32.mrb[10].mxu1  ;;  %v8433_v32 = vpop.f32.mrb[23].mxu0  ;;  %v1830_v12 = vmul.f32 1.442695, %v1814_v8 }
 0x3cb   :  { %v9823_v31 = vadd.f32 %v1317_v30, %v9764_v35  ;;  %v8418_v34 = vpop.f32.mrb[11].mxu1 }
 0x3cc   :  { %v1802_v36 = vsel %vm1765_vm2, %v9820_v29, -inf  ;;  %9035 = vpow2.f32 %v1830_v12  ;;  %v9871_v25 = vpop.permute.xlu1 %524 }
 0x3cd   :  { %1803 = vmax.xlane.f32.xlu0 %v1802_v36  ;;  %v1687_v37 = vpop.f32.mrb[24].mxu0  ;;  %v1793_v38 = vsel %vm1765_vm2, %v9823_v31, -inf }
 0x3ce   :  { %v9830_v40 = vadd.f32 %v1687_v37, %v9772_v43  ;;  %1794 = vmax.xlane.f32.xlu1 %v1793_v38  ;;  %v1465_v42 = vpop.f32.mrb[12].mxu1  ;;  %v8443_v44 = vpop.f32.mrb[25].mxu0 }
 0x3cf   :  { %v9833_v46 = vadd.f32 %v1465_v42, %v9777_v45  ;;  %v8428_v53 = vpop.f32.mrb[13].mxu1  ;;  %v1774_v11 = vpop.xlane.xlu0 %1773 }
 0x3d0   :  { %v1808_v54 = vsel %vm1765_vm2, %v9830_v40, -inf  ;;  %v1816_v15 = vsub.f32 %v9780_v48, %v1774_v11  ;;  %v9875_v26 = vpop.permute.xlu1 %526 }
 0x3d1   :  { %1809 = vmax.xlane.f32.xlu0 %v1808_v54  ;;  %v1799_v57 = vsel %vm1765_vm2, %v9833_v46, -inf }
 0x3d2   :  { %1800 = vmax.xlane.f32.xlu1 %v1799_v57  ;;  %v1613_v58 = vpop.f32.mrb[14].mxu1  ;;  %v1834_v13 = vmul.f32 1.442695, %v1816_v15 }
 0x3d3   :  { %v9840_v60 = vadd.f32 %v1613_v58, %v9764_v35  ;;  %v8438_v61 = vpop.f32.mrb[15].mxu1  ;;  %v1777_v34 = vpop.xlane.xlu0 %1776 }
 0x3d4   :  { %9037 = vpow2.f32 %v1834_v13  ;;  %v9877_v27 = vpop.permute.xlu1 %534  ;;  %v1817_v37 = vsub.f32 %v9783_v55, %v1777_v34 }
 0x3d5   :  { %v1805_v63 = vsel %vm1765_vm2, %v9840_v60, -inf }
 0x3d6   :  { %1806 = vmax.xlane.f32.xlu1 %v1805_v63  ;;  %v1761_v1 = vpop.f32.mrb[16].mxu1  ;;  %v9856_v19 = vpop.eup %9035  ;;  %v1836_v38 = vmul.f32 1.442695, %v1817_v37 }
 0x3d7   :  { %v8448_v2 = vpop.f32.mrb[17].mxu1  ;;  %v9859_v21 = vadd.f32 %v1761_v1, %v9777_v45 }
 0x3d8   :  { %v1771_v30 = vpop.xlane.xlu1 %1770 }
 0x3d9   :  { %v1811_v33 = vsel %vm1765_vm2, %v9859_v21, -inf  ;;  %v1815_v32 = vsub.f32 %v9769_v41, %v1771_v30 }
 0x3db   :  { %v1832_v36 = vmul.f32 1.442695, %v1815_v32 }
 0x3dd   :  { %9039 = vpow2.f32 %v1832_v36 }
 0x3de   :  { %v9863_v22 = vpop.eup %9037  ;;  %9041 = vpow2.f32 %v1836_v38 }
 0x3df   :  { %v1868_v48 = vsel %vm1765_vm2, %v9863_v22, 0.0 }
 0x3e7   :  { %538 = vrot.lane.b32.xlu1 %v9675_v52, %s9349_s19  ;;  %536 = vrot.lane.b32.xlu0 %v9671_v51, %s9349_s19  ;;  %v9882_v53 = vpop.eup %9039 }
 0x3e8   :  { %v1865_v54 = vsel %vm1765_vm2, %v9882_v53, 0.0  ;;  %v9886_v57 = vpop.eup %9041 }
 0x3e9   :  { %v1871_v41 = vsel %vm1765_vm2, %v9886_v57, 0.0 }
 0x3eb   :  { %544 = vrot.lane.b32.xlu0 %v9658_v49, %s9360_s27  ;;  %v1862_v49 = vsel %vm1765_vm2, %v9856_v19, 0.0 }
 0x40a   :  { %1863 = vadd.xlane.f32.xlu0 %v1862_v49 }
 0x40b   :  { %1812 = vmax.xlane.f32.xlu1 %v1811_v33 }
 0x40e   :  { %1869 = vadd.xlane.f32.xlu0 %v1868_v48 }
 0x41c   :  { %546 = vrot.lane.b32.xlu1 %v9666_v50, %s9360_s27 }
 0x439   :  { %v1780_v42 = vpop.xlane.xlu0 %1779 }
 0x43a   :  { %v1818_v44 = vsub.f32 %v9790_v62, %v1780_v42 }
 0x43c   :  { %v1838_v50 = vmul.f32 1.442695, %v1818_v44 }
 0x43e   :  { %9043 = vpow2.f32 %v1838_v50 }
 0x440   :  { %1866 = vadd.xlane.f32.xlu1 %v1865_v54 }
 0x444   :  { %1872 = vadd.xlane.f32.xlu1 %v1871_v41 }
 0x447   :  { %v1783_v55 = vpop.xlane.xlu1 %1782 }
 0x448   :  { %v9890_v58 = vpop.eup %9043  ;;  %v1819_v61 = vsub.f32 %v9795_v3, %v1783_v55 }
 0x449   :  { %v1874_v62 = vsel %vm1765_vm2, %v9890_v58, 0.0 }
 0x44a   :  { %v1840_v63 = vmul.f32 1.442695, %v1819_v61  ;;  %1875 = vadd.xlane.f32.xlu0 %v1874_v62 }
 0x44c   :  { %9045 = vpow2.f32 %v1840_v63 }
 0x44e   :  { %v1786_v1 = vpop.xlane.xlu0 %1785 }
 0x44f   :  { %v1820_v2 = vsub.f32 %v9800_v7, %v1786_v1 }
 0x451   :  { %v1842_v6 = vmul.f32 1.442695, %v1820_v2 }
 0x452   :  { %v1792_v8 = vpop.xlane.xlu0 %1791 }
 0x453   :  { %9047 = vpow2.f32 %v1842_v6  ;;  %v1822_v11 = vsub.f32 %v9805_v14, %v1792_v8 }
 0x455   :  { %v1846_v12 = vmul.f32 1.442695, %v1822_v11 }
 0x456   :  { %v9897_v15 = vpop.eup %9045  ;;  %v1798_v13 = vpop.xlane.xlu0 %1797 }
 0x457   :  { %9049 = vpow2.f32 %v1846_v12  ;;  %v1824_v3 = vsub.f32 %v9810_v20, %v1798_v13  ;;  %v1789_v49 = vpop.xlane.xlu1 %1788  ;;  %v1877_v33 = vsel %vm1765_vm2, %v9897_v15, 0.0 }
 0x458   :  { %v1821_v48 = vsub.f32 %v9813_v23, %v1789_v49  ;;  %1878 = vadd.xlane.f32.xlu1 %v1877_v33 }
 0x459   :  { %v1850_v7 = vmul.f32 1.442695, %v1824_v3 }
 0x45a   :  { %v1844_v30 = vmul.f32 1.442695, %v1821_v48  ;;  %v1804_v32 = vpop.xlane.xlu0 %1803 }
 0x45b   :  { %9051 = vpow2.f32 %v1850_v7  ;;  %v1826_v14 = vsub.f32 %v9820_v29, %v1804_v32  ;;  %v1795_v34 = vpop.xlane.xlu1 %1794 }
 0x45c   :  { %9053 = vpow2.f32 %v1844_v30  ;;  %v1823_v36 = vsub.f32 %v9823_v31, %v1795_v34 }
 0x45d   :  { %v9905_v37 = vpop.eup %9047  ;;  %v1854_v20 = vmul.f32 1.442695, %v1826_v14 }
 0x45e   :  { %v1848_v38 = vmul.f32 1.442695, %v1823_v36  ;;  %v1810_v42 = vpop.xlane.xlu0 %1809  ;;  %v1880_v44 = vsel %vm1765_vm2, %v9905_v37, 0.0 }
 0x45f   :  { %9055 = vpow2.f32 %v1854_v20  ;;  %v1828_v23 = vsub.f32 %v9830_v40, %v1810_v42  ;;  %v1801_v50 = vpop.xlane.xlu1 %1800  ;;  %1881 = vadd.xlane.f32.xlu0 %v1880_v44 }
 0x460   :  { %9057 = vpow2.f32 %v1848_v38  ;;  %v1825_v29 = vsub.f32 %v9833_v46, %v1801_v50 }
 0x461   :  { %v9911_v54 = vpop.eup %9049  ;;  %v1858_v41 = vmul.f32 1.442695, %v1828_v23 }
 0x462   :  { %v1852_v31 = vmul.f32 1.442695, %v1825_v29  ;;  %v1886_v55 = vsel %vm1765_vm2, %v9911_v54, 0.0  ;;  %v9946_v7 = vpop.permute.xlu0 %536 }
 0x463   :  { %9059 = vpow2.f32 %v1858_v41  ;;  %v1807_v61 = vpop.xlane.xlu1 %1806  ;;  %1887 = vadd.xlane.f32.xlu0 %v1886_v55 }
 0x464   :  { %9061 = vpow2.f32 %v1852_v31  ;;  %v1827_v62 = vsub.f32 %v9840_v60, %v1807_v61 }
 0x465   :  { %v9916_v63 = vpop.eup %9051 }
 0x466   :  { %v9918_v40 = vpop.eup %9053  ;;  %v1856_v1 = vmul.f32 1.442695, %v1827_v62  ;;  %v1892_v46 = vsel %vm1765_vm2, %v9916_v63, 0.0  ;;  %v9948_v30 = vpop.permute.xlu0 %544 }
 0x467   :  { %1893 = vadd.xlane.f32.xlu0 %v1892_v46  ;;  %v1883_v2 = vsel %vm1765_vm2, %v9918_v40, 0.0  ;;  %v9950_v32 = vpop.permute.xlu1 %538 }
 0x468   :  { %9063 = vpow2.f32 %v1856_v1  ;;  %1884 = vadd.xlane.f32.xlu1 %v1883_v2 }
 0x469   :  { %v9924_v6 = vpop.eup %9055 }
 0x46a   :  { %v9926_v8 = vpop.eup %9057  ;;  %v1898_v60 = vsel %vm1765_vm2, %v9924_v6, 0.0 }
 0x46b   :  { %1899 = vadd.xlane.f32.xlu0 %v1898_v60  ;;  %v1889_v11 = vsel %vm1765_vm2, %v9926_v8, 0.0 }
 0x46c   :  { %1890 = vadd.xlane.f32.xlu1 %v1889_v11 }
 0x46d   :  { %v9932_v12 = vpop.eup %9059 }
 0x46e   :  { %v9934_v13 = vpop.eup %9061  ;;  %v1904_v3 = vsel %vm1765_vm2, %v9932_v12, 0.0 }
 0x46f   :  { %1905 = vadd.xlane.f32.xlu0 %v1904_v3  ;;  %v1895_v49 = vsel %vm1765_vm2, %v9934_v13, 0.0 }
 0x470   :  { %1896 = vadd.xlane.f32.xlu1 %v1895_v49 }
 0x472   :  { %v9940_v33 = vpop.eup %9063 }
 0x473   :  { %v1901_v48 = vsel %vm1765_vm2, %v9940_v33, 0.0 }
 0x474   :  { %1902 = vadd.xlane.f32.xlu1 %v1901_v48 }
 0x485   :  { %548 = vrot.lane.b32.xlu0 %v9671_v51, %s9360_s27 }
 0x497   :  { %v1864_v14 = vpop.xlane.xlu0 %1863 }
 0x498   :  { %9065 = vrcp.f32 %v1864_v14  ;;  %v1813_v34 = vpop.xlane.xlu1 %1812 }
 0x499   :  { %v1829_v36 = vsub.f32 %v9859_v21, %v1813_v34 }
 0x49b   :  { %v1860_v20 = vmul.f32 1.442695, %v1829_v36  ;;  %v1870_v38 = vpop.xlane.xlu0 %1869 }
 0x49c   :  { %9067 = vrcp.f32 %v1870_v38 }
 0x49d   :  { %9069 = vpow2.f32 %v1860_v20 }
 0x4a2   :  { %v9066_v42 = vpop.eup %9065 }
 0x4a3   :  { %v1926_v44 = vmul.f32 %v9066_v42, %v9856_v19 }
 0x4a5   :  { %8452 = vmatmul.mubr.msk.f32.vlgmr.msra.gmra.mrb[26].mxu0 %vm1765_vm2, %v1926_v44 }
 0x4a6   :  { %v9068_v23 = vpop.eup %9067  ;;  %8460 = vmatpush3.msra.mxu0 %v9671_v51  ;;  %8461 = vmatprep.mubr.msk.f32.mxu0 %vm9358_vm0, %v9357_v18  ;;  %v9971_v51 = vpop.permute.xlu1 %546 }
 0x4a7   :  { %v9958_v50 = vpop.eup %9069  ;;  %8469 = vmatprep.subr.mxu0 %v9357_v18  ;;  %v1928_v21 = vmul.f32 %v9068_v23, %v9863_v22 }
 0x4a8   :  { %v1907_v29 = vsel %vm1765_vm2, %v9958_v50, 0.0 }
 0x4a9   :  { %1908 = vadd.xlane.f32.xlu1 %v1907_v29  ;;  %8462 = vmatmul.mubr.msk.f32.vlgmr.msra.gmra.mrb[28].mxu0 %vm1765_vm2, %v1928_v21 }
 0x4aa   :  { %8470 = vmatpush3.msra.mxu0 %v9844_v4  ;;  %8471 = vmatprep.mubr.msk.f32.mxu0 %vm9358_vm0, %v9357_v18 }
 0x4ab   :  { %8479 = vmatprep.subr.mxu0 %v9357_v18 }
 0x4ba   :  { %550 = vrot.lane.b32.xlu1 %v9675_v52, %s9360_s27 }
 0x4cd   :  { %v1867_v19 = vpop.xlane.xlu1 %1866 }
 0x4ce   :  { %9071 = vrcp.f32 %v1867_v19 }
 0x4d1   :  { %v1873_v22 = vpop.xlane.xlu1 %1872 }
 0x4d2   :  { %9073 = vrcp.f32 %v1873_v22 }
 0x4d7   :  { %v1876_v41 = vpop.xlane.xlu0 %1875 }
 0x4d8   :  { %v9072_v31 = vpop.eup %9071  ;;  %9075 = vrcp.f32 %v1876_v41 }
 0x4d9   :  { %v1927_v55 = vmul.f32 %v9072_v31, %v9882_v53 }
 0x4db   :  { %8457 = vmatmul.mubr.msk.f32.vlgmr.msra.gmra.mrb[18].mxu1 %vm1765_vm2, %v1927_v55 }
 0x4dc   :  { %v9074_v4 = vpop.eup %9073  ;;  %8465 = vmatpush3.msra.mxu1 %v9675_v52  ;;  %8466 = vmatprep.mubr.msk.f32.mxu1 %vm9358_vm0, %v9357_v18 }
 0x4dd   :  { %8474 = vmatprep.subr.mxu1 %v9357_v18  ;;  %v1929_v61 = vmul.f32 %v9074_v4, %v9886_v57 }
 0x4df   :  { %8467 = vmatmul.mubr.msk.f32.vlgmr.msra.gmra.mrb[20].mxu1 %vm1765_vm2, %v1929_v61 }
 0x4e0   :  { %8475 = vmatpush3.msra.mxu1 %v9869_v24  ;;  %8476 = vmatprep.mubr.msk.f32.mxu1 %vm9358_vm0, %v9357_v18 }
 0x4e1   :  { %8484 = vmatprep.subr.mxu1 %v9357_v18 }
 0x4e2   :  { %v9076_v53 = vpop.eup %9075 }
 0x4e3   :  { %v1930_v62 = vmul.f32 %v9076_v53, %v9890_v58 }
 0x4e5   :  { %v1879_v52 = vpop.xlane.xlu1 %1878  ;;  %8472 = vmatmul.mubr.msk.f32.vlgmr.msra.gmra.mrb[30].mxu0 %vm1765_vm2, %v1930_v62 }
 0x4e6   :  { %9077 = vrcp.f32 %v1879_v52  ;;  %8480 = vmatpush3.msra.mxu0 %v9871_v25  ;;  %8481 = vmatprep.mubr.msk.f32.mxu0 %vm9358_vm0, %v9357_v18 }
 0x4e7   :  { %8489 = vmatprep.subr.mxu0 %v9357_v18 }
 0x4ec   :  { %v1882_v24 = vpop.xlane.xlu0 %1881 }
 0x4ed   :  { %9079 = vrcp.f32 %v1882_v24 }
 0x4f0   :  { %v9078_v57 = vpop.eup %9077  ;;  %v1888_v1 = vpop.xlane.xlu0 %1887 }
 0x4f1   :  { %9081 = vrcp.f32 %v1888_v1  ;;  %v1931_v46 = vmul.f32 %v9078_v57, %v9897_v15 }
 0x4f3   :  { %8477 = vmatmul.mubr.msk.f32.vlgmr.msra.gmra.mrb[22].mxu1 %vm1765_vm2, %v1931_v46 }
 0x4f4   :  { %8485 = vmatpush3.msra.mxu1 %v9875_v26  ;;  %v1894_v58 = vpop.xlane.xlu0 %1893  ;;  %8486 = vmatprep.mubr.msk.f32.mxu1 %vm9358_vm0, %v9357_v18 }
 0x4f5   :  { %9083 = vrcp.f32 %v1894_v58  ;;  %v1885_v25 = vpop.xlane.xlu1 %1884  ;;  %8494 = vmatprep.subr.mxu1 %v9357_v18 }
 0x4f6   :  { %9085 = vrcp.f32 %v1885_v25 }
 0x4f7   :  { %v9080_v2 = vpop.eup %9079 }
 0x4f8   :  { %v1900_v60 = vpop.xlane.xlu0 %1899  ;;  %v1932_v11 = vmul.f32 %v9080_v2, %v9905_v37 }
 0x4f9   :  { %9087 = vrcp.f32 %v1900_v60  ;;  %v1891_v3 = vpop.xlane.xlu1 %1890 }
 0x4fa   :  { %9089 = vrcp.f32 %v1891_v3  ;;  %8482 = vmatmul.mubr.msk.f32.vlgmr.msra.gmra.mrb[32].mxu0 %vm1765_vm2, %v1932_v11 }
 0x4fb   :  { %v9082_v15 = vpop.eup %9081  ;;  %8490 = vmatpush3.msra.mxu0 %v9852_v5  ;;  %8491 = vmatprep.mubr.msk.f32.mxu0 %vm9358_vm0, %v9357_v18 }
 0x4fc   :  { %v1906_v26 = vpop.xlane.xlu0 %1905  ;;  %8499 = vmatprep.subr.mxu0 %v9357_v18  ;;  %v1934_v49 = vmul.f32 %v9082_v15, %v9911_v54 }
 0x4fd   :  { %9091 = vrcp.f32 %v1906_v26  ;;  %v1897_v48 = vpop.xlane.xlu1 %1896 }
 0x4fe   :  { %9093 = vrcp.f32 %v1897_v48  ;;  %8492 = vmatmul.mubr.msk.f32.vlgmr.msra.gmra.mrb[34].mxu0 %vm1765_vm2, %v1934_v49  ;;  %v8875_v49 = vld [vmem:[%s10913_s3] sm:$0xff]   ;;  %v8876_v48 = vld [vmem:[%s10913_s3 + $0x8] sm:$0xff]  }
 0x4ff   :  { %v9084_v37 = vpop.eup %9083  ;;  %8500 = vmatpush3.msra.mxu0 %v9946_v7  ;;  %8501 = vmatprep.mubr.msk.f32.mxu0 %vm9358_vm0, %v9357_v18 }
 0x500   :  { %v9086_v5 = vpop.eup %9085  ;;  %8509 = vmatprep.subr.mxu0 %v9357_v18  ;;  %v1936_v14 = vmul.f32 %v9084_v37, %v9916_v63 }
 0x501   :  { %v1903_v34 = vpop.xlane.xlu1 %1902  ;;  %v1933_v36 = vmul.f32 %v9086_v5, %v9918_v40  ;;  %v549_v40 = vpop.permute.xlu0 %548 }
 0x502   :  { %9095 = vrcp.f32 %v1903_v34  ;;  %8502 = vmatmul.mubr.msk.f32.vlgmr.msra.gmra.mrb[36].mxu0 %vm1765_vm2, %v1936_v14 }
 0x503   :  { %v9088_v54 = vpop.eup %9087  ;;  %8510 = vmatpush3.msra.mxu0 %v9948_v30  ;;  %8487 = vmatmul.mubr.msk.f32.vlgmr.msra.gmra.mrb[24].mxu1 %vm1765_vm2, %v1933_v36  ;;  %v8877_v36 = vld [vmem:[%s10913_s3 + $0x10] sm:$0xff]  }
 0x504   :  { %v9090_v7 = vpop.eup %9089  ;;  %8495 = vmatpush3.msra.mxu1 %v9877_v27  ;;  %8511 = vmatprep.mubr.msk.f32.mxu0 %vm9358_vm0, %v9357_v18  ;;  %v1938_v20 = vmul.f32 %v9088_v54, %v9924_v6 }
 0x505   :  { %8519 = vmatprep.subr.mxu0 %v9357_v18  ;;  %8496 = vmatprep.mubr.msk.f32.mxu1 %vm9358_vm0, %v9357_v18  ;;  %v1935_v63 = vmul.f32 %v9090_v7, %v9926_v8 }
 0x506   :  { %8504 = vmatprep.subr.mxu1 %v9357_v18  ;;  %8512 = vmatmul.mubr.msk.f32.vlgmr.msra.gmra.mrb[38].mxu0 %vm1765_vm2, %v1938_v20 }
 0x507   :  { %v9092_v30 = vpop.eup %9091  ;;  %8520 = vmatpush3.msra.mxu0 %v549_v40  ;;  %8497 = vmatmul.mubr.msk.f32.vlgmr.msra.gmra.mrb[26].mxu1 %vm1765_vm2, %v1935_v63  ;;  %v8878_v63 = vld [vmem:[%s10913_s3 + $0x18] sm:$0xff]   ;;  %v8879_v40 = vld [vmem:[%s10913_s3 + $0x20] sm:$0xff]  }
 0x508   :  { %v9094_v27 = vpop.eup %9093  ;;  %8505 = vmatpush3.msra.mxu1 %v9950_v32  ;;  %8521 = vmatprep.mubr.msk.f32.mxu0 %vm9358_vm0, %v9357_v18  ;;  %v1940_v6 = vmul.f32 %v9092_v30, %v9932_v12  ;;  %v8880_v30 = vld [vmem:[%s10913_s3 + $0x28] sm:$0xff]  }
 0x509   :  { %8506 = vmatprep.mubr.msk.f32.mxu1 %vm9358_vm0, %v9357_v18  ;;  %8514 = vmatprep.subr.mxu1 %v9357_v18  ;;  %v1937_v8 = vmul.f32 %v9094_v27, %v9934_v13  ;;  %v8881_v27 = vld [vmem:[%s10913_s3 + $0x30] sm:$0xff]  }
 0x50a   :  { %8522 = vmatmul.mubr.msk.f32.vlgmr.msra.gmra.mrb[40].mxu0 %vm1765_vm2, %v1940_v6  ;;  %8529 = vmatprep.subr.bf16.mxu0 %v8875_v49  ;;  %v8882_v6 = vld [vmem:[%s10913_s3 + $0x38] sm:$0xff]  }
 0x50b   :  { %8507 = vmatmul.mubr.msk.f32.vlgmr.msra.gmra.mrb[28].mxu1 %vm1765_vm2, %v1937_v8  ;;  %8530 = vmatpush3.bf16.msra.mxu0 %v8875_v49 }
 0x50c   :  { %v9096_v38 = vpop.eup %9095  ;;  %8515 = vmatpush3.msra.mxu1 %v9971_v51  ;;  %8516 = vmatprep.mubr.msk.f32.mxu1 %vm9358_vm0, %v9357_v18 }
 0x50d   :  { %v1939_v32 = vmul.f32 %v9096_v38, %v9940_v33  ;;  %8524 = vmatprep.subr.mxu1 %v9357_v18  ;;  %8531 = vmatprep.subr.bf16.mxu0 %v8876_v48 }
 0x50f   :  { %8517 = vmatmul.mubr.msk.f32.vlgmr.msra.gmra.mrb[30].mxu1 %vm1765_vm2, %v1939_v32  ;;  %8532 = vmatpush3.bf16.msra.mxu0 %v8876_v48 }
 0x510   :  { %8526 = vmatprep.mubr.msk.f32.mxu1 %vm9358_vm0, %v9357_v18  ;;  %8533 = vmatprep.subr.bf16.mxu0 %v8877_v36 }
 0x513   :  { %8534 = vmatpush3.bf16.msra.mxu0 %v8877_v36 }
 0x514   :  { %8535 = vmatprep.subr.bf16.mxu0 %v8878_v63 }
 0x517   :  { %8536 = vmatpush3.bf16.msra.mxu0 %v8878_v63 }
 0x518   :  { %8537 = vmatprep.subr.bf16.mxu0 %v8879_v40 }
 0x51b   :  { %8538 = vmatpush3.bf16.msra.mxu0 %v8879_v40 }
 0x51c   :  { %8539 = vmatprep.subr.bf16.mxu0 %v8880_v30 }
 0x51f   :  { %8540 = vmatpush3.bf16.msra.mxu0 %v8880_v30 }
 0x520   :  { %8541 = vmatprep.subr.bf16.mxu0 %v8881_v27 }
 0x523   :  { %8542 = vmatpush3.bf16.msra.mxu0 %v8881_v27 }
 0x524   :  { %8543 = vmatprep.subr.bf16.mxu0 %v8882_v6 }
 0x527   :  { %8544 = vmatpush3.bf16.msra.mxu0 %v8882_v6 }
 0x536   :  { %v1909_v12 = vpop.xlane.xlu1 %1908 }
 0x537   :  { %9097 = vrcp.f32 %v1909_v12 }
 0x53a   :  { %v551_v13 = vpop.permute.xlu1 %550 }
 0x53b   :  { %8525 = vmatpush3.msra.mxu1 %v551_v13 }
 0x541   :  { %v9098_v42 = vpop.eup %9097 }
 0x542   :  { %v1941_v44 = vmul.f32 %v9098_v42, %v9958_v50 }
 0x544   :  { %8527 = vmatmul.mubr.msk.f32.vlgmr.msra.gmra.mrb[32].mxu1 %vm1765_vm2, %v1941_v44 }
 0x545   :  { %3493 = vmatprep.mubr.bf16.mxu1 %v9356_v39 }
 0x578   :  { %v10046_v23 = vpop.f32.mrb[26].mxu0 }
 0x579   :  { %v8453_v33 = vpop.f32.mrb[27].mxu0 }
 0x57c   :  { %v10048_v21 = vpop.f32.mrb[28].mxu0 }
 0x57d   :  { %v8463_v29 = vpop.f32.mrb[29].mxu0 }
 0x5ae   :  { %v10050_v51 = vpop.f32.mrb[18].mxu1 }
 0x5af   :  { %v8458_v19 = vpop.f32.mrb[19].mxu1 }
 0x5b2   :  { %v10052_v22 = vpop.f32.mrb[20].mxu1 }
 0x5b3   :  { %v8468_v41 = vpop.f32.mrb[21].mxu1 }
 0x5b8   :  { %v2303_v31 = vpop.f32.mrb[30].mxu0 }
 0x5b9   :  { %v8473_v55 = vpop.f32.mrb[31].mxu0 }
 0x5c6   :  { %v2376_v4 = vpop.f32.mrb[22].mxu1 }
 0x5c7   :  { %v8783_v50 = vpack.i.bf16 %v2376_v4, %v2303_v31  ;;  %v8478_v61 = vpop.f32.mrb[23].mxu1 }
 0x5c9   :  { %8784 = vrot.lane.b32.xlu0 %v8783_v50, %s9360_s27 }
 0x5cd   :  { %v2449_v53 = vpop.f32.mrb[32].mxu0 }
 0x5ce   :  { %v8483_v62 = vpop.f32.mrb[33].mxu0 }
 0x5d1   :  { %v2595_v52 = vpop.f32.mrb[34].mxu0 }
 0x5d2   :  { %v8493_v24 = vpop.f32.mrb[35].mxu0 }
 0x5d5   :  { %v2741_v57 = vpop.f32.mrb[36].mxu0 }
 0x5d6   :  { %v2522_v1 = vpop.f32.mrb[24].mxu1  ;;  %v8503_v46 = vpop.f32.mrb[37].mxu0 }
 0x5d7   :  { %v8788_v58 = vpack.i.bf16 %v2522_v1, %v2449_v53  ;;  %v8488_v25 = vpop.f32.mrb[25].mxu1 }
 0x5d9   :  { %8789 = vrot.lane.b32.xlu1 %v8788_v58, %s9360_s27  ;;  %v2887_v2 = vpop.f32.mrb[38].mxu0 }
 0x5da   :  { %v2668_v60 = vpop.f32.mrb[26].mxu1  ;;  %v8513_v11 = vpop.f32.mrb[39].mxu0 }
 0x5db   :  { %v8793_v3 = vpack.i.bf16 %v2668_v60, %v2595_v52  ;;  %v8498_v15 = vpop.f32.mrb[27].mxu1 }
 0x5dd   :  { %8794 = vrot.lane.b32.xlu0 %v8793_v3, %s9349_s19  ;;  %v3033_v26 = vpop.f32.mrb[40].mxu0 }
 0x5de   :  { %v2814_v37 = vpop.f32.mrb[28].mxu1  ;;  %v8523_v5 = vpop.f32.mrb[41].mxu0 }
 0x5df   :  { %v8798_v14 = vpack.i.bf16 %v2814_v37, %v2741_v57  ;;  %v8508_v34 = vpop.f32.mrb[29].mxu1  ;;  %v10101_v37 = vsub.s32 3, %v9567_v56 }
 0x5e1   :  { %8799 = vrot.lane.b32.xlu1 %v8798_v14, %s9349_s19 }
 0x5e2   :  { %v2960_v54 = vpop.f32.mrb[30].mxu1 }
 0x5e3   :  { %v8803_v7 = vpack.i.bf16 %v2960_v54, %v2887_v2  ;;  %v8518_v20 = vpop.f32.mrb[31].mxu1 }
 0x5e5   :  { %8804 = vrot.lane.b32.xlu0 %v8803_v7, %s9359_s26 }
 0x617   :  { %v3106_v8 = vpop.f32.mrb[32].mxu1 }
 0x618   :  { %v8808_v38 = vpack.i.bf16 %v3106_v8, %v3033_v26  ;;  %v8528_v32 = vpop.f32.mrb[33].mxu1  ;;  %v8883_v8 = vld [vmem:[#allocation2] ss:$8 sps:$4 sm:$0xff]  }
 0x619   :  { %v8888_v32 = vld [vmem:[#allocation2 + $0x14] ss:$8 sps:$4 sm:$0xff]  }
 0x61a   :  { %8809 = vrot.lane.b32.xlu1 %v8808_v38, %s9359_s26  ;;  %v8885_v38 = vld [vmem:[#allocation2 + $0x4] ss:$8 sps:$4 sm:$0xff]  }
 0x61b   :  { %3461 = vmatprep.subr.bf16.mxu1 %v8885_v38 }
 0x61c   :  { %3462 = vmatpush1.bf16.msra.mxu1 %v8883_v8 }
 0x61d   :  { %3463 = vmatprep.subr.bf16.mxu1 %v8888_v32 }
 0x63b   :  { %v8785_v12 = vpop.permute.xlu0 %8784 }
 0x63c   :  { %v8787_v42 = vunpack.i.h.bf16 %v8785_v12  ;;  %v8786_v44 = vunpack.i.l.bf16 %v8785_v12  ;;  %v8886_v12 = vld [vmem:[#allocation2 + $0x10] ss:$8 sps:$4 sm:$0xff]  }
 0x63d   :  { %3464 = vmatpush1.bf16.msra.mxu1 %v8886_v12 }
 0x63e   :  { %v3159_v41 = vsel %vm580_vm1, %v10050_v51, %v8787_v42  ;;  %v3158_v31 = vsel %vm580_vm1, %v10046_v23, %v8786_v44 }
 0x64b   :  { %v8790_v24 = vpop.permute.xlu1 %8789 }
 0x64c   :  { %v8792_v1 = vunpack.i.h.bf16 %v8790_v24  ;;  %v8791_v46 = vunpack.i.l.bf16 %v8790_v24  ;;  %v8892_v24 = vld [vmem:[#allocation2 + $0x30] ss:$8 sps:$4 sm:$0xff]  }
 0x64e   :  { %v3161_v23 = vsel %vm580_vm1, %v10052_v22, %v8792_v1  ;;  %v3160_v2 = vsel %vm580_vm1, %v10048_v21, %v8791_v46  ;;  %v10106_v22 = vld [vmem:[%s10916_s6] sm:$0xff]  ;;  %v8898_v46 = vld [vmem:[#allocation2 + $0x50] ss:$8 sps:$4 sm:$0xff]  }
 0x64f   :  { %v8795_v13 = vpop.permute.xlu0 %8794  ;;  %v3193_v21 = vrot.slane %v10106_v22, %v10101_v37  ;;  %v8895_v1 = vld [vmem:[#allocation2 + $0x40] ss:$8 sps:$4 sm:$0xff]  }
 0x650   :  { %v8797_v33 = vunpack.i.h.bf16 %v8795_v13  ;;  %v8796_v29 = vunpack.i.l.bf16 %v8795_v13 }
 0x652   :  { %v3163_v50 = vsel %vm3162_vm3, %v3158_v31, %v8796_v29  ;;  %v3164_v61 = vsel %vm3162_vm3, %v3159_v41, %v8797_v33 }
 0x653   :  { %v8800_v57 = vpop.permute.xlu1 %8799 }
 0x654   :  { %v8802_v51 = vunpack.i.h.bf16 %v8800_v57  ;;  %v8801_v58 = vunpack.i.l.bf16 %v8800_v57  ;;  %v8897_v57 = vld [vmem:[#allocation2 + $0x44] ss:$8 sps:$4 sm:$0xff]  }
 0x656   :  { %v3166_v3 = vsel %vm3162_vm3, %v3161_v23, %v8802_v51  ;;  %v3165_v15 = vsel %vm3162_vm3, %v3160_v2, %v8801_v58  ;;  %v8900_v51 = vld [vmem:[#allocation2 + $0x54] ss:$8 sps:$4 sm:$0xff]   ;;  %v8903_v58 = vld [vmem:[#allocation2 + $0x64] ss:$8 sps:$4 sm:$0xff]   ;;  %v8904_v2 = vld [vmem:[#allocation2 + $0x70] ss:$8 sps:$4 sm:$0xff]  }
 0x657   :  { %v8805_v19 = vpop.permute.xlu0 %8804  ;;  %v8906_v23 = vld [vmem:[#allocation2 + $0x74] ss:$8 sps:$4 sm:$0xff]  }
 0x658   :  { %v8807_v55 = vunpack.i.h.bf16 %v8805_v19  ;;  %v8806_v4 = vunpack.i.l.bf16 %v8805_v19 }
 0x65a   :  { %v3168_v53 = vsel %vm3167_vm4, %v3163_v50, %v8806_v4  ;;  %v3169_v62 = vsel %vm3167_vm4, %v3164_v61, %v8807_v55 }
 0x65b   :  { %v3172_v52 = vpack.c.bf16 %v3169_v62, %v3168_v53  ;;  %v8891_v53 = vld [vmem:[#allocation2 + $0x24] ss:$8 sps:$4 sm:$0xff]   ;;  %v8889_v62 = vld [vmem:[#allocation2 + $0x20] ss:$8 sps:$4 sm:$0xff]  }
 0x65c   :  { %3465 = vmatprep.subr.bf16.mxu1 %v8891_v53  ;;  %v8913_v53 = vld [vmem:[#allocation5 + $0x58] sm:$0xff]  }
 0x65d   :  { %8545 = vmatprep.mubr.bf16.mxu0 %v3172_v52  ;;  %3466 = vmatpush1.bf16.msra.mxu1 %v8889_v62  ;;  %v8894_v52 = vld [vmem:[#allocation2 + $0x34] ss:$8 sps:$4 sm:$0xff]  }
 0x65e   :  { %3467 = vmatprep.subr.bf16.mxu1 %v8894_v52  ;;  %v8914_v62 = vld [vmem:[#allocation5 + $0x18] sm:$0xff]   ;;  %v8915_v52 = vld [vmem:[#allocation5 + $0x60] sm:$0xff]  }
 0x661   :  { %3468 = vmatpush1.bf16.msra.mxu1 %v8892_v24  ;;  %v8916_v24 = vld [vmem:[#allocation5 + $0x20] sm:$0xff]  }
 0x662   :  { %3469 = vmatprep.subr.bf16.mxu1 %v8897_v57  ;;  %v8917_v57 = vld [vmem:[#allocation5 + $0x68] sm:$0xff]  }
 0x665   :  { %3470 = vmatpush1.bf16.msra.mxu1 %v8895_v1  ;;  %v8918_v1 = vld [vmem:[#allocation5 + $0x28] sm:$0xff]  }
 0x666   :  { %3471 = vmatprep.subr.bf16.mxu1 %v8900_v51  ;;  %v8920_v51 = vld [vmem:[#allocation5 + $0x30] sm:$0xff]  }
 0x669   :  { %3472 = vmatpush1.bf16.msra.mxu1 %v8898_v46  ;;  %v8919_v46 = vld [vmem:[#allocation5 + $0x70] sm:$0xff]  }
 0x66a   :  { %3473 = vmatprep.subr.bf16.mxu1 %v8903_v58  ;;  %v8921_v58 = vld [vmem:[#allocation5 + $0x78] sm:$0xff]  }
 0x68c   :  { %v8810_v25 = vpop.permute.xlu1 %8809 }
 0x68d   :  { %v8812_v60 = vunpack.i.h.bf16 %v8810_v25  ;;  %v8811_v11 = vunpack.i.l.bf16 %v8810_v25  ;;  %v8901_v25 = vld [vmem:[#allocation2 + $0x60] ss:$8 sps:$4 sm:$0xff]  }
 0x68e   :  { %3474 = vmatpush1.bf16.msra.mxu1 %v8901_v25  ;;  %v8922_v25 = vld [vmem:[#allocation5 + $0x38] sm:$0xff]  }
 0x68f   :  { %v3171_v26 = vsel %vm3167_vm4, %v3166_v3, %v8812_v60  ;;  %v3170_v49 = vsel %vm3167_vm4, %v3165_v15, %v8811_v11  ;;  %3475 = vmatprep.subr.bf16.mxu1 %v8906_v23  ;;  %v10138_v23 = vsub.s32 6, %v9567_v56 }
 0x690   :  { %v3173_v48 = vpack.c.bf16 %v3171_v26, %v3170_v49 }
 0x692   :  { %8546 = vmatmul.mubr.bf16.vlgmr.msra.gmra.mrb[44].mxu0 %v3173_v48  ;;  %3476 = vmatpush1.bf16.msra.mxu1 %v8904_v2  ;;  %v166_v2 = vld [vmem:[%s10916_s6 + $0x8] sm:$0xff] }
 0x765   :  { %v8547_v5 = vpop.f32.mrb[44].mxu0 }
 0x766   :  { %v3276_v14 = vpop.f32.mrb[45].mxu0  ;;  %v3285_v7 = vadd.f32 %v8547_v5, %v3193_v21 }
 0x767   :  { %v3277_v34 = vadd.f32 %v3276_v14, %v3193_v21  ;;  %v8548_v36 = vpop.f32.mrb[46].mxu0 }
 0x768   :  { %v3279_v54 = vpop.f32.mrb[47].mxu0  ;;  %v3288_v30 = vadd.f32 %v8548_v36, %v3193_v21  ;;  %v3293_v27 = vadd.f32 %v3285_v7, %v9587_v16  ;;  %v3341_v36 = vsub.s32 4, %v9567_v56 }
 0x769   :  { %v3280_v20 = vadd.f32 %v3279_v54, %v3193_v21  ;;  %v3291_v63 = vadd.f32 %v3277_v34, %v9580_v9 }
 0x76a   :  { %v3294_v6 = vadd.f32 %v3288_v30, %v9589_v17  ;;  %v3342_v7 = vrot.slane %v10106_v22, %v3341_v36 }
 0x76b   :  { %3295 = vadd.xlane.f32.xlu0 %v3291_v63  ;;  %v3292_v40 = vadd.f32 %v3280_v20, %v9582_v10  ;;  %v3349_v20 = vsub.s32 5, %v9567_v56 }
 0x76d   :  { %3297 = vadd.xlane.f32.xlu1 %v3292_v40  ;;  %v3350_v8 = vrot.slane %v10106_v22, %v3349_v20 }
 0x76f   :  { %3299 = vadd.xlane.f32.xlu0 %v3293_v27 }
 0x773   :  { %3301 = vadd.xlane.f32.xlu0 %v3294_v6 }
 0x7f8   :  { %v3296_v9 = vpop.xlane.xlu0 %3295 }
 0x7f9   :  { %v3303_v13 = vmul.f32 0.0078125, %v3296_v9 }
 0x7fa   :  { %v3298_v42 = vpop.xlane.xlu1 %3297 }
 0x7fb   :  { %v3304_v10 = vmul.f32 0.0078125, %v3298_v42  ;;  %v3307_v44 = vsub.f32 %v3291_v63, %v3303_v13 }
 0x7fc   :  { %v3300_v33 = vpop.xlane.xlu0 %3299 }
 0x7fd   :  { %v3305_v29 = vmul.f32 0.0078125, %v3300_v33  ;;  %v3311_v16 = vmul.f32 %v3307_v44, %v3307_v44  ;;  %v3308_v19 = vsub.f32 %v3292_v40, %v3304_v10 }
 0x7ff   :  { %3315 = vadd.xlane.f32.xlu0 %v3311_v16  ;;  %v3312_v17 = vmul.f32 %v3308_v19, %v3308_v19  ;;  %v3309_v41 = vsub.f32 %v3293_v27, %v3305_v29 }
 0x800   :  { %v3302_v31 = vpop.xlane.xlu0 %3301 }
 0x801   :  { %v3306_v55 = vmul.f32 0.0078125, %v3302_v31  ;;  %3317 = vadd.xlane.f32.xlu1 %v3312_v17  ;;  %v3313_v4 = vmul.f32 %v3309_v41, %v3309_v41  ;;  %v8908_v31 = vld [vmem:[#allocation5] sm:$0xff]  }
 0x803   :  { %3319 = vadd.xlane.f32.xlu0 %v3313_v4  ;;  %v3310_v50 = vsub.f32 %v3294_v6, %v3306_v55  ;;  %v8909_v55 = vld [vmem:[#allocation5 + $0x48] sm:$0xff]  }
 0x804   :  { %v8910_v4 = vld [vmem:[#allocation5 + $0x8] sm:$0xff]  }
 0x805   :  { %v3314_v61 = vmul.f32 %v3310_v50, %v3310_v50 }
 0x807   :  { %3321 = vadd.xlane.f32.xlu1 %v3314_v61  ;;  %v8912_v61 = vld [vmem:[#allocation5 + $0x10] sm:$0xff]  }
 0x88c   :  { %v3316_v60 = vpop.xlane.xlu0 %3315 }
 0x88d   :  { %v3323_v11 = vmul.f32 0.0078125, %v3316_v60  ;;  %v3376_v60 = vrot.slane %v10106_v22, %v10138_v23 }
 0x88e   :  { %v3318_v3 = vpop.xlane.xlu1 %3317 }
 0x88f   :  { %v3327_v15 = vadd.f32 1e-12, %v3323_v11  ;;  %v3324_v26 = vmul.f32 0.0078125, %v3318_v3  ;;  %v3380_v11 = vrot.slane %v166_v2, %v10138_v23 }
 0x890   :  { %v3320_v49 = vpop.xlane.xlu0 %3319 }
 0x891   :  { %9099 = vrsqrt.f32 %v3327_v15  ;;  %v3328_v48 = vadd.f32 1e-12, %v3324_v26  ;;  %v3325_v21 = vmul.f32 0.0078125, %v3320_v49 }
 0x893   :  { %9101 = vrsqrt.f32 %v3328_v48  ;;  %v3329_v5 = vadd.f32 1e-12, %v3325_v21 }
 0x894   :  { %v3322_v14 = vpop.xlane.xlu1 %3321 }
 0x895   :  { %9103 = vrsqrt.f32 %v3329_v5  ;;  %v3326_v34 = vmul.f32 0.0078125, %v3322_v14 }
 0x897   :  { %v3330_v54 = vadd.f32 1e-12, %v3326_v34 }
 0x899   :  { %9105 = vrsqrt.f32 %v3330_v54 }
 0x89b   :  { %v9100_v63 = vpop.eup %9099 }
 0x89c   :  { %v3335_v40 = vmul.f32 %v9100_v63, %v3307_v44 }
 0x89d   :  { %v9102_v30 = vpop.eup %9101 }
 0x89e   :  { %v3336_v27 = vmul.f32 %v9102_v30, %v3308_v19  ;;  %v3343_v6 = vmul.f32 %v3342_v7, %v3335_v40 }
 0x89f   :  { %v9104_v38 = vpop.eup %9103 }
 0x8a0   :  { %v3344_v32 = vmul.f32 %v3342_v7, %v3336_v27  ;;  %v10122_v12 = vadd.f32 %v3350_v8, %v3343_v6  ;;  %v3337_v13 = vmul.f32 %v9104_v38, %v3309_v41  ;;  %v8907_v41 = vld [vmem:[#allocation5 + $0x40] sm:$0xff]  }
 0x8a1   :  { %8178 = vmatprep.subr.bf16.mxu0 %v8907_v41 }
 0x8a2   :  { %v10124_v9 = vadd.f32 %v3350_v8, %v3344_v32  ;;  %v3345_v44 = vmul.f32 %v3342_v7, %v3337_v13  ;;  %8179 = vmatpush3.bf16.msra.mxu0 %v8908_v31 }
 0x8a3   :  { %v9106_v42 = vpop.eup %9105  ;;  %8180 = vmatprep.subr.bf16.mxu0 %v8909_v55 }
 0x8a4   :  { %v3355_v10 = vpack.c.bf16 %v10124_v9, %v10122_v12  ;;  %v3338_v33 = vmul.f32 %v9106_v42, %v3310_v50  ;;  %v10131_v19 = vadd.f32 %v3350_v8, %v3345_v44  ;;  %v8911_v50 = vld [vmem:[#allocation5 + $0x50] sm:$0xff]  }
 0x8a6   :  { %3494 = vmatmul.mubr.bf16.vlgmr.msra.gmra.mrb[36].mxu1 %v3355_v10  ;;  %v3346_v29 = vmul.f32 %v3342_v7, %v3338_v33  ;;  %8181 = vmatpush3.bf16.msra.mxu0 %v8910_v4 }
 0x8a7   :  { %3503 = vmatprep.mubr.bf16.mxu1 %v9356_v39  ;;  %8182 = vmatprep.subr.bf16.mxu0 %v8911_v50 }
 0x8a8   :  { %v10129_v16 = vadd.f32 %v3350_v8, %v3346_v29 }
 0x8aa   :  { %v3356_v17 = vpack.c.bf16 %v10129_v16, %v10131_v19  ;;  %8183 = vmatpush3.bf16.msra.mxu0 %v8912_v61 }
 0x8ab   :  { %8184 = vmatprep.subr.bf16.mxu0 %v8913_v53 }
 0x8ae   :  { %3504 = vmatmul.mubr.bf16.gmra.mrb[40].mxu1 %v3356_v17  ;;  %8185 = vmatpush3.bf16.msra.mxu0 %v8914_v62 }
 0x8af   :  { %4034 = vmatprep.mubr.bf16.mxu1 %v9356_v39  ;;  %8186 = vmatprep.subr.bf16.mxu0 %v8915_v52 }
 0x8b2   :  { %8187 = vmatpush3.bf16.msra.mxu0 %v8916_v24 }
 0x8b3   :  { %8188 = vmatprep.subr.bf16.mxu0 %v8917_v57 }
 0x8b6   :  { %8189 = vmatpush3.bf16.msra.mxu0 %v8918_v1 }
 0x8b7   :  { %8190 = vmatprep.subr.bf16.mxu0 %v8919_v46 }
 0x8ba   :  { %8191 = vmatpush3.bf16.msra.mxu0 %v8920_v51 }
 0x8bb   :  { %8192 = vmatprep.subr.bf16.mxu0 %v8921_v58 }
 0x8be   :  { %8193 = vmatpush3.bf16.msra.mxu0 %v8922_v25 }
 0x8bf   :  { %8599 = vmatprep.subr.mxu0 %v9357_v18 }
 0x979   :  { %v3495_v3 = vpop.f32.mrb[36].mxu1 }
 0x97a   :  { %v10146_v15 = vadd.f32 %v3495_v3, %v3376_v60  ;;  %v3497_v26 = vpop.f32.mrb[37].mxu1 }
 0x97b   :  { %v10148_v49 = vadd.f32 %v3497_v26, %v3380_v11  ;;  %v3499_v48 = vpop.f32.mrb[38].mxu1 }
 0x97c   :  { %v3522_v21 = vmul.f32 0.044715, %v10146_v15  ;;  %v10151_v5 = vadd.f32 %v3499_v48, %v3376_v60  ;;  %v3501_v14 = vpop.f32.mrb[39].mxu1 }
 0x97d   :  { %v3523_v34 = vmul.f32 0.044715, %v10148_v49  ;;  %v10154_v54 = vadd.f32 %v3501_v14, %v3380_v11 }
 0x97e   :  { %v3530_v7 = vmul.f32 %v3522_v21, %v10146_v15  ;;  %v3524_v63 = vmul.f32 0.044715, %v10151_v5 }
 0x97f   :  { %v3531_v40 = vmul.f32 %v3523_v34, %v10148_v49  ;;  %v3525_v30 = vmul.f32 0.044715, %v10154_v54 }
 0x980   :  { %v3538_v27 = vmul.f32 %v3530_v7, %v10146_v15  ;;  %v3532_v6 = vmul.f32 %v3524_v63, %v10151_v5 }
 0x981   :  { %v3539_v8 = vmul.f32 %v3531_v40, %v10148_v49  ;;  %v3533_v38 = vmul.f32 %v3525_v30, %v10154_v54  ;;  %v3505_v32 = vpop.f32.mrb[40].mxu1 }
 0x982   :  { %v3546_v13 = vadd.f32 %v3538_v27, %v10146_v15  ;;  %v3540_v42 = vmul.f32 %v3532_v6, %v10151_v5  ;;  %v10166_v10 = vadd.f32 %v3505_v32, %v3376_v60  ;;  %v3507_v33 = vpop.f32.mrb[41].mxu1 }
 0x983   :  { %v3541_v44 = vmul.f32 %v3533_v38, %v10154_v54  ;;  %v10169_v29 = vadd.f32 %v3507_v33, %v3380_v11  ;;  %v3509_v17 = vpop.f32.mrb[42].mxu1  ;;  %v3547_v41 = vadd.f32 %v3539_v8, %v10148_v49  ;;  %v3514_v33 = vmul.f32 0.5, %v10146_v15 }
 0x984   :  { %v3554_v31 = vmul.f32 0.7978846, %v3546_v13  ;;  %v3548_v55 = vadd.f32 %v3540_v42, %v10151_v5  ;;  %v3526_v4 = vmul.f32 0.044715, %v10166_v10  ;;  %v3510_v50 = vadd.f32 %v3509_v17, %v3376_v60  ;;  %v3511_v61 = vpop.f32.mrb[43].mxu1 }
 0x985   :  { %v3527_v53 = vmul.f32 0.044715, %v10169_v29  ;;  %v3512_v62 = vadd.f32 %v3511_v61, %v3380_v11  ;;  %v3549_v52 = vadd.f32 %v3541_v44, %v10154_v54  ;;  %v3555_v24 = vmul.f32 0.7978846, %v3547_v41 }
 0x986   :  { %9107 = vtanh.f32 %v3554_v31  ;;  %v3556_v57 = vmul.f32 0.7978846, %v3548_v55  ;;  %v3534_v1 = vmul.f32 %v3526_v4, %v10166_v10  ;;  %v3528_v46 = vmul.f32 0.044715, %v3510_v50 }
 0x987   :  { %v3535_v51 = vmul.f32 %v3527_v53, %v10169_v29  ;;  %v3529_v58 = vmul.f32 0.044715, %v3512_v62  ;;  %v3557_v25 = vmul.f32 0.7978846, %v3549_v52  ;;  %9109 = vtanh.f32 %v3555_v24 }
 0x988   :  { %9111 = vtanh.f32 %v3556_v57  ;;  %v3542_v2 = vmul.f32 %v3534_v1, %v10166_v10  ;;  %v3536_v60 = vmul.f32 %v3528_v46, %v3510_v50  ;;  %v3516_v44 = vmul.f32 0.5, %v10151_v5 }
 0x989   :  { %v3543_v3 = vmul.f32 %v3535_v51, %v10169_v29  ;;  %v3537_v11 = vmul.f32 %v3529_v58, %v3512_v62  ;;  %9113 = vtanh.f32 %v3557_v25  ;;  %v3515_v41 = vmul.f32 0.5, %v10148_v49 }
 0x98a   :  { %v3544_v26 = vmul.f32 %v3536_v60, %v3510_v50  ;;  %v3550_v48 = vadd.f32 %v3542_v2, %v10166_v10  ;;  %v3517_v31 = vmul.f32 0.5, %v10154_v54  ;;  %v3518_v5 = vmul.f32 0.5, %v10166_v10 }
 0x98b   :  { %v3545_v21 = vmul.f32 %v3537_v11, %v3512_v62  ;;  %v3551_v14 = vadd.f32 %v3543_v3, %v10169_v29  ;;  %v3520_v49 = vmul.f32 0.5, %v3510_v50  ;;  %v3519_v54 = vmul.f32 0.5, %v10169_v29 }
 0x98c   :  { %v3552_v34 = vadd.f32 %v3544_v26, %v3510_v50  ;;  %v3558_v7 = vmul.f32 0.7978846, %v3550_v48  ;;  %v3521_v60 = vmul.f32 0.5, %v3512_v62 }
 0x98d   :  { %v3553_v63 = vadd.f32 %v3545_v21, %v3512_v62  ;;  %v3559_v40 = vmul.f32 0.7978846, %v3551_v14 }
 0x98e   :  { %v3560_v30 = vmul.f32 0.7978846, %v3552_v34  ;;  %9115 = vtanh.f32 %v3558_v7  ;;  %v3624_v7 = vsub.s32 7, %v9567_v56 }
 0x98f   :  { %v3561_v27 = vmul.f32 0.7978846, %v3553_v63  ;;  %9117 = vtanh.f32 %v3559_v40 }
 0x990   :  { %v9108_v6 = vpop.eup %9107  ;;  %9119 = vtanh.f32 %v3560_v30  ;;  %v3625_v29 = vrot.slane %v10106_v22, %v3624_v7 }
 0x991   :  { %v9110_v8 = vpop.eup %9109  ;;  %v3570_v38 = vadd.f32 1.0, %v9108_v6  ;;  %9121 = vtanh.f32 %v3561_v27 }
 0x992   :  { %v9112_v32 = vpop.eup %9111  ;;  %v3571_v13 = vadd.f32 1.0, %v9110_v8 }
 0x993   :  { %v9114_v42 = vpop.eup %9113  ;;  %v3572_v17 = vadd.f32 1.0, %v9112_v32  ;;  %v3578_v4 = vmul.f32 %v3570_v38, %v3514_v33 }
 0x994   :  { %v3573_v55 = vadd.f32 1.0, %v9114_v42  ;;  %v3579_v53 = vmul.f32 %v3571_v13, %v3515_v41 }
 0x995   :  { %v3580_v61 = vmul.f32 %v3572_v17, %v3516_v44 }
 0x996   :  { %v3581_v52 = vmul.f32 %v3573_v55, %v3517_v31 }
 0x997   :  { %v3586_v24 = vpack.c.bf16 %v3580_v61, %v3578_v4  ;;  %v8928_v4 = vld [vmem:[%s10912_s2 + $0xdc] ss:$12 sps:$4 sm:$0xff]  }
 0x998   :  { %v9116_v57 = vpop.eup %9115  ;;  %v3587_v1 = vpack.c.bf16 %v3581_v52, %v3579_v53 }
 0x999   :  { %v9118_v46 = vpop.eup %9117  ;;  %v3574_v51 = vadd.f32 1.0, %v9116_v57 }
 0x99a   :  { %v9120_v58 = vpop.eup %9119  ;;  %3754 = vmatprep.mubr.bf16.mxu0 %v3587_v1  ;;  %v3575_v15 = vadd.f32 1.0, %v9118_v46 }
 0x99b   :  { %v9122_v25 = vpop.eup %9121  ;;  %3755 = vmatmul.mubr.bf16.vlgmr.msra.gmra.mrb[48].mxu0 %v3586_v24  ;;  %v3576_v2 = vadd.f32 1.0, %v9120_v58  ;;  %v3582_v11 = vmul.f32 %v3574_v51, %v3518_v5 }
 0x99c   :  { %v3577_v3 = vadd.f32 1.0, %v9122_v25  ;;  %v3583_v48 = vmul.f32 %v3575_v15, %v3519_v54 }
 0x99d   :  { %v3584_v26 = vmul.f32 %v3576_v2, %v3520_v49 }
 0x99e   :  { %v3585_v21 = vmul.f32 %v3577_v3, %v3521_v60  ;;  %v8931_v60 = vld [vmem:[%s10912_s2 + $0xf4] ss:$12 sps:$4 sm:$0xff]   ;;  %v8929_v3 = vld [vmem:[%s10912_s2 + $0xf0] ss:$12 sps:$4 sm:$0xff]  }
 0x99f   :  { %v3588_v14 = vpack.c.bf16 %v3584_v26, %v3582_v11  ;;  %v8934_v11 = vld [vmem:[%s10912_s2 + $0x10c] ss:$12 sps:$4 sm:$0xff]   ;;  %v8932_v26 = vld [vmem:[%s10912_s2 + $0x108] ss:$12 sps:$4 sm:$0xff]  }
 0x9a0   :  { %v3589_v34 = vpack.c.bf16 %v3585_v21, %v3583_v48  ;;  %v8937_v48 = vld [vmem:[%s10912_s2 + $0x124] ss:$12 sps:$4 sm:$0xff]   ;;  %v8935_v21 = vld [vmem:[%s10912_s2 + $0x120] ss:$12 sps:$4 sm:$0xff]  }
 0x9a2   :  { %3762 = vmatprep.mubr.bf16.mxu0 %v3589_v34  ;;  %v8938_v34 = vld [vmem:[%s10912_s2 + $0x138] ss:$12 sps:$4 sm:$0xff]  }
 0x9a3   :  { %3763 = vmatmul.mubr.bf16.gmra.mrb[52].mxu0 %v3588_v14  ;;  %v8940_v14 = vld [vmem:[%s10912_s2 + $0x13c] ss:$12 sps:$4 sm:$0xff]  }
 0x9a4   :  { %8601 = vmatprep.mubr.msk.f32.mxu0 %vm9358_vm0, %v9357_v18 }
 0xa6e   :  { %v8194_v10 = vpop.f32.mrb[48].mxu0 }
 0xa6f   :  { %v8195_v50 = vpop.f32.mrb[49].mxu0 }
 0xa70   :  { %v8196_v62 = vadd.f32 %v8195_v50, %v8194_v10  ;;  %v8197_v63 = vpop.f32.mrb[50].mxu0  ;;  %v8941_v10 = vld [vmem:[%s10912_s2 + $0x150] ss:$12 sps:$4 sm:$0xff]   ;;  %v8946_v50 = vld [vmem:[%s10912_s2 + $0x16c] ss:$12 sps:$4 sm:$0xff]  }
 0xa71   :  { %v8198_v40 = vpop.f32.mrb[51].mxu0 }
 0xa72   :  { %v3757_v30 = vadd.f32 %v8196_v62, %v3625_v29  ;;  %v8199_v27 = vadd.f32 %v8198_v40, %v8197_v63  ;;  %v8944_v62 = vld [vmem:[%s10912_s2 + $0x168] ss:$12 sps:$4 sm:$0xff]  }
 0xa73   :  { %v8947_v63 = vld [vmem:[%s10912_s2 + $0xc8] ss:$12 sps:$4 sm:$0xff]  }
 0xa74   :  { %v3760_v6 = vadd.f32 %v8199_v27, %v3625_v29  ;;  %v3771_v8 = vadd.f32 %v3757_v30, %v10122_v12  ;;  %v8923_v12 = vld [vmem:[%s10912_s2 + $0xc0] ss:$12 sps:$4 sm:$0xff]  }
 0xa76   :  { %3775 = vadd.xlane.f32.xlu0 %v3771_v8  ;;  %v8200_v38 = vpop.f32.mrb[52].mxu0  ;;  %v3772_v32 = vadd.f32 %v3760_v6, %v10124_v9  ;;  %v8925_v9 = vld [vmem:[%s10912_s2 + $0xc4] ss:$12 sps:$4 sm:$0xff]  }
 0xa77   :  { %v8201_v13 = vpop.f32.mrb[53].mxu0  ;;  %4002 = vmatprep.subr.bf16.mxu1 %v8925_v9 }
 0xa78   :  { %v8202_v42 = vadd.f32 %v8201_v13, %v8200_v38  ;;  %3777 = vadd.xlane.f32.xlu1 %v3772_v32  ;;  %v8203_v33 = vpop.f32.mrb[54].mxu0  ;;  %4003 = vmatpush1.bf16.msra.mxu1 %v8923_v12 }
 0xa79   :  { %v8204_v44 = vpop.f32.mrb[55].mxu0  ;;  %4004 = vmatprep.subr.bf16.mxu1 %v8928_v4 }
 0xa7a   :  { %v3765_v17 = vadd.f32 %v8202_v42, %v3625_v29  ;;  %v8205_v22 = vadd.f32 %v8204_v44, %v8203_v33  ;;  %v167_v33 = vld [vmem:[%s10916_s6 + $0x10] sm:$0x3] }
 0xa7c   :  { %v3768_v41 = vadd.f32 %v8205_v22, %v3625_v29  ;;  %v3773_v31 = vadd.f32 %v3765_v17, %v10131_v19  ;;  %v8926_v19 = vld [vmem:[%s10912_s2 + $0xd8] ss:$12 sps:$4 sm:$0xff]   ;;  %v8943_v29 = vld [vmem:[%s10912_s2 + $0x154] ss:$12 sps:$4 sm:$0xff]  }
 0xa7d   :  { %4005 = vmatpush1.bf16.msra.mxu1 %v8926_v19  ;;  %v3830_v19 = vrot.slane %v167_v33, %v9575_v0 }
 0xa7e   :  { %3779 = vadd.xlane.f32.xlu0 %v3773_v31  ;;  %v3774_v55 = vadd.f32 %v3768_v41, %v10129_v16  ;;  %4006 = vmatprep.subr.bf16.mxu1 %v8931_v60  ;;  %v3822_v41 = vrot.slane %v167_v33, %v9570_v59  ;;  %v8951_v60 = vld [vmem:[%s10912_s2 + $0x128] ss:$12 sps:$4 sm:$0xff]  }
 0xa80   :  { %3781 = vadd.xlane.f32.xlu1 %v3774_v55 }
 0xa81   :  { %4007 = vmatpush1.bf16.msra.mxu1 %v8929_v3  ;;  %v8952_v3 = vld [vmem:[%s10912_s2 + $0x140] ss:$12 sps:$4 sm:$0xff]  }
 0xa82   :  { %4008 = vmatprep.subr.bf16.mxu1 %v8934_v11  ;;  %v8953_v11 = vld [vmem:[%s10912_s2 + $0x158] ss:$12 sps:$4 sm:$0xff]  }
 0xa85   :  { %4009 = vmatpush1.bf16.msra.mxu1 %v8932_v26  ;;  %v8954_v26 = vld [vmem:[%s10912_s2 + $0x170] ss:$12 sps:$4 sm:$0xff]  }
 0xa86   :  { %4010 = vmatprep.subr.bf16.mxu1 %v8937_v48  ;;  %v10309_v48 = vld [vmem:[%s10916_s6 + $0x20] sm:$0xff] }
 0xa89   :  { %4011 = vmatpush1.bf16.msra.mxu1 %v8935_v21  ;;  %v4107_v21 = vrot.slane %v10309_v48, %v9570_v59 }
 0xa8a   :  { %4012 = vmatprep.subr.bf16.mxu1 %v8940_v14  ;;  %v4119_v14 = vrot.slane %v10309_v48, %v9575_v0 }
 0xa8d   :  { %4013 = vmatpush1.bf16.msra.mxu1 %v8938_v34 }
 0xa8e   :  { %4014 = vmatprep.subr.bf16.mxu1 %v8943_v29 }
 0xa91   :  { %4015 = vmatpush1.bf16.msra.mxu1 %v8941_v10 }
 0xa92   :  { %4016 = vmatprep.subr.bf16.mxu1 %v8946_v50 }
 0xa95   :  { %4017 = vmatpush1.bf16.msra.mxu1 %v8944_v62 }
 0xa96   :  { %8549 = vmatprep.subr.bf16.mxu1 %v8947_v63 }
 0xb03   :  { %v3776_v16 = vpop.xlane.xlu0 %3775 }
 0xb04   :  { %v3783_v61 = vmul.f32 0.0078125, %v3776_v16 }
 0xb05   :  { %v3778_v53 = vpop.xlane.xlu1 %3777 }
 0xb06   :  { %v3787_v52 = vsub.f32 %v3771_v8, %v3783_v61  ;;  %v3784_v24 = vmul.f32 0.0078125, %v3778_v53 }
 0xb08   :  { %v10210_v57 = vsub.f32 %v3772_v32, %v3784_v24  ;;  %v3791_v1 = vmul.f32 %v3787_v52, %v3787_v52 }
 0xb0a   :  { %3795 = vadd.xlane.f32.xlu0 %v3791_v1  ;;  %v3792_v46 = vmul.f32 %v10210_v57, %v10210_v57 }
 0xb0b   :  { %v3780_v51 = vpop.xlane.xlu0 %3779 }
 0xb0c   :  { %v3785_v58 = vmul.f32 0.0078125, %v3780_v51  ;;  %3797 = vadd.xlane.f32.xlu1 %v3792_v46  ;;  %v8948_v46 = vld [vmem:[%s10912_s2 + $0xe0] ss:$12 sps:$4 sm:$0xff]  }
 0xb0d   :  { %v3782_v15 = vpop.xlane.xlu1 %3781 }
 0xb0e   :  { %v10214_v25 = vsub.f32 %v3773_v31, %v3785_v58  ;;  %v3786_v5 = vmul.f32 0.0078125, %v3782_v15  ;;  %v8949_v15 = vld [vmem:[%s10912_s2 + $0xf8] ss:$12 sps:$4 sm:$0xff]  }
 0xb10   :  { %v10216_v49 = vsub.f32 %v3774_v55, %v3786_v5  ;;  %v3793_v2 = vmul.f32 %v10214_v25, %v10214_v25 }
 0xb12   :  { %3799 = vadd.xlane.f32.xlu0 %v3793_v2  ;;  %v3794_v54 = vmul.f32 %v10216_v49, %v10216_v49 }
 0xb14   :  { %3801 = vadd.xlane.f32.xlu1 %v3794_v54 }
 0xb97   :  { %v3796_v40 = vpop.xlane.xlu0 %3795 }
 0xb98   :  { %v3803_v30 = vmul.f32 0.0078125, %v3796_v40 }
 0xb99   :  { %v3798_v27 = vpop.xlane.xlu1 %3797 }
 0xb9a   :  { %v3807_v6 = vadd.f32 1e-12, %v3803_v30  ;;  %v3804_v8 = vmul.f32 0.0078125, %v3798_v27 }
 0xb9c   :  { %9123 = vrsqrt.f32 %v3807_v6  ;;  %v3808_v38 = vadd.f32 1e-12, %v3804_v8 }
 0xb9e   :  { %9125 = vrsqrt.f32 %v3808_v38 }
 0xb9f   :  { %v3800_v32 = vpop.xlane.xlu0 %3799 }
 0xba0   :  { %v3805_v13 = vmul.f32 0.0078125, %v3800_v32 }
 0xba1   :  { %v3802_v42 = vpop.xlane.xlu1 %3801 }
 0xba2   :  { %v3809_v44 = vadd.f32 1e-12, %v3805_v13  ;;  %v3806_v17 = vmul.f32 0.0078125, %v3802_v42 }
 0xba4   :  { %9127 = vrsqrt.f32 %v3809_v44  ;;  %v3810_v22 = vadd.f32 1e-12, %v3806_v17 }
 0xba6   :  { %v9124_v31 = vpop.eup %9123  ;;  %9129 = vrsqrt.f32 %v3810_v22 }
 0xba7   :  { %v3815_v55 = vmul.f32 %v9124_v31, %v3787_v52 }
 0xba8   :  { %v9126_v12 = vpop.eup %9125 }
 0xba9   :  { %v3823_v9 = vmul.f32 %v3822_v41, %v3815_v55  ;;  %v3816_v4 = vmul.f32 %v9126_v12, %v10210_v57 }
 0xbab   :  { %v3824_v16 = vmul.f32 %v3822_v41, %v3816_v4  ;;  %v10267_v61 = vadd.f32 %v3830_v19, %v3823_v9  ;;  %v4127_v4 = vrot.slane %v10309_v48, %v9650_v47 }
 0xbad   :  { %v10269_v53 = vadd.f32 %v3830_v19, %v3824_v16 }
 0xbae   :  { %v9128_v24 = vpop.eup %9127 }
 0xbaf   :  { %v3839_v1 = vpack.c.bf16 %v10269_v53, %v10267_v61  ;;  %v3817_v52 = vmul.f32 %v9128_v24, %v10214_v25 }
 0xbb0   :  { %v9130_v51 = vpop.eup %9129 }
 0xbb1   :  { %4035 = vmatmul.mubr.bf16.vlgmr.msra.gmra.mrb[44].mxu1 %v3839_v1  ;;  %v3818_v57 = vmul.f32 %v9130_v51, %v10216_v49  ;;  %v3825_v58 = vmul.f32 %v3822_v41, %v3817_v52  ;;  %v8950_v49 = vld [vmem:[%s10912_s2 + $0x110] ss:$12 sps:$4 sm:$0xff]  }
 0xbb2   :  { %8550 = vmatpush3.bf16.msra.mxu1 %v8947_v63  ;;  %4044 = vmatprep.mubr.bf16.mxu1 %v9356_v39 }
 0xbb3   :  { %8551 = vmatprep.subr.bf16.mxu1 %v8948_v46  ;;  %v3826_v5 = vmul.f32 %v3822_v41, %v3818_v57  ;;  %v10282_v2 = vadd.f32 %v3830_v19, %v3825_v58 }
 0xbb5   :  { %v10284_v54 = vadd.f32 %v3830_v19, %v3826_v5 }
 0xbb6   :  { %8552 = vmatpush3.bf16.msra.mxu1 %v8948_v46 }
 0xbb7   :  { %8553 = vmatprep.subr.bf16.mxu1 %v8949_v15  ;;  %v3840_v25 = vpack.c.bf16 %v10284_v54, %v10282_v2 }
 0xbb9   :  { %4045 = vmatmul.mubr.bf16.gmra.mrb[48].mxu1 %v3840_v25 }
 0xbba   :  { %8554 = vmatpush3.bf16.msra.mxu1 %v8949_v15  ;;  %8565 = vmatprep.mubr.bf16.mxu1 %v3839_v1 }
 0xbbb   :  { %8555 = vmatprep.subr.bf16.mxu1 %v8950_v49 }
 0xbbe   :  { %8556 = vmatpush3.bf16.msra.mxu1 %v8950_v49 }
 0xbbf   :  { %8557 = vmatprep.subr.bf16.mxu1 %v8951_v60 }
 0xbc2   :  { %8558 = vmatpush3.bf16.msra.mxu1 %v8951_v60 }
 0xbc3   :  { %8559 = vmatprep.subr.bf16.mxu1 %v8952_v3 }
 0xbc6   :  { %8560 = vmatpush3.bf16.msra.mxu1 %v8952_v3 }
 0xbc7   :  { %8561 = vmatprep.subr.bf16.mxu1 %v8953_v11 }
 0xbca   :  { %8562 = vmatpush3.bf16.msra.mxu1 %v8953_v11 }
 0xbcb   :  { %8563 = vmatprep.subr.bf16.mxu1 %v8954_v26 }
 0xbce   :  { %8564 = vmatpush3.bf16.msra.mxu1 %v8954_v26 }
 0xbcf   :  { %8569 = vmatprep.subr.mxu1 %v9357_v18 }
 0xbd1   :  { %8566 = vmatmul.mubr.bf16.vlgmr.msra.gmra.mrb[52].mxu1 %v3840_v25 }
 0xbd2   :  { %8571 = vmatprep.mubr.msk.f32.mxu1 %vm9358_vm0, %v9357_v18 }
 0xc84   :  { %v4036_v34 = vpop.f32.mrb[44].mxu1 }
 0xc85   :  { %v4108_v10 = vadd.f32 %v4107_v21, %v4036_v34  ;;  %v4038_v29 = vpop.f32.mrb[45].mxu1 }
 0xc86   :  { %v4120_v50 = vadd.f32 %v4119_v14, %v4038_v29  ;;  %v4040_v62 = vpop.f32.mrb[46].mxu1 }
 0xc87   :  { %v4112_v63 = vmul.f32 0.17677669, %v4108_v10  ;;  %v4042_v40 = vpop.f32.mrb[47].mxu1  ;;  %v4109_v30 = vadd.f32 %v4107_v21, %v4040_v62 }
 0xc88   :  { %4164 = vrot.lane.b32.xlu0 %v4120_v50, %s9359_s26  ;;  %8570 = vmatpush3.xpose.msk.msra.mxu1 %vm580_vm1, %v4120_v50  ;;  %v4121_v27 = vadd.f32 %v4119_v14, %v4042_v40 }
 0xc89   :  { %4136 = vrot.lane.b32.xlu1 %v4112_v63, %s9359_s26  ;;  %8574 = vmatprep.subr.mxu1 %v9357_v18  ;;  %v4113_v8 = vmul.f32 0.17677669, %v4109_v30 }
 0xc8b   :  { %8572 = vmatmul.mubr.msk.f32.vlgmr.msra.gmra.mrb[34].mxu1 %vm580_vm1, %v4112_v63 }
 0xc8c   :  { %4172 = vrot.lane.b32.xlu0 %v4120_v50, %s9349_s19  ;;  %v4046_v6 = vpop.f32.mrb[48].mxu1  ;;  %8575 = vmatpush3.xpose.msk.msra.mxu1 %vm580_vm1, %v4121_v27 }
 0xc8d   :  { %v4110_v38 = vadd.f32 %v4107_v21, %v4046_v6  ;;  %4166 = vrot.lane.b32.xlu1 %v4121_v27, %s9359_s26  ;;  %v4048_v32 = vpop.f32.mrb[49].mxu1  ;;  %8576 = vmatprep.mubr.msk.f32.mxu1 %vm9358_vm0, %v9357_v18 }
 0xc8e   :  { %v4122_v13 = vadd.f32 %v4119_v14, %v4048_v32  ;;  %v4050_v42 = vpop.f32.mrb[50].mxu1  ;;  %8579 = vmatprep.subr.mxu1 %v9357_v18 }
 0xc8f   :  { %v4052_v33 = vpop.f32.mrb[51].mxu1  ;;  %8577 = vmatmul.mubr.msk.f32.vlgmr.msra.gmra.mrb[56].mxu1 %vm580_vm1, %v4113_v8  ;;  %v4114_v44 = vmul.f32 0.17677669, %v4110_v38  ;;  %v4111_v17 = vadd.f32 %v4107_v21, %v4050_v42 }
 0xc90   :  { %4180 = vrot.lane.b32.xlu0 %v4120_v50, %s9360_s27  ;;  %8580 = vmatpush3.xpose.msk.msra.mxu1 %vm580_vm1, %v4122_v13  ;;  %v4123_v22 = vadd.f32 %v4119_v14, %v4052_v33 }
 0xc91   :  { %4174 = vrot.lane.b32.xlu1 %v4121_v27, %s9349_s19  ;;  %8581 = vmatprep.mubr.msk.f32.mxu1 %vm9358_vm0, %v9357_v18  ;;  %v4115_v41 = vmul.f32 0.17677669, %v4111_v17 }
 0xc92   :  { %8584 = vmatprep.subr.mxu1 %v9357_v18 }
 0xc93   :  { %8582 = vmatmul.mubr.msk.f32.vlgmr.msra.gmra.mrb[58].mxu1 %vm580_vm1, %v4114_v44 }
 0xc94   :  { %4144 = vrot.lane.b32.xlu0 %v4112_v63, %s9349_s19  ;;  %8585 = vmatpush3.xpose.msk.msra.mxu1 %vm580_vm1, %v4123_v22 }
 0xc95   :  { %4182 = vrot.lane.b32.xlu1 %v4121_v27, %s9360_s27  ;;  %8586 = vmatprep.mubr.msk.f32.mxu1 %vm9358_vm0, %v9357_v18 }
 0xc96   :  { %8589 = vmatprep.subr.mxu1 %v9357_v18 }
 0xc97   :  { %8587 = vmatmul.mubr.msk.f32.vlgmr.msra.gmra.mrb[60].mxu1 %vm580_vm1, %v4115_v41 }
 0xc98   :  { %4168 = vrot.lane.b32.xlu0 %v4122_v13, %s9359_s26  ;;  %8591 = vmatprep.mubr.msk.f32.mxu1 %vm9358_vm0, %v9357_v18 }
 0xc99   :  { %4138 = vrot.lane.b32.xlu1 %v4113_v8, %s9359_s26 }
 0xc9c   :  { %4176 = vrot.lane.b32.xlu0 %v4122_v13, %s9349_s19 }
 0xc9d   :  { %4146 = vrot.lane.b32.xlu1 %v4113_v8, %s9349_s19 }
 0xca0   :  { %4140 = vrot.lane.b32.xlu0 %v4114_v44, %s9359_s26 }
 0xca1   :  { %4170 = vrot.lane.b32.xlu1 %v4123_v22, %s9359_s26 }
 0xca4   :  { %v8567_v31 = vpop.f32.mrb[52].mxu1  ;;  %4152 = vrot.lane.b32.xlu0 %v4112_v63, %s9360_s27 }
 0xca5   :  { %v4089_v55 = vpop.f32.mrb[53].mxu1  ;;  %4178 = vrot.lane.b32.xlu1 %v4123_v22, %s9349_s19  ;;  %v10367_v16 = vadd.f32 %v8567_v31, %v4127_v4 }
 0xca6   :  { %v8568_v12 = vpop.f32.mrb[54].mxu1  ;;  %v10359_v19 = vadd.f32 %v4127_v4, %v4089_v55 }
 0xca7   :  { %v4092_v9 = vpop.f32.mrb[55].mxu1  ;;  %v10371_v24 = vadd.f32 %v8568_v12, %v4127_v4 }
 0xca8   :  { %4148 = vrot.lane.b32.xlu0 %v4114_v44, %s9349_s19  ;;  %v10375_v1 = vadd.f32 %v4127_v4, %v4092_v9 }
 0xca9   :  { %4142 = vrot.lane.b32.xlu1 %v4115_v41, %s9359_s26 }
 0xcac   :  { %4184 = vrot.lane.b32.xlu0 %v4122_v13, %s9360_s27 }
 0xcad   :  { %4154 = vrot.lane.b32.xlu1 %v4113_v8, %s9360_s27 }
 0xcb0   :  { %4156 = vrot.lane.b32.xlu0 %v4114_v44, %s9360_s27 }
 0xcb1   :  { %4150 = vrot.lane.b32.xlu1 %v4115_v41, %s9349_s19 }
 0xcb4   :  { %4192 = vrot.lane.b32.xlu0 %v10359_v19, %s9359_s26 }
 0xcb5   :  { %4186 = vrot.lane.b32.xlu1 %v4123_v22, %s9360_s27 }
 0xcb8   :  { %4204 = vrot.lane.b32.xlu0 %v10359_v19, %s9349_s19 }
 0xcb9   :  { %4158 = vrot.lane.b32.xlu1 %v4115_v41, %s9360_s27 }
 0xcbd   :  { %4196 = vrot.lane.b32.xlu1 %v10367_v16, %s9359_s26 }
 0xcc1   :  { %4198 = vrot.lane.b32.xlu1 %v10371_v24, %s9359_s26 }
 0xcc5   :  { %4194 = vrot.lane.b32.xlu1 %v10375_v1, %s9359_s26 }
 0xcc9   :  { %4206 = vrot.lane.b32.xlu1 %v10375_v1, %s9349_s19 }
 0xcfa   :  { %v4165_v46 = vpop.permute.xlu0 %4164 }
 0xcfb   :  { %v4137_v52 = vpop.permute.xlu1 %4136  ;;  %8590 = vmatpush3.xpose.msk.msra.mxu1 %vm580_vm1, %v4165_v46 }
 0xcfc   :  { %8594 = vmatprep.subr.mxu1 %v9357_v18 }
 0xcfe   :  { %8592 = vmatmul.mubr.msk.f32.vlgmr.msra.gmra.mrb[62].mxu1 %vm580_vm1, %v4137_v52  ;;  %v4173_v51 = vpop.permute.xlu0 %4172 }
 0xcff   :  { %v4167_v57 = vpop.permute.xlu1 %4166  ;;  %8596 = vmatprep.mubr.msk.f32.mxu1 %vm9358_vm0, %v9357_v18 }
 0xd00   :  { %8595 = vmatpush3.xpose.msk.msra.mxu1 %vm580_vm1, %v4167_v57 }
 0xd01   :  { %8604 = vmatprep.subr.mxu1 %v9357_v18 }
 0xd02   :  { %v4181_v58 = vpop.permute.xlu0 %4180 }
 0xd03   :  { %v4175_v15 = vpop.permute.xlu1 %4174 }
 0xd06   :  { %v4145_v5 = vpop.permute.xlu0 %4144 }
 0xd07   :  { %v4183_v25 = vpop.permute.xlu1 %4182 }
 0xd0a   :  { %v4169_v49 = vpop.permute.xlu0 %4168 }
 0xd0b   :  { %v4139_v60 = vpop.permute.xlu1 %4138  ;;  %8600 = vmatpush3.xpose.msk.msra.mxu0 %vm580_vm1, %v4169_v49 }
 0xd0c   :  { %8597 = vmatmul.mubr.msk.f32.vlgmr.msra.gmra.mrb[64].mxu1 %vm580_vm1, %v4139_v60  ;;  %8609 = vmatprep.subr.mxu0 %v9357_v18 }
 0xd0d   :  { %8606 = vmatprep.mubr.msk.f32.mxu1 %vm9358_vm0, %v9357_v18 }
 0xd0e   :  { %v4177_v3 = vpop.permute.xlu0 %4176 }
 0xd0f   :  { %v4147_v11 = vpop.permute.xlu1 %4146 }
 0xd12   :  { %v4141_v26 = vpop.permute.xlu0 %4140 }
 0xd13   :  { %v4171_v48 = vpop.permute.xlu1 %4170  ;;  %8602 = vmatmul.mubr.msk.f32.vlgmr.msra.gmra.mrb[42].mxu0 %vm580_vm1, %v4141_v26 }
 0xd14   :  { %8610 = vmatpush3.xpose.msk.msra.mxu0 %vm580_vm1, %v4173_v51  ;;  %8605 = vmatpush3.xpose.msk.msra.mxu1 %vm580_vm1, %v4171_v48 }
 0xd15   :  { %8611 = vmatprep.mubr.msk.f32.mxu0 %vm9358_vm0, %v9357_v18  ;;  %8619 = vmatprep.subr.mxu0 %v9357_v18 }
 0xd16   :  { %v4153_v21 = vpop.permute.xlu0 %4152  ;;  %8614 = vmatprep.subr.mxu1 %v9357_v18 }
 0xd17   :  { %v4179_v14 = vpop.permute.xlu1 %4178  ;;  %8612 = vmatmul.mubr.msk.f32.vlgmr.msra.gmra.mrb[56].mxu0 %vm580_vm1, %v4145_v5 }
 0xd18   :  { %8620 = vmatpush3.xpose.msk.msra.mxu0 %vm580_vm1, %v4177_v3  ;;  %8621 = vmatprep.mubr.msk.f32.mxu0 %vm9358_vm0, %v9357_v18 }
 0xd19   :  { %8629 = vmatprep.subr.mxu0 %v9357_v18 }
 0xd1a   :  { %v4149_v34 = vpop.permute.xlu0 %4148 }
 0xd1b   :  { %v4143_v10 = vpop.permute.xlu1 %4142  ;;  %8622 = vmatmul.mubr.msk.f32.vlgmr.msra.gmra.mrb[58].mxu0 %vm580_vm1, %v4149_v34 }
 0xd1c   :  { %8630 = vmatpush3.xpose.msk.msra.mxu0 %vm580_vm1, %v4181_v58  ;;  %8607 = vmatmul.mubr.msk.f32.vlgmr.msra.gmra.mrb[66].mxu1 %vm580_vm1, %v4143_v10 }
 0xd1d   :  { %8615 = vmatpush3.xpose.msk.msra.mxu1 %vm580_vm1, %v4175_v15  ;;  %8631 = vmatprep.mubr.msk.f32.mxu0 %vm9358_vm0, %v9357_v18 }
 0xd1e   :  { %8639 = vmatprep.subr.mxu0 %v9357_v18  ;;  %v4185_v29 = vpop.permute.xlu0 %4184  ;;  %8616 = vmatprep.mubr.msk.f32.mxu1 %vm9358_vm0, %v9357_v18 }
 0xd1f   :  { %v4155_v50 = vpop.permute.xlu1 %4154  ;;  %8624 = vmatprep.subr.mxu1 %v9357_v18  ;;  %8632 = vmatmul.mubr.msk.f32.vlgmr.msra.gmra.mrb[60].mxu0 %vm580_vm1, %v4153_v21 }
 0xd20   :  { %8640 = vmatpush3.xpose.msk.msra.mxu0 %vm580_vm1, %v4185_v29  ;;  %8617 = vmatmul.mubr.msk.f32.vlgmr.msra.gmra.mrb[68].mxu1 %vm580_vm1, %v4147_v11 }
 0xd21   :  { %8625 = vmatpush3.xpose.msk.msra.mxu1 %vm580_vm1, %v4179_v14  ;;  %8641 = vmatprep.mubr.msk.f32.mxu0 %vm9358_vm0, %v9357_v18 }
 0xd22   :  { %8649 = vmatprep.subr.mxu0 %v9357_v18  ;;  %v4157_v62 = vpop.permute.xlu0 %4156  ;;  %8626 = vmatprep.mubr.msk.f32.mxu1 %vm9358_vm0, %v9357_v18 }
 0xd23   :  { %v4151_v63 = vpop.permute.xlu1 %4150  ;;  %8634 = vmatprep.subr.mxu1 %v9357_v18  ;;  %8642 = vmatmul.mubr.msk.f32.vlgmr.msra.gmra.mrb[62].mxu0 %vm580_vm1, %v4157_v62 }
 0xd24   :  { %8650 = vmatpush3.msra.mxu0 %v10359_v19  ;;  %8627 = vmatmul.mubr.msk.f32.vlgmr.msra.gmra.mrb[70].mxu1 %vm580_vm1, %v4151_v63 }
 0xd25   :  { %8635 = vmatpush3.xpose.msk.msra.mxu1 %vm580_vm1, %v4183_v25  ;;  %8636 = vmatprep.mubr.msk.f32.mxu1 %vm9358_vm0, %v9357_v18 }
 0xd26   :  { %8644 = vmatprep.subr.mxu1 %v9357_v18  ;;  %8651 = vmatprep.mubr.msk.f32.mxu0 %vm9358_vm0, %v9357_v18 }
 0xd27   :  { %v4187_v40 = vpop.permute.xlu1 %4186  ;;  %8659 = vmatprep.subr.mxu0 %v9357_v18 }
 0xd28   :  { %8637 = vmatmul.mubr.msk.f32.vlgmr.msra.gmra.mrb[72].mxu1 %vm580_vm1, %v4155_v50 }
 0xd29   :  { %8645 = vmatpush3.xpose.msk.msra.mxu1 %vm580_vm1, %v4187_v40  ;;  %8646 = vmatprep.mubr.msk.f32.mxu1 %vm9358_vm0, %v9357_v18 }
 0xd2a   :  { %8654 = vmatprep.subr.mxu1 %v9357_v18 }
 0xd2b   :  { %v4159_v30 = vpop.permute.xlu1 %4158 }
 0xd2c   :  { %8647 = vmatmul.mubr.msk.f32.vlgmr.msra.gmra.mrb[74].mxu1 %vm580_vm1, %v4159_v30 }
 0xd2d   :  { %8655 = vmatpush3.msra.mxu1 %v10375_v1  ;;  %8656 = vmatprep.mubr.msk.f32.mxu1 %vm9358_vm0, %v9357_v18 }
 0xd2e   :  { %8664 = vmatprep.subr.mxu1 %v9357_v18 }
 0xd5e   :  { %v4298_v27 = vpop.f32.mrb[34].mxu1 }
 0xd5f   :  { %v10446_v6 = vadd.f32 %v4298_v27, %v9758_v28  ;;  %v8573_v8 = vpop.f32.mrb[35].mxu1 }
 0xd61   :  { %v5412_v38 = vsel %vm1765_vm2, %v10446_v6, -inf }
 0xd62   :  { %5413 = vmax.xlane.f32.xlu0 %v5412_v38  ;;  %v4372_v32 = vpop.f32.mrb[56].mxu1 }
 0xd63   :  { %v10451_v13 = vadd.f32 %v4372_v32, %v9764_v35  ;;  %v8578_v42 = vpop.f32.mrb[57].mxu1 }
 0xd65   :  { %v5415_v33 = vsel %vm1765_vm2, %v10451_v13, -inf }
 0xd66   :  { %v4446_v44 = vpop.f32.mrb[58].mxu1  ;;  %5416 = vmax.xlane.f32.xlu1 %v5415_v33 }
 0xd67   :  { %v10456_v17 = vadd.f32 %v4446_v44, %v9772_v43  ;;  %v8583_v22 = vpop.f32.mrb[59].mxu1 }
 0xd69   :  { %v5418_v41 = vsel %vm1765_vm2, %v10456_v17, -inf }
 0xd6a   :  { %5419 = vmax.xlane.f32.xlu0 %v5418_v41  ;;  %v4520_v31 = vpop.f32.mrb[60].mxu1 }
 0xd6b   :  { %v10461_v55 = vadd.f32 %v4520_v31, %v9777_v45  ;;  %v8588_v12 = vpop.f32.mrb[61].mxu1 }
 0xd6d   :  { %v5421_v9 = vsel %vm1765_vm2, %v10461_v55, -inf }
 0xd6e   :  { %5422 = vmax.xlane.f32.xlu0 %v5421_v9 }
 0xdd1   :  { %v4594_v4 = vpop.f32.mrb[62].mxu1 }
 0xdd2   :  { %v10466_v46 = vadd.f32 %v4594_v4, %v9758_v28  ;;  %v8593_v52 = vpop.f32.mrb[63].mxu1 }
 0xdd4   :  { %v5424_v51 = vsel %vm1765_vm2, %v10466_v46, -inf }
 0xdd5   :  { %5425 = vmax.xlane.f32.xlu0 %v5424_v51 }
 0xddf   :  { %v4668_v57 = vpop.f32.mrb[64].mxu1 }
 0xde0   :  { %v10471_v58 = vadd.f32 %v4668_v57, %v9764_v35  ;;  %v8598_v15 = vpop.f32.mrb[65].mxu1 }
 0xde2   :  { %v5427_v5 = vsel %vm1765_vm2, %v10471_v58, -inf }
 0xde3   :  { %5428 = vmax.xlane.f32.xlu1 %v5427_v5 }
 0xde6   :  { %v4742_v25 = vpop.f32.mrb[42].mxu0 }
 0xde7   :  { %v10476_v49 = vadd.f32 %v4742_v25, %v9772_v43  ;;  %v8603_v60 = vpop.f32.mrb[43].mxu0 }
 0xde8   :  { %v10520_v60 = vpop.permute.xlu0 %4192 }
 0xde9   :  { %v5430_v3 = vsel %vm1765_vm2, %v10476_v49, -inf }
 0xdea   :  { %5431 = vmax.xlane.f32.xlu0 %v5430_v3  ;;  %v4890_v11 = vpop.f32.mrb[56].mxu0 }
 0xdeb   :  { %v10481_v26 = vadd.f32 %v4890_v11, %v9758_v28  ;;  %v8613_v48 = vpop.f32.mrb[57].mxu0 }
 0xded   :  { %v5436_v21 = vsel %vm1765_vm2, %v10481_v26, -inf }
 0xdee   :  { %5437 = vmax.xlane.f32.xlu0 %v5436_v21  ;;  %v5038_v14 = vpop.f32.mrb[58].mxu0 }
 0xdef   :  { %v10486_v34 = vadd.f32 %v5038_v14, %v9772_v43  ;;  %v4816_v10 = vpop.f32.mrb[66].mxu1  ;;  %v8623_v29 = vpop.f32.mrb[59].mxu0 }
 0xdf0   :  { %v10489_v50 = vadd.f32 %v4816_v10, %v9777_v45  ;;  %v8608_v62 = vpop.f32.mrb[67].mxu1 }
 0xdf1   :  { %v5442_v63 = vsel %vm1765_vm2, %v10486_v34, -inf }
 0xdf2   :  { %5443 = vmax.xlane.f32.xlu0 %v5442_v63  ;;  %v5186_v40 = vpop.f32.mrb[60].mxu0  ;;  %v5433_v30 = vsel %vm1765_vm2, %v10489_v50, -inf }
 0xdf3   :  { %v10496_v27 = vadd.f32 %v5186_v40, %v9758_v28  ;;  %5434 = vmax.xlane.f32.xlu1 %v5433_v30  ;;  %v4964_v8 = vpop.f32.mrb[68].mxu1  ;;  %v8633_v32 = vpop.f32.mrb[61].mxu0 }
 0xdf4   :  { %v10499_v38 = vadd.f32 %v4964_v8, %v9764_v35  ;;  %v8618_v42 = vpop.f32.mrb[69].mxu1  ;;  %v10545_v40 = vpop.permute.xlu1 %4196 }
 0xdf5   :  { %v5448_v33 = vsel %vm1765_vm2, %v10496_v27, -inf }
 0xdf6   :  { %5449 = vmax.xlane.f32.xlu0 %v5448_v33  ;;  %v5334_v44 = vpop.f32.mrb[62].mxu0  ;;  %v5439_v22 = vsel %vm1765_vm2, %v10499_v38, -inf }
 0xdf7   :  { %v10506_v41 = vadd.f32 %v5334_v44, %v9772_v43  ;;  %5440 = vmax.xlane.f32.xlu1 %v5439_v22  ;;  %v5112_v28 = vpop.f32.mrb[70].mxu1  ;;  %v8643_v31 = vpop.f32.mrb[63].mxu0 }
 0xdf8   :  { %v10509_v12 = vadd.f32 %v5112_v28, %v9777_v45  ;;  %v8628_v9 = vpop.f32.mrb[71].mxu1  ;;  %v10547_v30 = vpop.permute.xlu1 %4198 }
 0xdf9   :  { %v5454_v4 = vsel %vm1765_vm2, %v10506_v41, -inf }
 0xdfa   :  { %5455 = vmax.xlane.f32.xlu0 %v5454_v4  ;;  %v5445_v52 = vsel %vm1765_vm2, %v10509_v12, -inf }
 0xdfb   :  { %5446 = vmax.xlane.f32.xlu1 %v5445_v52  ;;  %v5260_v51 = vpop.f32.mrb[72].mxu1 }
 0xdfc   :  { %v10516_v57 = vadd.f32 %v5260_v51, %v9764_v35  ;;  %v8638_v43 = vpop.f32.mrb[73].mxu1  ;;  %v10528_v35 = vpop.permute.xlu0 %4204 }
 0xdfe   :  { %v5451_v15 = vsel %vm1765_vm2, %v10516_v57, -inf }
 0xdff   :  { %5452 = vmax.xlane.f32.xlu1 %v5451_v15  ;;  %v5408_v5 = vpop.f32.mrb[74].mxu1 }
 0xe00   :  { %v8648_v25 = vpop.f32.mrb[75].mxu1  ;;  %v5414_v3 = vpop.xlane.xlu0 %5413  ;;  %v10535_v62 = vadd.f32 %v5408_v5, %v9777_v45 }
 0xe01   :  { %v5460_v11 = vsub.f32 %v10446_v6, %v5414_v3  ;;  %v10551_v45 = vpop.permute.xlu1 %4194 }
 0xe02   :  { %v5457_v6 = vsel %vm1765_vm2, %v10535_v62, -inf }
 0xe03   :  { %v5476_v21 = vmul.f32 1.442695, %v5460_v11 }
 0xe04   :  { %v5420_v48 = vpop.xlane.xlu0 %5419 }
 0xe05   :  { %v5462_v14 = vsub.f32 %v10456_v17, %v5420_v48  ;;  %9131 = vpow2.f32 %v5476_v21  ;;  %v10553_v8 = vpop.permute.xlu1 %4206 }
 0xe07   :  { %v5480_v10 = vmul.f32 1.442695, %v5462_v14 }
 0xe08   :  { %v5423_v33 = vpop.xlane.xlu0 %5422 }
 0xe09   :  { %9133 = vpow2.f32 %v5480_v10  ;;  %v5417_v32 = vpop.xlane.xlu1 %5416  ;;  %v5463_v22 = vsub.f32 %v10461_v55, %v5423_v33 }
 0xe0a   :  { %v5461_v42 = vsub.f32 %v10451_v13, %v5417_v32 }
 0xe0b   :  { %v5482_v28 = vmul.f32 1.442695, %v5463_v22 }
 0xe0c   :  { %v5478_v44 = vmul.f32 1.442695, %v5461_v42 }
 0xe0e   :  { %9135 = vpow2.f32 %v5478_v44 }
 0xe0f   :  { %v10532_v29 = vpop.eup %9131  ;;  %9137 = vpow2.f32 %v5482_v28 }
 0xe10   :  { %4210 = vrot.lane.b32.xlu1 %v10371_v24, %s9349_s19  ;;  %4208 = vrot.lane.b32.xlu0 %v10367_v16, %s9349_s19 }
 0xe13   :  { %v10539_v63 = vpop.eup %9133 }
 0xe14   :  { %4216 = vrot.lane.b32.xlu0 %v10359_v19, %s9360_s27  ;;  %v5508_v19 = vsel %vm1765_vm2, %v10532_v29, 0.0  ;;  %v5514_v17 = vsel %vm1765_vm2, %v10539_v63, 0.0 }
 0xe18   :  { %v10558_v4 = vpop.eup %9135 }
 0xe19   :  { %v5511_v52 = vsel %vm1765_vm2, %v10558_v4, 0.0  ;;  %v10562_v51 = vpop.eup %9137 }
 0xe1a   :  { %v5517_v13 = vsel %vm1765_vm2, %v10562_v51, 0.0 }
 0xe33   :  { %5509 = vadd.xlane.f32.xlu0 %v5508_v19 }
 0xe34   :  { %5458 = vmax.xlane.f32.xlu1 %v5457_v6 }
 0xe37   :  { %5515 = vadd.xlane.f32.xlu0 %v5514_v17 }
 0xe45   :  { %4218 = vrot.lane.b32.xlu1 %v10375_v1, %s9360_s27 }
 0xe62   :  { %v5426_v31 = vpop.xlane.xlu0 %5425 }
 0xe63   :  { %v5464_v9 = vsub.f32 %v10466_v46, %v5426_v31 }
 0xe65   :  { %v5484_v1 = vmul.f32 1.442695, %v5464_v9 }
 0xe67   :  { %9139 = vpow2.f32 %v5484_v1 }
 0xe69   :  { %5512 = vadd.xlane.f32.xlu1 %v5511_v52 }
 0xe6d   :  { %5518 = vadd.xlane.f32.xlu1 %v5517_v13 }
 0xe70   :  { %v5429_v55 = vpop.xlane.xlu1 %5428 }
 0xe71   :  { %v10566_v43 = vpop.eup %9139  ;;  %v5465_v15 = vsub.f32 %v10471_v58, %v5429_v55 }
 0xe72   :  { %v5520_v46 = vsel %vm1765_vm2, %v10566_v43, 0.0 }
 0xe73   :  { %v5486_v5 = vmul.f32 1.442695, %v5465_v15  ;;  %5521 = vadd.xlane.f32.xlu0 %v5520_v46 }
 0xe75   :  { %9141 = vpow2.f32 %v5486_v5 }
 0xe77   :  { %v5432_v25 = vpop.xlane.xlu0 %5431 }
 0xe78   :  { %v5466_v3 = vsub.f32 %v10476_v49, %v5432_v25 }
 0xe7a   :  { %v5488_v11 = vmul.f32 1.442695, %v5466_v3 }
 0xe7b   :  { %v5438_v48 = vpop.xlane.xlu0 %5437 }
 0xe7c   :  { %9143 = vpow2.f32 %v5488_v11  ;;  %v5468_v21 = vsub.f32 %v10481_v26, %v5438_v48 }
 0xe7e   :  { %v5492_v14 = vmul.f32 1.442695, %v5468_v21 }
 0xe7f   :  { %v10573_v10 = vpop.eup %9141  ;;  %v5444_v19 = vpop.xlane.xlu0 %5443 }
 0xe80   :  { %9145 = vpow2.f32 %v5492_v14  ;;  %v5470_v58 = vsub.f32 %v10486_v34, %v5444_v19  ;;  %v5435_v6 = vpop.xlane.xlu1 %5434  ;;  %v5523_v17 = vsel %vm1765_vm2, %v10573_v10, 0.0 }
 0xe81   :  { %v5467_v32 = vsub.f32 %v10489_v50, %v5435_v6  ;;  %5524 = vadd.xlane.f32.xlu1 %v5523_v17 }
 0xe82   :  { %v5496_v49 = vmul.f32 1.442695, %v5470_v58 }
 0xe83   :  { %v5490_v42 = vmul.f32 1.442695, %v5467_v32  ;;  %v5450_v33 = vpop.xlane.xlu0 %5449 }
 0xe84   :  { %9147 = vpow2.f32 %v5496_v49  ;;  %v5472_v26 = vsub.f32 %v10496_v27, %v5450_v33  ;;  %v5441_v44 = vpop.xlane.xlu1 %5440 }
 0xe85   :  { %9149 = vpow2.f32 %v5490_v42  ;;  %v5469_v22 = vsub.f32 %v10499_v38, %v5441_v44 }
 0xe86   :  { %v10581_v28 = vpop.eup %9143  ;;  %v5500_v34 = vmul.f32 1.442695, %v5472_v26 }
 0xe87   :  { %v5494_v31 = vmul.f32 1.442695, %v5469_v22  ;;  %v5456_v9 = vpop.xlane.xlu0 %5455  ;;  %v5526_v1 = vsel %vm1765_vm2, %v10581_v28, 0.0 }
 0xe88   :  { %9151 = vpow2.f32 %v5500_v34  ;;  %v5474_v50 = vsub.f32 %v10506_v41, %v5456_v9  ;;  %v5447_v52 = vpop.xlane.xlu1 %5446  ;;  %5527 = vadd.xlane.f32.xlu0 %v5526_v1 }
 0xe89   :  { %9153 = vpow2.f32 %v5494_v31  ;;  %v5471_v27 = vsub.f32 %v10509_v12, %v5447_v52 }
 0xe8a   :  { %v10587_v13 = vpop.eup %9145  ;;  %v5504_v55 = vmul.f32 1.442695, %v5474_v50 }
 0xe8b   :  { %v5498_v38 = vmul.f32 1.442695, %v5471_v27  ;;  %v5532_v15 = vsel %vm1765_vm2, %v10587_v13, 0.0  ;;  %v10622_v42 = vpop.permute.xlu0 %4208 }
 0xe8c   :  { %9155 = vpow2.f32 %v5504_v55  ;;  %v5453_v46 = vpop.xlane.xlu1 %5452  ;;  %5533 = vadd.xlane.f32.xlu0 %v5532_v15 }
 0xe8d   :  { %9157 = vpow2.f32 %v5498_v38  ;;  %v5473_v5 = vsub.f32 %v10516_v57, %v5453_v46 }
 0xe8e   :  { %v10592_v25 = vpop.eup %9147 }
 0xe8f   :  { %v10594_v41 = vpop.eup %9149  ;;  %v5502_v3 = vmul.f32 1.442695, %v5473_v5  ;;  %v5538_v12 = vsel %vm1765_vm2, %v10592_v25, 0.0  ;;  %v10624_v33 = vpop.permute.xlu0 %4216 }
 0xe90   :  { %5539 = vadd.xlane.f32.xlu0 %v5538_v12  ;;  %v5529_v11 = vsel %vm1765_vm2, %v10594_v41, 0.0  ;;  %v10626_v26 = vpop.permute.xlu1 %4210 }
 0xe91   :  { %9159 = vpow2.f32 %v5502_v3  ;;  %5530 = vadd.xlane.f32.xlu1 %v5529_v11 }
 0xe92   :  { %v10600_v48 = vpop.eup %9151 }
 0xe93   :  { %v10602_v21 = vpop.eup %9153  ;;  %v5544_v57 = vsel %vm1765_vm2, %v10600_v48, 0.0 }
 0xe94   :  { %5545 = vadd.xlane.f32.xlu0 %v5544_v57  ;;  %v5535_v14 = vsel %vm1765_vm2, %v10602_v21, 0.0 }
 0xe95   :  { %5536 = vadd.xlane.f32.xlu1 %v5535_v14 }
 0xe96   :  { %v10608_v19 = vpop.eup %9155 }
 0xe97   :  { %v10610_v58 = vpop.eup %9157  ;;  %v5550_v6 = vsel %vm1765_vm2, %v10608_v19, 0.0 }
 0xe98   :  { %5551 = vadd.xlane.f32.xlu0 %v5550_v6  ;;  %v5541_v17 = vsel %vm1765_vm2, %v10610_v58, 0.0 }
 0xe99   :  { %5542 = vadd.xlane.f32.xlu1 %v5541_v17 }
 0xe9b   :  { %v10616_v32 = vpop.eup %9159 }
 0xe9c   :  { %v5547_v49 = vsel %vm1765_vm2, %v10616_v32, 0.0 }
 0xe9d   :  { %5548 = vadd.xlane.f32.xlu1 %v5547_v49 }
 0xeae   :  { %4220 = vrot.lane.b32.xlu0 %v10367_v16, %s9360_s27 }
 0xec0   :  { %v5510_v44 = vpop.xlane.xlu0 %5509 }
 0xec1   :  { %9161 = vrcp.f32 %v5510_v44  ;;  %v5459_v22 = vpop.xlane.xlu1 %5458 }
 0xec2   :  { %v5475_v34 = vsub.f32 %v10535_v62, %v5459_v22 }
 0xec4   :  { %v5506_v31 = vmul.f32 1.442695, %v5475_v34  ;;  %v5516_v9 = vpop.xlane.xlu0 %5515 }
 0xec5   :  { %9163 = vrcp.f32 %v5516_v9 }
 0xec6   :  { %9165 = vpow2.f32 %v5506_v31 }
 0xecb   :  { %v9162_v1 = vpop.eup %9161 }
 0xecc   :  { %v5572_v50 = vmul.f32 %v9162_v1, %v10532_v29 }
 0xece   :  { %8652 = vmatmul.mubr.msk.f32.vlgmr.msra.gmra.mrb[64].mxu0 %vm1765_vm2, %v5572_v50 }
 0xecf   :  { %v9164_v52 = vpop.eup %9163  ;;  %8660 = vmatpush3.msra.mxu0 %v10367_v16  ;;  %8661 = vmatprep.mubr.msk.f32.mxu0 %vm9358_vm0, %v9357_v18  ;;  %v10647_v16 = vpop.permute.xlu1 %4218 }
 0xed0   :  { %v10634_v27 = vpop.eup %9165  ;;  %v5574_v55 = vmul.f32 %v9164_v52, %v10539_v63  ;;  %8669 = vmatprep.subr.mxu0 %v9357_v18 }
 0xed1   :  { %v5553_v62 = vsel %vm1765_vm2, %v10634_v27, 0.0 }
 0xed2   :  { %5554 = vadd.xlane.f32.xlu1 %v5553_v62  ;;  %8662 = vmatmul.mubr.msk.f32.vlgmr.msra.gmra.mrb[66].mxu0 %vm1765_vm2, %v5574_v55 }
 0xed3   :  { %8670 = vmatpush3.msra.mxu0 %v10520_v60  ;;  %8671 = vmatprep.mubr.msk.f32.mxu0 %vm9358_vm0, %v9357_v18 }
 0xed4   :  { %8679 = vmatprep.subr.mxu0 %v9357_v18 }
 0xee3   :  { %4222 = vrot.lane.b32.xlu1 %v10371_v24, %s9360_s27 }
 0xef6   :  { %v5513_v29 = vpop.xlane.xlu1 %5512 }
 0xef7   :  { %9167 = vrcp.f32 %v5513_v29 }
 0xefa   :  { %v5519_v63 = vpop.xlane.xlu1 %5518 }
 0xefb   :  { %9169 = vrcp.f32 %v5519_v63 }
 0xf00   :  { %v5522_v38 = vpop.xlane.xlu0 %5521 }
 0xf01   :  { %v9168_v15 = vpop.eup %9167  ;;  %9171 = vrcp.f32 %v5522_v38 }
 0xf02   :  { %v5573_v46 = vmul.f32 %v9168_v15, %v10558_v4 }
 0xf04   :  { %8657 = vmatmul.mubr.msk.f32.vlgmr.msra.gmra.mrb[76].mxu1 %vm1765_vm2, %v5573_v46 }
 0xf05   :  { %v9170_v60 = vpop.eup %9169  ;;  %8665 = vmatpush3.msra.mxu1 %v10371_v24  ;;  %8666 = vmatprep.mubr.msk.f32.mxu1 %vm9358_vm0, %v9357_v18 }
 0xf06   :  { %v5575_v5 = vmul.f32 %v9170_v60, %v10562_v51  ;;  %8674 = vmatprep.subr.mxu1 %v9357_v18 }
 0xf08   :  { %8667 = vmatmul.mubr.msk.f32.vlgmr.msra.gmra.mrb[78].mxu1 %vm1765_vm2, %v5575_v5 }
 0xf09   :  { %8675 = vmatpush3.msra.mxu1 %v10551_v45  ;;  %8676 = vmatprep.mubr.msk.f32.mxu1 %vm9358_vm0, %v9357_v18 }
 0xf0a   :  { %8684 = vmatprep.subr.mxu1 %v9357_v18 }
 0xf0b   :  { %v9172_v4 = vpop.eup %9171 }
 0xf0c   :  { %v5576_v3 = vmul.f32 %v9172_v4, %v10566_v43 }
 0xf0e   :  { %v5525_v24 = vpop.xlane.xlu1 %5524  ;;  %8672 = vmatmul.mubr.msk.f32.vlgmr.msra.gmra.mrb[68].mxu0 %vm1765_vm2, %v5576_v3 }
 0xf0f   :  { %9173 = vrcp.f32 %v5525_v24  ;;  %8680 = vmatpush3.msra.mxu0 %v10545_v40  ;;  %8681 = vmatprep.mubr.msk.f32.mxu0 %vm9358_vm0, %v9357_v18 }
 0xf10   :  { %8689 = vmatprep.subr.mxu0 %v9357_v18 }
 0xf15   :  { %v5528_v45 = vpop.xlane.xlu0 %5527 }
 0xf16   :  { %9175 = vrcp.f32 %v5528_v45 }
 0xf19   :  { %v9174_v51 = vpop.eup %9173  ;;  %v5534_v12 = vpop.xlane.xlu0 %5533 }
 0xf1a   :  { %v5577_v11 = vmul.f32 %v9174_v51, %v10573_v10  ;;  %9177 = vrcp.f32 %v5534_v12 }
 0xf1c   :  { %8677 = vmatmul.mubr.msk.f32.vlgmr.msra.gmra.mrb[80].mxu1 %vm1765_vm2, %v5577_v11 }
 0xf1d   :  { %8685 = vmatpush3.msra.mxu1 %v10547_v30  ;;  %v5540_v43 = vpop.xlane.xlu0 %5539  ;;  %8686 = vmatprep.mubr.msk.f32.mxu1 %vm9358_vm0, %v9357_v18 }
 0xf1e   :  { %9179 = vrcp.f32 %v5540_v43  ;;  %v5531_v40 = vpop.xlane.xlu1 %5530  ;;  %8694 = vmatprep.subr.mxu1 %v9357_v18 }
 0xf1f   :  { %9181 = vrcp.f32 %v5531_v40 }
 0xf20   :  { %v9176_v57 = vpop.eup %9175 }
 0xf21   :  { %v5578_v14 = vmul.f32 %v9176_v57, %v10581_v28  ;;  %v5546_v6 = vpop.xlane.xlu0 %5545 }
 0xf22   :  { %9183 = vrcp.f32 %v5546_v6  ;;  %v5537_v10 = vpop.xlane.xlu1 %5536 }
 0xf23   :  { %9185 = vrcp.f32 %v5537_v10  ;;  %8682 = vmatmul.mubr.msk.f32.vlgmr.msra.gmra.mrb[70].mxu0 %vm1765_vm2, %v5578_v14 }
 0xf24   :  { %v9178_v17 = vpop.eup %9177  ;;  %8690 = vmatpush3.msra.mxu0 %v10528_v35  ;;  %8691 = vmatprep.mubr.msk.f32.mxu0 %vm9358_vm0, %v9357_v18 }
 0xf25   :  { %v5580_v30 = vmul.f32 %v9178_v17, %v10587_v13  ;;  %v5552_v49 = vpop.xlane.xlu0 %5551  ;;  %8699 = vmatprep.subr.mxu0 %v9357_v18 }
 0xf26   :  { %9187 = vrcp.f32 %v5552_v49  ;;  %v5543_v44 = vpop.xlane.xlu1 %5542 }
 0xf27   :  { %9189 = vrcp.f32 %v5543_v44  ;;  %8692 = vmatmul.mubr.msk.f32.vlgmr.msra.gmra.mrb[72].mxu0 %vm1765_vm2, %v5580_v30  ;;  %v8955_v44 = vld [vmem:[%s10913_s3 + $0x40] sm:$0xff]  }
 0xf28   :  { %v9180_v28 = vpop.eup %9179  ;;  %8700 = vmatpush3.msra.mxu0 %v10622_v42  ;;  %8701 = vmatprep.mubr.msk.f32.mxu0 %vm9358_vm0, %v9357_v18 }
 0xf29   :  { %v9182_v35 = vpop.eup %9181  ;;  %v5582_v22 = vmul.f32 %v9180_v28, %v10592_v25  ;;  %8709 = vmatprep.subr.mxu0 %v9357_v18  ;;  %v8956_v28 = vld [vmem:[%s10913_s3 + $0x48] sm:$0xff]  }
 0xf2a   :  { %v5579_v13 = vmul.f32 %v9182_v35, %v10594_v41  ;;  %v5549_v34 = vpop.xlane.xlu1 %5548  ;;  %v4221_v41 = vpop.permute.xlu0 %4220 }
 0xf2b   :  { %9191 = vrcp.f32 %v5549_v34  ;;  %8702 = vmatmul.mubr.msk.f32.vlgmr.msra.gmra.mrb[74].mxu0 %vm1765_vm2, %v5582_v22 }
 0xf2c   :  { %v9184_v31 = vpop.eup %9183  ;;  %8710 = vmatpush3.msra.mxu0 %v10624_v33  ;;  %8687 = vmatmul.mubr.msk.f32.vlgmr.msra.gmra.mrb[82].mxu1 %vm1765_vm2, %v5579_v13 }
 0xf2d   :  { %v9186_v42 = vpop.eup %9185  ;;  %v5584_v9 = vmul.f32 %v9184_v31, %v10600_v48  ;;  %8695 = vmatpush3.msra.mxu1 %v10553_v8  ;;  %8711 = vmatprep.mubr.msk.f32.mxu0 %vm9358_vm0, %v9357_v18  ;;  %v8957_v31 = vld [vmem:[%s10913_s3 + $0x50] sm:$0xff]  }
 0xf2e   :  { %v5581_v25 = vmul.f32 %v9186_v42, %v10602_v21  ;;  %8719 = vmatprep.subr.mxu0 %v9357_v18  ;;  %8696 = vmatprep.mubr.msk.f32.mxu1 %vm9358_vm0, %v9357_v18 }
 0xf2f   :  { %8704 = vmatprep.subr.mxu1 %v9357_v18  ;;  %8712 = vmatmul.mubr.msk.f32.vlgmr.msra.gmra.mrb[76].mxu0 %vm1765_vm2, %v5584_v9 }
 0xf30   :  { %v9188_v33 = vpop.eup %9187  ;;  %8720 = vmatpush3.msra.mxu0 %v4221_v41  ;;  %8697 = vmatmul.mubr.msk.f32.vlgmr.msra.gmra.mrb[84].mxu1 %vm1765_vm2, %v5581_v25  ;;  %v8958_v41 = vld [vmem:[%s10913_s3 + $0x58] sm:$0xff]  }
 0xf31   :  { %v9190_v8 = vpop.eup %9189  ;;  %v5586_v48 = vmul.f32 %v9188_v33, %v10608_v19  ;;  %8705 = vmatpush3.msra.mxu1 %v10626_v26  ;;  %8721 = vmatprep.mubr.msk.f32.mxu0 %vm9358_vm0, %v9357_v18  ;;  %v8959_v33 = vld [vmem:[%s10913_s3 + $0x60] sm:$0xff]  }
 0xf32   :  { %v5583_v21 = vmul.f32 %v9190_v8, %v10610_v58  ;;  %8706 = vmatprep.mubr.msk.f32.mxu1 %vm9358_vm0, %v9357_v18  ;;  %8714 = vmatprep.subr.mxu1 %v9357_v18  ;;  %v8960_v8 = vld [vmem:[%s10913_s3 + $0x68] sm:$0xff]  }
 0xf33   :  { %8722 = vmatmul.mubr.msk.f32.vlgmr.msra.gmra.mrb[78].mxu0 %vm1765_vm2, %v5586_v48  ;;  %8729 = vmatprep.subr.bf16.mxu0 %v8955_v44  ;;  %v8961_v48 = vld [vmem:[%s10913_s3 + $0x70] sm:$0xff]  }
 0xf34   :  { %8707 = vmatmul.mubr.msk.f32.vlgmr.msra.gmra.mrb[86].mxu1 %vm1765_vm2, %v5583_v21  ;;  %8730 = vmatpush3.bf16.msra.mxu0 %v8955_v44  ;;  %v8962_v21 = vld [vmem:[%s10913_s3 + $0x78] sm:$0xff]  }
 0xf35   :  { %v9192_v1 = vpop.eup %9191  ;;  %8715 = vmatpush3.msra.mxu1 %v10647_v16  ;;  %8716 = vmatprep.mubr.msk.f32.mxu1 %vm9358_vm0, %v9357_v18 }
 0xf36   :  { %v5585_v19 = vmul.f32 %v9192_v1, %v10616_v32  ;;  %8724 = vmatprep.subr.mxu1 %v9357_v18  ;;  %8731 = vmatprep.subr.bf16.mxu0 %v8956_v28 }
 0xf38   :  { %8717 = vmatmul.mubr.msk.f32.vlgmr.msra.gmra.mrb[88].mxu1 %vm1765_vm2, %v5585_v19  ;;  %8732 = vmatpush3.bf16.msra.mxu0 %v8956_v28 }
 0xf39   :  { %8726 = vmatprep.mubr.msk.f32.mxu1 %vm9358_vm0, %v9357_v18  ;;  %8733 = vmatprep.subr.bf16.mxu0 %v8957_v31 }
 0xf3c   :  { %8734 = vmatpush3.bf16.msra.mxu0 %v8957_v31 }
 0xf3d   :  { %8735 = vmatprep.subr.bf16.mxu0 %v8958_v41 }
 0xf40   :  { %8736 = vmatpush3.bf16.msra.mxu0 %v8958_v41 }
 0xf41   :  { %8737 = vmatprep.subr.bf16.mxu0 %v8959_v33 }
 0xf44   :  { %8738 = vmatpush3.bf16.msra.mxu0 %v8959_v33 }
 0xf45   :  { %8739 = vmatprep.subr.bf16.mxu0 %v8960_v8 }
 0xf48   :  { %8740 = vmatpush3.bf16.msra.mxu0 %v8960_v8 }
 0xf49   :  { %8741 = vmatprep.subr.bf16.mxu0 %v8961_v48 }
 0xf4c   :  { %8742 = vmatpush3.bf16.msra.mxu0 %v8961_v48 }
 0xf4d   :  { %8743 = vmatprep.subr.bf16.mxu0 %v8962_v21 }
 0xf50   :  { %8744 = vmatpush3.bf16.msra.mxu0 %v8962_v21 }
 0xf5f   :  { %v5555_v58 = vpop.xlane.xlu1 %5554 }
 0xf60   :  { %9193 = vrcp.f32 %v5555_v58 }
 0xf63   :  { %v4223_v26 = vpop.permute.xlu1 %4222 }
 0xf64   :  { %8725 = vmatpush3.msra.mxu1 %v4223_v26 }
 0xf6a   :  { %v9194_v50 = vpop.eup %9193 }
 0xf6b   :  { %v5587_v52 = vmul.f32 %v9194_v50, %v10634_v27 }
 0xf6d   :  { %8727 = vmatmul.mubr.msk.f32.vlgmr.msra.gmra.mrb[90].mxu1 %vm1765_vm2, %v5587_v52 }
 0xf6e   :  { %7139 = vmatprep.mubr.bf16.mxu1 %v9356_v39 }
 0xfa1   :  { %v10722_v55 = vpop.f32.mrb[64].mxu0 }
 0xfa2   :  { %v8653_v32 = vpop.f32.mrb[65].mxu0 }
 0xfa5   :  { %v10724_v62 = vpop.f32.mrb[66].mxu0 }
 0xfa6   :  { %v8663_v16 = vpop.f32.mrb[67].mxu0 }
 0xfd7   :  { %v10726_v29 = vpop.f32.mrb[76].mxu1 }
 0xfd8   :  { %v8658_v63 = vpop.f32.mrb[77].mxu1 }
 0xfdb   :  { %v10728_v38 = vpop.f32.mrb[78].mxu1 }
 0xfdc   :  { %v8668_v15 = vpop.f32.mrb[79].mxu1 }
 0xfe1   :  { %v5949_v46 = vpop.f32.mrb[68].mxu0 }
 0xfe2   :  { %v8673_v60 = vpop.f32.mrb[69].mxu0 }
 0xfef   :  { %v6022_v5 = vpop.f32.mrb[80].mxu1 }
 0xff0   :  { %v8813_v27 = vpack.i.bf16 %v6022_v5, %v5949_v46  ;;  %v8678_v4 = vpop.f32.mrb[81].mxu1 }
 0xff2   :  { %8814 = vrot.lane.b32.xlu0 %v8813_v27, %s9360_s27 }
 0xff6   :  { %v6095_v3 = vpop.f32.mrb[70].mxu0 }
 0xff7   :  { %v8683_v24 = vpop.f32.mrb[71].mxu0 }
 0xffa   :  { %v6241_v45 = vpop.f32.mrb[72].mxu0 }
 0xffb   :  { %v8693_v51 = vpop.f32.mrb[73].mxu0 }
 0xffe   :  { %v6387_v12 = vpop.f32.mrb[74].mxu0 }
 0xfff   :  { %v6168_v11 = vpop.f32.mrb[82].mxu1  ;;  %v8703_v43 = vpop.f32.mrb[75].mxu0 }
0x1000   :  { %v8818_v40 = vpack.i.bf16 %v6168_v11, %v6095_v3  ;;  %v8688_v57 = vpop.f32.mrb[83].mxu1 }
0x1002   :  { %8819 = vrot.lane.b32.xlu1 %v8818_v40, %s9360_s27  ;;  %v6533_v14 = vpop.f32.mrb[76].mxu0 }
0x1003   :  { %v6314_v6 = vpop.f32.mrb[84].mxu1  ;;  %v8713_v10 = vpop.f32.mrb[77].mxu0 }
0x1004   :  { %v8823_v17 = vpack.i.bf16 %v6314_v6, %v6241_v45  ;;  %v8698_v30 = vpop.f32.mrb[85].mxu1 }
0x1006   :  { %8824 = vrot.lane.b32.xlu0 %v8823_v17, %s9349_s19  ;;  %v6679_v49 = vpop.f32.mrb[78].mxu0 }
0x1007   :  { %v6460_v35 = vpop.f32.mrb[86].mxu1  ;;  %v8723_v22 = vpop.f32.mrb[79].mxu0 }
0x1008   :  { %v8828_v13 = vpack.i.bf16 %v6460_v35, %v6387_v12  ;;  %v8708_v34 = vpop.f32.mrb[87].mxu1  ;;  %v10779_v22 = vld [vmem:[%s10916_s6 + $0x20] sm:$0xff] }
0x100a   :  { %8829 = vrot.lane.b32.xlu1 %v8828_v13, %s9349_s19 }
0x100b   :  { %v6606_v42 = vpop.f32.mrb[88].mxu1 }
0x100c   :  { %v8833_v9 = vpack.i.bf16 %v6606_v42, %v6533_v14  ;;  %v8718_v25 = vpop.f32.mrb[89].mxu1 }
0x100e   :  { %8834 = vrot.lane.b32.xlu0 %v8833_v9, %s9359_s26 }
0x1040   :  { %v6752_v1 = vpop.f32.mrb[90].mxu1 }
0x1041   :  { %v8838_v19 = vpack.i.bf16 %v6752_v1, %v6679_v49  ;;  %v8728_v58 = vpop.f32.mrb[91].mxu1  ;;  %v8963_v1 = vld [vmem:[#allocation2 + $0x80] ss:$8 sps:$4 sm:$0xff]  }
0x1042   :  { %v8968_v58 = vld [vmem:[#allocation2 + $0x94] ss:$8 sps:$4 sm:$0xff]  }
0x1043   :  { %8839 = vrot.lane.b32.xlu1 %v8838_v19, %s9359_s26  ;;  %v8965_v19 = vld [vmem:[#allocation2 + $0x84] ss:$8 sps:$4 sm:$0xff]  }
0x1044   :  { %7107 = vmatprep.subr.bf16.mxu1 %v8965_v19 }
0x1045   :  { %7108 = vmatpush1.bf16.msra.mxu1 %v8963_v1 }
0x1046   :  { %7109 = vmatprep.subr.bf16.mxu1 %v8968_v58 }
0x1064   :  { %v8815_v26 = vpop.permute.xlu0 %8814 }
0x1065   :  { %v8817_v52 = vunpack.i.h.bf16 %v8815_v26  ;;  %v8816_v32 = vunpack.i.l.bf16 %v8815_v26  ;;  %v8966_v26 = vld [vmem:[#allocation2 + $0x90] ss:$8 sps:$4 sm:$0xff]  }
0x1066   :  { %7110 = vmatpush1.bf16.msra.mxu1 %v8966_v26 }
0x1067   :  { %v6805_v46 = vsel %vm580_vm1, %v10726_v29, %v8817_v52  ;;  %v6804_v60 = vsel %vm580_vm1, %v10722_v55, %v8816_v32 }
0x1074   :  { %v8820_v12 = vpop.permute.xlu1 %8819 }
0x1075   :  { %v8822_v43 = vunpack.i.h.bf16 %v8820_v12  ;;  %v8821_v40 = vunpack.i.l.bf16 %v8820_v12  ;;  %v8972_v12 = vld [vmem:[#allocation2 + $0xb0] ss:$8 sps:$4 sm:$0xff]  }
0x1077   :  { %v6807_v55 = vsel %vm580_vm1, %v10728_v38, %v8822_v43  ;;  %v6806_v6 = vsel %vm580_vm1, %v10724_v62, %v8821_v40  ;;  %v6838_v62 = vrot.slane %v10779_v22, %v10101_v37  ;;  %v8975_v43 = vld [vmem:[#allocation2 + $0xc0] ss:$8 sps:$4 sm:$0xff]   ;;  %v8978_v40 = vld [vmem:[#allocation2 + $0xd0] ss:$8 sps:$4 sm:$0xff]  }
0x1078   :  { %v8825_v50 = vpop.permute.xlu0 %8824 }
0x1079   :  { %v8827_v16 = vunpack.i.h.bf16 %v8825_v50  ;;  %v8826_v63 = vunpack.i.l.bf16 %v8825_v50 }
0x107b   :  { %v6808_v4 = vsel %vm3162_vm3, %v6804_v60, %v8826_v63  ;;  %v6809_v3 = vsel %vm3162_vm3, %v6805_v46, %v8827_v16 }
0x107c   :  { %v8830_v11 = vpop.permute.xlu1 %8829 }
0x107d   :  { %v8832_v29 = vunpack.i.h.bf16 %v8830_v11  ;;  %v8831_v57 = vunpack.i.l.bf16 %v8830_v11  ;;  %v8977_v11 = vld [vmem:[#allocation2 + $0xc4] ss:$8 sps:$4 sm:$0xff]  }
0x107f   :  { %v6811_v30 = vsel %vm3162_vm3, %v6807_v55, %v8832_v29  ;;  %v6810_v49 = vsel %vm3162_vm3, %v6806_v6, %v8831_v57  ;;  %v8980_v29 = vld [vmem:[#allocation2 + $0xd4] ss:$8 sps:$4 sm:$0xff]   ;;  %v8983_v57 = vld [vmem:[#allocation2 + $0xe4] ss:$8 sps:$4 sm:$0xff]   ;;  %v8984_v6 = vld [vmem:[#allocation2 + $0xf0] ss:$8 sps:$4 sm:$0xff]  }
0x1080   :  { %v8835_v15 = vpop.permute.xlu0 %8834  ;;  %v8986_v55 = vld [vmem:[#allocation2 + $0xf4] ss:$8 sps:$4 sm:$0xff]  }
0x1081   :  { %v8837_v5 = vunpack.i.h.bf16 %v8835_v15  ;;  %v8836_v27 = vunpack.i.l.bf16 %v8835_v15 }
0x1083   :  { %v6812_v24 = vsel %vm3167_vm4, %v6808_v4, %v8836_v27  ;;  %v6813_v45 = vsel %vm3167_vm4, %v6809_v3, %v8837_v5 }
0x1084   :  { %v6816_v51 = vpack.c.bf16 %v6813_v45, %v6812_v24  ;;  %v8971_v24 = vld [vmem:[#allocation2 + $0xa4] ss:$8 sps:$4 sm:$0xff]   ;;  %v8969_v45 = vld [vmem:[#allocation2 + $0xa0] ss:$8 sps:$4 sm:$0xff]  }
0x1085   :  { %7111 = vmatprep.subr.bf16.mxu1 %v8971_v24  ;;  %v8998_v24 = vld [vmem:[#allocation5 + $0xa8] sm:$0xff]  }
0x1086   :  { %8745 = vmatprep.mubr.bf16.mxu0 %v6816_v51  ;;  %7112 = vmatpush1.bf16.msra.mxu1 %v8969_v45  ;;  %v8974_v51 = vld [vmem:[#allocation2 + $0xb4] ss:$8 sps:$4 sm:$0xff]  }
0x1087   :  { %7113 = vmatprep.subr.bf16.mxu1 %v8974_v51  ;;  %v8999_v45 = vld [vmem:[#allocation5 + $0xf0] sm:$0xff]  }
0x1088   :  { %v9000_v51 = vld [vmem:[#allocation5 + $0xb0] sm:$0xff]  }
0x108a   :  { %7114 = vmatpush1.bf16.msra.mxu1 %v8972_v12  ;;  %v9001_v12 = vld [vmem:[#allocation5 + $0xf8] sm:$0xff]  }
0x108b   :  { %7115 = vmatprep.subr.bf16.mxu1 %v8977_v11  ;;  %v9002_v11 = vld [vmem:[#allocation5 + $0xb8] sm:$0xff]  }
0x108e   :  { %7116 = vmatpush1.bf16.msra.mxu1 %v8975_v43  ;;  %v7908_v43 = vld [vmem:[%s10916_s6 + $0x28] sm:$0xff] }
0x108f   :  { %7117 = vmatprep.subr.bf16.mxu1 %v8980_v29  ;;  %v7026_v29 = vrot.slane %v7908_v43, %v10138_v23 }
0x1092   :  { %7118 = vmatpush1.bf16.msra.mxu1 %v8978_v40  ;;  %v7022_v40 = vrot.slane %v10779_v22, %v10138_v23 }
0x1093   :  { %7119 = vmatprep.subr.bf16.mxu1 %v8983_v57 }
0x10b5   :  { %v8840_v14 = vpop.permute.xlu1 %8839 }
0x10b6   :  { %v8842_v10 = vunpack.i.h.bf16 %v8840_v14  ;;  %v8841_v17 = vunpack.i.l.bf16 %v8840_v14  ;;  %v8981_v14 = vld [vmem:[#allocation2 + $0xe0] ss:$8 sps:$4 sm:$0xff]  }
0x10b7   :  { %7120 = vmatpush1.bf16.msra.mxu1 %v8981_v14 }
0x10b8   :  { %v6815_v44 = vsel %vm3167_vm4, %v6811_v30, %v8842_v10  ;;  %v6814_v28 = vsel %vm3167_vm4, %v6810_v49, %v8841_v17  ;;  %7121 = vmatprep.subr.bf16.mxu1 %v8986_v55 }
0x10b9   :  { %v6817_v35 = vpack.c.bf16 %v6815_v44, %v6814_v28 }
0x10bb   :  { %8746 = vmatmul.mubr.bf16.vlgmr.msra.gmra.mrb[80].mxu0 %v6817_v35  ;;  %7122 = vmatpush1.bf16.msra.mxu1 %v8984_v6 }
0x118e   :  { %v8747_v38 = vpop.f32.mrb[80].mxu0 }
0x118f   :  { %v6921_v13 = vpop.f32.mrb[81].mxu0  ;;  %v6930_v9 = vadd.f32 %v8747_v38, %v6838_v62 }
0x1190   :  { %v6922_v34 = vadd.f32 %v6921_v13, %v6838_v62  ;;  %v8748_v31 = vpop.f32.mrb[82].mxu0 }
0x1191   :  { %v6924_v42 = vpop.f32.mrb[83].mxu0  ;;  %v6938_v8 = vadd.f32 %v6930_v9, %v10282_v2  ;;  %v6933_v48 = vadd.f32 %v8748_v31, %v6838_v62 }
0x1192   :  { %v6936_v25 = vadd.f32 %v6922_v34, %v10267_v61  ;;  %v6925_v41 = vadd.f32 %v6924_v42, %v6838_v62  ;;  %v6987_v42 = vrot.slane %v10779_v22, %v3341_v36 }
0x1193   :  { %v6939_v21 = vadd.f32 %v6933_v48, %v10284_v54  ;;  %v6995_v48 = vrot.slane %v10779_v22, %v3349_v20 }
0x1194   :  { %v6937_v33 = vadd.f32 %v6925_v41, %v10269_v53  ;;  %6940 = vadd.xlane.f32.xlu0 %v6936_v25 }
0x1196   :  { %6942 = vadd.xlane.f32.xlu1 %v6937_v33 }
0x1198   :  { %6944 = vadd.xlane.f32.xlu0 %v6938_v8 }
0x119c   :  { %6946 = vadd.xlane.f32.xlu0 %v6939_v21 }
0x1221   :  { %v6941_v61 = vpop.xlane.xlu0 %6940 }
0x1222   :  { %v6948_v50 = vmul.f32 0.0078125, %v6941_v61 }
0x1223   :  { %v6943_v53 = vpop.xlane.xlu1 %6942 }
0x1224   :  { %v6952_v52 = vsub.f32 %v6936_v25, %v6948_v50  ;;  %v6949_v32 = vmul.f32 0.0078125, %v6943_v53 }
0x1225   :  { %v6945_v2 = vpop.xlane.xlu0 %6944 }
0x1226   :  { %v6953_v16 = vsub.f32 %v6937_v33, %v6949_v32  ;;  %v6950_v63 = vmul.f32 0.0078125, %v6945_v2  ;;  %v6956_v15 = vmul.f32 %v6952_v52, %v6952_v52 }
0x1228   :  { %v6954_v46 = vsub.f32 %v6938_v8, %v6950_v63  ;;  %6960 = vadd.xlane.f32.xlu0 %v6956_v15  ;;  %v6957_v54 = vmul.f32 %v6953_v16, %v6953_v16  ;;  %v8988_v63 = vld [vmem:[#allocation5 + $0x80] sm:$0xff]   ;;  %v8989_v15 = vld [vmem:[#allocation5 + $0xc8] sm:$0xff]  }
0x1229   :  { %v6947_v60 = vpop.xlane.xlu0 %6946 }
0x122a   :  { %v6951_v5 = vmul.f32 0.0078125, %v6947_v60  ;;  %6962 = vadd.xlane.f32.xlu1 %v6957_v54  ;;  %v6958_v27 = vmul.f32 %v6954_v46, %v6954_v46  ;;  %v8991_v54 = vld [vmem:[#allocation5 + $0xd0] sm:$0xff]  }
0x122b   :  { %v8992_v60 = vld [vmem:[#allocation5 + $0x90] sm:$0xff]  }
0x122c   :  { %v6955_v4 = vsub.f32 %v6939_v21, %v6951_v5  ;;  %6964 = vadd.xlane.f32.xlu0 %v6958_v27  ;;  %v8994_v5 = vld [vmem:[#allocation5 + $0x98] sm:$0xff]   ;;  %v8995_v27 = vld [vmem:[#allocation5 + $0xe0] sm:$0xff]  }
0x122e   :  { %v6959_v3 = vmul.f32 %v6955_v4, %v6955_v4 }
0x1230   :  { %6966 = vadd.xlane.f32.xlu1 %v6959_v3  ;;  %v8997_v3 = vld [vmem:[#allocation5 + $0xe8] sm:$0xff]  }
0x12b5   :  { %v6961_v10 = vpop.xlane.xlu0 %6960 }
0x12b6   :  { %v6968_v17 = vmul.f32 0.0078125, %v6961_v10 }
0x12b7   :  { %v6963_v30 = vpop.xlane.xlu1 %6962 }
0x12b8   :  { %v6972_v49 = vadd.f32 1e-12, %v6968_v17  ;;  %v6969_v44 = vmul.f32 0.0078125, %v6963_v30 }
0x12b9   :  { %v6965_v28 = vpop.xlane.xlu0 %6964 }
0x12ba   :  { %9195 = vrsqrt.f32 %v6972_v49  ;;  %v6973_v35 = vadd.f32 1e-12, %v6969_v44  ;;  %v6970_v62 = vmul.f32 0.0078125, %v6965_v28 }
0x12bc   :  { %9197 = vrsqrt.f32 %v6973_v35  ;;  %v6974_v38 = vadd.f32 1e-12, %v6970_v62 }
0x12bd   :  { %v6967_v13 = vpop.xlane.xlu1 %6966 }
0x12be   :  { %9199 = vrsqrt.f32 %v6974_v38  ;;  %v6971_v34 = vmul.f32 0.0078125, %v6967_v13 }
0x12c0   :  { %v6975_v31 = vadd.f32 1e-12, %v6971_v34 }
0x12c2   :  { %9201 = vrsqrt.f32 %v6975_v31 }
0x12c4   :  { %v9196_v9 = vpop.eup %9195 }
0x12c5   :  { %v6980_v25 = vmul.f32 %v9196_v9, %v6952_v52 }
0x12c6   :  { %v9198_v41 = vpop.eup %9197 }
0x12c7   :  { %v6981_v33 = vmul.f32 %v9198_v41, %v6953_v16  ;;  %v6988_v8 = vmul.f32 %v6987_v42, %v6980_v25  ;;  %v8987_v16 = vld [vmem:[#allocation5 + $0xc0] sm:$0xff]  }
0x12c8   :  { %v9200_v21 = vpop.eup %9199  ;;  %8290 = vmatprep.subr.bf16.mxu0 %v8987_v16 }
0x12c9   :  { %v6989_v1 = vmul.f32 %v6987_v42, %v6981_v33  ;;  %v10793_v19 = vadd.f32 %v6995_v48, %v6988_v8  ;;  %v6982_v26 = vmul.f32 %v9200_v21, %v6954_v46  ;;  %8291 = vmatpush3.bf16.msra.mxu0 %v8988_v63  ;;  %v8990_v46 = vld [vmem:[#allocation5 + $0x88] sm:$0xff]  }
0x12ca   :  { %8292 = vmatprep.subr.bf16.mxu0 %v8989_v15 }
0x12cb   :  { %v10795_v58 = vadd.f32 %v6995_v48, %v6989_v1  ;;  %v6990_v53 = vmul.f32 %v6987_v42, %v6982_v26 }
0x12cc   :  { %v9202_v61 = vpop.eup %9201 }
0x12cd   :  { %v7000_v36 = vpack.c.bf16 %v10795_v58, %v10793_v19  ;;  %v6983_v50 = vmul.f32 %v9202_v61, %v6955_v4  ;;  %v10802_v20 = vadd.f32 %v6995_v48, %v6990_v53  ;;  %8293 = vmatpush3.bf16.msra.mxu0 %v8990_v46  ;;  %v8996_v4 = vld [vmem:[#allocation5 + $0xa0] sm:$0xff]  }
0x12ce   :  { %8294 = vmatprep.subr.bf16.mxu0 %v8991_v54 }
0x12cf   :  { %7140 = vmatmul.mubr.bf16.vlgmr.msra.gmra.mrb[92].mxu1 %v7000_v36  ;;  %v6991_v52 = vmul.f32 %v6987_v42, %v6983_v50 }
0x12d0   :  { %7149 = vmatprep.mubr.bf16.mxu1 %v9356_v39  ;;  %v8993_v39 = vld [vmem:[#allocation5 + $0xd8] sm:$0xff]  }
0x12d1   :  { %v10800_v32 = vadd.f32 %v6995_v48, %v6991_v52  ;;  %8295 = vmatpush3.bf16.msra.mxu0 %v8992_v60 }
0x12d2   :  { %8296 = vmatprep.subr.bf16.mxu0 %v8993_v39 }
0x12d3   :  { %v7001_v2 = vpack.c.bf16 %v10800_v32, %v10802_v20 }
0x12d5   :  { %8297 = vmatpush3.bf16.msra.mxu0 %v8994_v5 }
0x12d6   :  { %8298 = vmatprep.subr.bf16.mxu0 %v8995_v27 }
0x12d7   :  { %7150 = vmatmul.mubr.bf16.gmra.mrb[96].mxu1 %v7001_v2 }
0x12d9   :  { %8299 = vmatpush3.bf16.msra.mxu0 %v8996_v4 }
0x12da   :  { %8300 = vmatprep.subr.bf16.mxu0 %v8997_v3 }
0x12dd   :  { %8301 = vmatpush3.bf16.msra.mxu0 %v8998_v24 }
0x12de   :  { %8302 = vmatprep.subr.bf16.mxu0 %v8999_v45 }
0x12e1   :  { %8303 = vmatpush3.bf16.msra.mxu0 %v9000_v51 }
0x12e2   :  { %8304 = vmatprep.subr.bf16.mxu0 %v9001_v12 }
0x12e5   :  { %8305 = vmatpush3.bf16.msra.mxu0 %v9002_v11 }
0x12e6   :  { %8749 = vmatprep.subr.bf16.mxu0 %v9357_v18 }
0x13a2   :  { %v7141_v57 = vpop.f32.mrb[92].mxu1 }
0x13a3   :  { %v10813_v14 = vadd.f32 %v7141_v57, %v7022_v40  ;;  %v7143_v55 = vpop.f32.mrb[93].mxu1 }
0x13a4   :  { %v10815_v6 = vadd.f32 %v7143_v55, %v7026_v29  ;;  %v7145_v10 = vpop.f32.mrb[94].mxu1 }
0x13a5   :  { %v7168_v17 = vmul.f32 0.044715, %v10813_v14  ;;  %v10818_v30 = vadd.f32 %v7145_v10, %v7022_v40  ;;  %v7147_v49 = vpop.f32.mrb[95].mxu1 }
0x13a6   :  { %v7169_v44 = vmul.f32 0.044715, %v10815_v6  ;;  %v10821_v28 = vadd.f32 %v7147_v49, %v7026_v29 }
0x13a7   :  { %v7176_v35 = vmul.f32 %v7168_v17, %v10813_v14  ;;  %v7170_v23 = vmul.f32 0.044715, %v10818_v30 }
0x13a8   :  { %v7177_v62 = vmul.f32 %v7169_v44, %v10815_v6  ;;  %v7171_v38 = vmul.f32 0.044715, %v10821_v28 }
0x13a9   :  { %v7184_v13 = vmul.f32 %v7176_v35, %v10813_v14  ;;  %v7178_v34 = vmul.f32 %v7170_v23, %v10818_v30 }
0x13aa   :  { %v7185_v31 = vmul.f32 %v7177_v62, %v10815_v6  ;;  %v7179_v42 = vmul.f32 %v7171_v38, %v10821_v28  ;;  %v7151_v9 = vpop.f32.mrb[96].mxu1 }
0x13ab   :  { %v7192_v25 = vadd.f32 %v7184_v13, %v10813_v14  ;;  %v7186_v41 = vmul.f32 %v7178_v34, %v10818_v30  ;;  %v10833_v33 = vadd.f32 %v7151_v9, %v7022_v40  ;;  %v7153_v8 = vpop.f32.mrb[97].mxu1  ;;  %v7160_v13 = vmul.f32 0.5, %v10813_v14 }
0x13ac   :  { %v7187_v48 = vmul.f32 %v7179_v42, %v10821_v28  ;;  %v10836_v21 = vadd.f32 %v7153_v8, %v7026_v29  ;;  %v7155_v1 = vpop.f32.mrb[98].mxu1  ;;  %v7193_v26 = vadd.f32 %v7185_v31, %v10815_v6  ;;  %v7162_v34 = vmul.f32 0.5, %v10818_v30 }
0x13ad   :  { %v7200_v61 = vmul.f32 0.7978846, %v7192_v25  ;;  %v7194_v36 = vadd.f32 %v7186_v41, %v10818_v30  ;;  %v7172_v50 = vmul.f32 0.044715, %v10833_v33  ;;  %v7156_v53 = vadd.f32 %v7155_v1, %v7022_v40  ;;  %v7157_v52 = vpop.f32.mrb[99].mxu1 }
0x13ae   :  { %v7173_v2 = vmul.f32 0.044715, %v10836_v21  ;;  %v7158_v16 = vadd.f32 %v7157_v52, %v7026_v29  ;;  %v7195_v63 = vadd.f32 %v7187_v48, %v10821_v28  ;;  %v7201_v15 = vmul.f32 0.7978846, %v7193_v26 }
0x13af   :  { %9203 = vtanh.f32 %v7200_v61  ;;  %v7202_v46 = vmul.f32 0.7978846, %v7194_v36  ;;  %v7180_v54 = vmul.f32 %v7172_v50, %v10833_v33  ;;  %v7174_v60 = vmul.f32 0.044715, %v7156_v53 }
0x13b0   :  { %v7181_v39 = vmul.f32 %v7173_v2, %v10836_v21  ;;  %v7175_v5 = vmul.f32 0.044715, %v7158_v16  ;;  %v7203_v27 = vmul.f32 0.7978846, %v7195_v63  ;;  %9205 = vtanh.f32 %v7201_v15 }
0x13b1   :  { %9207 = vtanh.f32 %v7202_v46  ;;  %v7188_v4 = vmul.f32 %v7180_v54, %v10833_v33  ;;  %v7182_v3 = vmul.f32 %v7174_v60, %v7156_v53  ;;  %v7161_v42 = vmul.f32 0.5, %v10815_v6 }
0x13b2   :  { %v7189_v24 = vmul.f32 %v7181_v39, %v10836_v21  ;;  %v7183_v45 = vmul.f32 %v7175_v5, %v7158_v16  ;;  %9209 = vtanh.f32 %v7203_v27  ;;  %v7163_v9 = vmul.f32 0.5, %v10821_v28 }
0x13b3   :  { %v7190_v51 = vmul.f32 %v7182_v3, %v7156_v53  ;;  %v7196_v12 = vadd.f32 %v7188_v4, %v10833_v33  ;;  %v7164_v30 = vmul.f32 0.5, %v10833_v33  ;;  %v7166_v6 = vmul.f32 0.5, %v7156_v53 }
0x13b4   :  { %v7191_v11 = vmul.f32 %v7183_v45, %v7158_v16  ;;  %v7197_v43 = vadd.f32 %v7189_v24, %v10836_v21  ;;  %v7165_v28 = vmul.f32 0.5, %v10836_v21  ;;  %v7167_v46 = vmul.f32 0.5, %v7158_v16 }
0x13b5   :  { %v7198_v40 = vadd.f32 %v7190_v51, %v7156_v53  ;;  %v7204_v29 = vmul.f32 0.7978846, %v7196_v12  ;;  %v7272_v21 = vrot.slane %v10779_v22, %v3624_v7 }
0x13b6   :  { %v7199_v57 = vadd.f32 %v7191_v11, %v7158_v16  ;;  %v7205_v55 = vmul.f32 0.7978846, %v7197_v43 }
0x13b7   :  { %v7206_v10 = vmul.f32 0.7978846, %v7198_v40  ;;  %9211 = vtanh.f32 %v7204_v29 }
0x13b8   :  { %v7207_v17 = vmul.f32 0.7978846, %v7199_v57  ;;  %9213 = vtanh.f32 %v7205_v55 }
0x13b9   :  { %v9204_v49 = vpop.eup %9203  ;;  %9215 = vtanh.f32 %v7206_v10 }
0x13ba   :  { %v9206_v44 = vpop.eup %9205  ;;  %v7216_v35 = vadd.f32 1.0, %v9204_v49  ;;  %9217 = vtanh.f32 %v7207_v17 }
0x13bb   :  { %v9208_v23 = vpop.eup %9207  ;;  %v7217_v62 = vadd.f32 1.0, %v9206_v44 }
0x13bc   :  { %v9210_v38 = vpop.eup %9209  ;;  %v7218_v31 = vadd.f32 1.0, %v9208_v23  ;;  %v7224_v41 = vmul.f32 %v7216_v35, %v7160_v13 }
0x13bd   :  { %v7219_v25 = vadd.f32 1.0, %v9210_v38  ;;  %v7225_v48 = vmul.f32 %v7217_v62, %v7161_v42 }
0x13be   :  { %v7226_v8 = vmul.f32 %v7218_v31, %v7162_v34 }
0x13bf   :  { %v7227_v1 = vmul.f32 %v7219_v25, %v7163_v9 }
0x13c0   :  { %v7232_v26 = vpack.c.bf16 %v7226_v8, %v7224_v41 }
0x13c1   :  { %v9212_v61 = vpop.eup %9211  ;;  %v7233_v36 = vpack.c.bf16 %v7227_v1, %v7225_v48  ;;  %v9003_v48 = vld [vmem:[#allocation7 + $0x40] sm:$0xff]  }
0x13c2   :  { %v9214_v50 = vpop.eup %9213  ;;  %v7220_v52 = vadd.f32 1.0, %v9212_v61  ;;  %v9004_v1 = vld [vmem:[#allocation7] sm:$0xff]   ;;  %8318 = vmatprep.subr.bf16.mxu1 %v9003_v48  ;;  %v9006_v61 = vld [vmem:[#allocation7 + $0x8] sm:$0xff]  }
0x13c3   :  { %v9216_v2 = vpop.eup %9215  ;;  %7401 = vmatprep.mubr.bf16.mxu0 %v7233_v36  ;;  %v7221_v14 = vadd.f32 1.0, %v9214_v50  ;;  %8319 = vmatpush3.bf16.msra.mxu1 %v9004_v1  ;;  %v9007_v36 = vld [vmem:[#allocation7 + $0x50] sm:$0xff]   ;;  %v9229_v1 = vld [vmem:[#allocation8] sm:$0xf] }
0x13c4   :  { %v9218_v63 = vpop.eup %9217  ;;  %7402 = vmatmul.mubr.bf16.vlgmr.msra.gmra.mrb[84].mxu0 %v7232_v26  ;;  %v7222_v15 = vadd.f32 1.0, %v9216_v2  ;;  %v7228_v60 = vmul.f32 %v7220_v52, %v7164_v30  ;;  %v9005_v26 = vld [vmem:[#allocation7 + $0x48] sm:$0xff]   ;;  %v9008_v50 = vld [vmem:[#allocation7 + $0x10] sm:$0xff]   ;;  %v9009_v52 = vld [vmem:[#allocation7 + $0x58] sm:$0xff]  }
0x13c5   :  { %v7223_v54 = vadd.f32 1.0, %v9218_v63  ;;  %v7229_v5 = vmul.f32 %v7221_v14, %v7165_v28  ;;  %8320 = vmatprep.subr.bf16.mxu1 %v9005_v26  ;;  %v9010_v2 = vld [vmem:[#allocation7 + $0x18] sm:$0xff]   ;;  %v9011_v14 = vld [vmem:[#allocation7 + $0x60] sm:$0xff]   ;;  %v9013_v30 = vld [vmem:[#allocation7 + $0x68] sm:$0xff]   ;;  %v7546_v26 = vrot.slane %v9229_v1, %v9650_v47 }
0x13c6   :  { %v7230_v39 = vmul.f32 %v7222_v15, %v7166_v6  ;;  %v9012_v63 = vld [vmem:[#allocation7 + $0x20] sm:$0xff]   ;;  %v9014_v6 = vld [vmem:[#allocation7 + $0x28] sm:$0xff]   ;;  %v9015_v15 = vld [vmem:[#allocation7 + $0x70] sm:$0xff]  }
0x13c7   :  { %v7231_v27 = vmul.f32 %v7223_v54, %v7167_v46  ;;  %8321 = vmatpush3.bf16.msra.mxu1 %v9006_v61  ;;  %v9016_v28 = vld [vmem:[#allocation7 + $0x30] sm:$0xff]   ;;  %v9017_v46 = vld [vmem:[#allocation7 + $0x78] sm:$0xff]  }
0x13c8   :  { %v7234_v4 = vpack.c.bf16 %v7230_v39, %v7228_v60  ;;  %8322 = vmatprep.subr.bf16.mxu1 %v9007_v36  ;;  %v9018_v54 = vld [vmem:[#allocation7 + $0x38] sm:$0xff]   ;;  %v9019_v60 = vld [vmem:[#allocation7 + $0x80] sm:$0xff]   ;;  %v9020_v39 = vld [vmem:[#allocation7 + $0x88] sm:$0xff]  }
0x13c9   :  { %v7235_v3 = vpack.c.bf16 %v7231_v27, %v7229_v5  ;;  %8750 = vmatpush3.bf16.msra.mxu0 %v9019_v60  ;;  %v9021_v5 = vld [vmem:[#allocation7 + $0x90] sm:$0xff]   ;;  %v9022_v27 = vld [vmem:[#allocation7 + $0x98] sm:$0xff]  }
0x13ca   :  { %8751 = vmatprep.subr.bf16.mxu0 %v9357_v18 }
0x13cb   :  { %7409 = vmatprep.mubr.bf16.mxu0 %v7235_v3  ;;  %8323 = vmatpush3.bf16.msra.mxu1 %v9008_v50  ;;  %v9024_v3 = vld [vmem:[#allocation7 + $0xa8] sm:$0xff]  }
0x13cc   :  { %7410 = vmatmul.mubr.bf16.gmra.mrb[88].mxu0 %v7234_v4  ;;  %8324 = vmatprep.subr.bf16.mxu1 %v9009_v52  ;;  %v9023_v4 = vld [vmem:[#allocation7 + $0xa0] sm:$0xff]  }
0x13cd   :  { %8765 = vmatprep.mubr.msk.bf16.mxu0 %vm9358_vm0, %v9357_v18  ;;  %8752 = vmatpush3.bf16.msra.mxu0 %v9020_v39 }
0x13ce   :  { %8753 = vmatprep.subr.bf16.mxu0 %v9357_v18 }
0x13cf   :  { %8325 = vmatpush3.bf16.msra.mxu1 %v9010_v2 }
0x13d0   :  { %8326 = vmatprep.subr.bf16.mxu1 %v9011_v14 }
0x13d1   :  { %8754 = vmatpush3.bf16.msra.mxu0 %v9021_v5 }
0x13d2   :  { %8755 = vmatprep.subr.bf16.mxu0 %v9357_v18 }
0x13d3   :  { %8327 = vmatpush3.bf16.msra.mxu1 %v9012_v63 }
0x13d4   :  { %8328 = vmatprep.subr.bf16.mxu1 %v9013_v30  ;;  %v7688_v30 = vrot.slane %v9229_v1, %v10101_v37 }
0x13d5   :  { %8756 = vmatpush3.bf16.msra.mxu0 %v9022_v27 }
0x13d6   :  { %8757 = vmatprep.subr.bf16.mxu0 %v9357_v18 }
0x13d7   :  { %8329 = vmatpush3.bf16.msra.mxu1 %v9014_v6 }
0x13d8   :  { %8330 = vmatprep.subr.bf16.mxu1 %v9015_v15 }
0x13d9   :  { %8758 = vmatpush3.bf16.msra.mxu0 %v9023_v4 }
0x13da   :  { %8759 = vmatprep.subr.bf16.mxu0 %v9357_v18 }
0x13db   :  { %8331 = vmatpush3.bf16.msra.mxu1 %v9016_v28 }
0x13dc   :  { %8332 = vmatprep.subr.bf16.mxu1 %v9017_v46 }
0x13dd   :  { %8760 = vmatpush3.bf16.msra.mxu0 %v9024_v3 }
0x13de   :  { %8761 = vmatprep.subr.bf16.mxu0 %v9357_v18 }
0x13df   :  { %8333 = vmatpush3.bf16.msra.mxu1 %v9018_v54 }
0x1497   :  { %v8306_v24 = vpop.f32.mrb[84].mxu0 }
0x1498   :  { %v8307_v45 = vpop.f32.mrb[85].mxu0 }
0x1499   :  { %v8308_v33 = vadd.f32 %v8307_v45, %v8306_v24  ;;  %v8309_v53 = vpop.f32.mrb[86].mxu0 }
0x149a   :  { %v8310_v51 = vpop.f32.mrb[87].mxu0 }
0x149b   :  { %v8311_v16 = vadd.f32 %v8310_v51, %v8309_v53  ;;  %v7404_v11 = vadd.f32 %v8308_v33, %v7272_v21 }
0x149d   :  { %v7407_v12 = vadd.f32 %v8311_v16, %v7272_v21  ;;  %v7418_v49 = vadd.f32 %v7404_v11, %v10793_v19 }
0x149f   :  { %v8312_v43 = vpop.f32.mrb[88].mxu0  ;;  %v7419_v40 = vadd.f32 %v7407_v12, %v10795_v58 }
0x14a0   :  { %v8313_v29 = vpop.f32.mrb[89].mxu0 }
0x14a1   :  { %v8314_v57 = vadd.f32 %v8313_v29, %v8312_v43  ;;  %7424 = vadd.xlane.f32.xlu1 %v7419_v40  ;;  %v8315_v55 = vpop.f32.mrb[90].mxu0 }
0x14a2   :  { %v8316_v10 = vpop.f32.mrb[91].mxu0 }
0x14a3   :  { %v8317_v17 = vadd.f32 %v8316_v10, %v8315_v55  ;;  %v7412_v35 = vadd.f32 %v8314_v57, %v7272_v21  ;;  %v7909_v55 = vld [vmem:[%s10916_s6 + $0x30] sm:$0x3]  ;;  %s9361_s6 = smov [#allocation10]  }
0x14a4   :  { %s7784_s4 = sshll.u32 %s9361_s6, 4  ;;  %s7785_s4 = int_to_ptr.vmem [resolvable:$true] %s7784_s4 }
0x14a5   :  { %v7415_v44 = vadd.f32 %v8317_v17, %v7272_v21  ;;  %7422 = vadd.xlane.f32.xlu1 %v7418_v49  ;;  %v7420_v7 = vadd.f32 %v7412_v35, %v10802_v20  ;;  %v7469_v17 = vrot.slane %v7909_v55, %v9570_v59  ;;  %s9318_s24 = scalar_lea.vmem %s7785_s4, 32  ;;  %p9323_p5 = scmp.lt.s32.totalorder %s7785_s4, %s7785_s4 }
0x14a6   :  { %p9319_p4 = scmp.ne.s32.totalorder %s7785_s4, %s9318_s24  ;;  %p9324_p6 = scmp.lt.s32.totalorder %s9318_s24, %s9318_s24 }
0x14a7   :  { %v7421_v56 = vadd.f32 %v7415_v44, %v10800_v32 }
0x14a8   :  { %p9325_p7 = por %p9324_p6, %p9323_p5 }
0x14a9   :  { %7428 = vadd.xlane.f32.xlu0 %v7421_v56 }
0x14aa   :  { %p9326_p8 = pnand %p9325_p7, %p9319_p4 }
0x14ad   :  { %7426 = vadd.xlane.f32.xlu0 %v7420_v7 }
0x152e   :  { %v7425_v22 = vpop.xlane.xlu1 %7424 }
0x152f   :  { %v7431_v23 = vmul.f32 0.0078125, %v7425_v22 }
0x1531   :  { %v10864_v58 = vsub.f32 %v7419_v40, %v7431_v23 }
0x1532   :  { %v7423_v62 = vpop.xlane.xlu1 %7422 }
0x1533   :  { %v7430_v38 = vmul.f32 0.0078125, %v7423_v62  ;;  %v7439_v13 = vmul.f32 %v10864_v58, %v10864_v58 }
0x1535   :  { %v10868_v34 = vsub.f32 %v7418_v49, %v7430_v38  ;;  %7444 = vadd.xlane.f32.xlu1 %v7439_v13 }
0x1536   :  { %v7429_v19 = vpop.xlane.xlu0 %7428 }
0x1537   :  { %v7433_v31 = vmul.f32 0.0078125, %v7429_v19  ;;  %v7438_v32 = vmul.f32 %v10868_v34, %v10868_v34 }
0x1539   :  { %v10872_v42 = vsub.f32 %v7421_v56, %v7433_v31  ;;  %7442 = vadd.xlane.f32.xlu1 %v7438_v32 }
0x153a   :  { %v7427_v20 = vpop.xlane.xlu0 %7426 }
0x153b   :  { %v7432_v9 = vmul.f32 0.0078125, %v7427_v20  ;;  %v7441_v25 = vmul.f32 %v10872_v42, %v10872_v42 }
0x153d   :  { %v10876_v41 = vsub.f32 %v7420_v7, %v7432_v9  ;;  %7448 = vadd.xlane.f32.xlu0 %v7441_v25  ;;  %v7477_v7 = vrot.slane %v7909_v55, %v9575_v0  ;;  %v9025_v0 = vld [vmem:[#allocation7 + $0xb0] sm:$0xff]  }
0x153e   :  { %8762 = vmatpush3.bf16.msra.mxu0 %v9025_v0 }
0x153f   :  { %v7440_v8 = vmul.f32 %v10876_v41, %v10876_v41  ;;  %8763 = vmatprep.subr.bf16.mxu0 %v9357_v18 }
0x1541   :  { %7446 = vadd.xlane.f32.xlu0 %v7440_v8 }
0x15c2   :  { %v7445_v24 = vpop.xlane.xlu1 %7444 }
0x15c3   :  { %v7451_v45 = vmul.f32 0.0078125, %v7445_v24 }
0x15c5   :  { %v7455_v33 = vadd.f32 1e-12, %v7451_v45 }
0x15c6   :  { %v7443_v53 = vpop.xlane.xlu1 %7442 }
0x15c7   :  { %v7450_v51 = vmul.f32 0.0078125, %v7443_v53  ;;  %9219 = vrsqrt.f32 %v7455_v33 }
0x15c9   :  { %v7454_v21 = vadd.f32 1e-12, %v7450_v51 }
0x15ca   :  { %v7449_v16 = vpop.xlane.xlu0 %7448 }
0x15cb   :  { %9221 = vrsqrt.f32 %v7454_v21  ;;  %v7453_v12 = vmul.f32 0.0078125, %v7449_v16 }
0x15cd   :  { %v7457_v11 = vadd.f32 1e-12, %v7453_v12 }
0x15ce   :  { %v7447_v43 = vpop.xlane.xlu0 %7446 }
0x15cf   :  { %9223 = vrsqrt.f32 %v7457_v11  ;;  %v7452_v40 = vmul.f32 0.0078125, %v7447_v43 }
0x15d1   :  { %v7456_v29 = vadd.f32 1e-12, %v7452_v40  ;;  %v9220_v57 = vpop.eup %9219 }
0x15d2   :  { %v7463_v49 = vmul.f32 %v9220_v57, %v10864_v58 }
0x15d3   :  { %9225 = vrsqrt.f32 %v7456_v29 }
0x15d4   :  { %v7471_v56 = vmul.f32 %v7469_v17, %v7463_v49 }
0x15d5   :  { %v9222_v10 = vpop.eup %9221 }
0x15d6   :  { %v7462_v44 = vmul.f32 %v9222_v10, %v10868_v34  ;;  %v7479_v13 = vadd.f32 %v7477_v7, %v7471_v56 }
0x15d8   :  { %v7470_v23 = vmul.f32 %v7469_v17, %v7462_v44  ;;  %v7484_v59 = vrot.slane %v7479_v13, 7 }
0x15d9   :  { %v9224_v35 = vpop.eup %9223 }
0x15da   :  { %v7465_v22 = vmul.f32 %v9224_v35, %v10872_v42  ;;  %v7478_v32 = vadd.f32 %v7477_v7, %v7470_v23  ;;  %v9026_v42 = vld [vmem:[#allocation7 + $0xb8] sm:$0xff]  }
0x15db   :  { %8764 = vmatpush3.bf16.msra.mxu0 %v9026_v42 }
0x15dc   :  { %v7473_v62 = vmul.f32 %v7469_v17, %v7465_v22  ;;  %v7486_v34 = vsel %vm7485_vm5, %v7484_v59, %v7478_v32 }
0x15dd   :  { %v9226_v38 = vpop.eup %9225  ;;  %v7541_v48 = vpack.c.bf16 %v7486_v34, %v7486_v34 }
0x15de   :  { %v7464_v19 = vmul.f32 %v9226_v38, %v10876_v41  ;;  %v7481_v31 = vadd.f32 %v7477_v7, %v7473_v62 }
0x15e0   :  { %v7472_v20 = vmul.f32 %v7469_v17, %v7464_v19  ;;  %v7490_v9 = vrot.slane %v7481_v31, 7 }
0x15e2   :  { %v7480_v58 = vadd.f32 %v7477_v7, %v7472_v20 }
0x15e4   :  { %v7491_v25 = vsel %vm7485_vm5, %v7490_v9, %v7480_v58 }
0x15e5   :  { %v7542_v8 = vpack.c.bf16 %v7491_v25, %v7491_v25 }
0x15e7   :  { %7675 = vmatprep.mubr.bf16.mxu1 %v7542_v8 }
0x15e8   :  { %7676 = vmatmul.mubr.bf16.vlgmr.msra.gmra.mrb[100].mxu1 %v7541_v48 }
0x16bb   :  { %v8334_v41 = vpop.f32.mrb[100].mxu1 }
0x16bc   :  { %v8335_v61 = vpop.f32.mrb[101].mxu1 }
0x16bd   :  { %v8336_v36 = vadd.f32 %v8335_v61, %v8334_v41  ;;  %v8337_v50 = vpop.f32.mrb[102].mxu1 }
0x16be   :  { %v8338_v52 = vpop.f32.mrb[103].mxu1 }
0x16bf   :  { %v7678_v2 = vadd.f32 %v8336_v36, %v7546_v26 }
0x16c1   :  { %v7683_v14 = vmax.f32 %v7678_v2, 0.0 }
0x16c3   :  { %v7684_v63 = vpack.c.bf16 %v7683_v14, %v7683_v14 }
0x16c5   :  { %8766 = vmatmul.mubr.bf16.vlgmr.msra.gmra.mrb[92].mxu0 %v7684_v63 }
0x1798   :  { %v7771_v6 = vpop.f32.mrb[92].mxu0 }
0x1799   :  { %v7772_v15 = vadd.f32 %v7771_v6, %v7688_v30  ;;  %v8767_v18 = vpop.f32.mrb[93].mxu0 }
0x179a   :  { %v7774_v28 = vpop.f32.mrb[94].mxu0 }
0x179b   :  { %7777 = vst [vmem:[#allocation10] sm:$0x3] %v7772_v15  ;;  %v8768_v46 = vpop.f32.mrb[95].mxu0 }
0x179c   :  { %9329 = shalt.err (!%p9326_p8)
}
0x179d   :  { %s9330_s11 = scalar_lea.hbm %s10919_s9, 32 }
0x179e   :  { %p9331_p9 = scmp.ne.s32.totalorder %s10919_s9, %s9330_s11  ;;  %p9334_p10 = scmp.lt.u32.totalorder %s9330_s11, %s10919_s9 }
0x17a0   :  { %p9336_p11 = pnand %p9334_p10, %p9331_p9 }
0x17a2   :  { %9339 = shalt.err (!%p9336_p11)
}
0x17a3   :  { %7787 = dma.vmem_to_hbm [thread:$0]  %s7785_s4, 32, %s10919_s9, [#allocation4]  }
0x17a4   :  { %9346 = dma.done.wait [#allocation4], 32  }
0x17a5   :  { %9347 = vsyncadd [#allocation4], 4294967264 }
0x17a6   :  { %7791 = vsyncpa [#allocation3], 1 }
0x17a7   :  { %7792 = vsyncpa [#allocation6], 1 }
0x17a8   :  { %7793 = vsyncpa [#allocation9], 1 }
0x17a9   :  { %7794 = vsyncpa [#allocation4], 1 }

</bundles_post_ra>
